<compile_context>
chip_gen: v7x
topology: tpu7x:2x2x1
jax: 0.10.0
libtpu: 0.0.40
codegen_flags: <defaults>
</compile_context>

<pallas_src>
import functools

import jax
import jax.numpy as jnp
from jax.experimental import pallas as pl
from jax.experimental.pallas import tpu as pltpu


# -----------------------------------------------------------------------------
# Static network dimensions
# -----------------------------------------------------------------------------
CIN, C1, C2, F1 = 3, 32, 64, 512
CIN_PAD = 8          # pad the 3 input channels to 8 (zero weights on the pad)
OUT_PAD = 128        # fc2 output padded to a full lane tile (dense final store)


def _cnn_dims(h, w):
    """Static row-layout constants (per image) for the fused kernel."""
    d = {}
    # stage 1: conv1 on (h, w); activations live as flattened padded rows.
    d["wp1"] = w + 2
    d["r1"] = (h + 2) * (w + 2)            # padded rows per image
    d["e1"] = d["wp1"] + 1                 # extension rows so taps stay in range
    d["x1_rows"] = d["r1"] + 2 * d["e1"]
    d["ho1"], d["wo1"] = h // 2, w // 2
    d["v1_rows"] = d["r1"] - 1 - d["wp1"]  # 2x2-window maxima rows
    # stage 2: conv2 on (h/2, w/2)
    h2, w2 = h // 2, w // 2
    d["wp2"] = w2 + 2
    d["r2"] = (h2 + 2) * (w2 + 2)
    d["e2"] = d["wp2"] + 1
    d["x2_rows"] = d["r2"] + 2 * d["e2"]
    d["ho2"], d["wo2"] = h2 // 2, w2 // 2
    d["v2_rows"] = d["r2"] - 1 - d["wp2"]
    d["pos"] = d["ho2"] * d["wo2"]         # spatial positions feeding fc1
    return d


def prepare_params(p, *, h, w, num_classes):
    """One-time (offline) re-layout of the PyTorch-convention weights."""
    dims = _cnn_dims(h, w)
    # conv taps: OIHW -> rows ordered (tap = dy*3+dx, cin), cols = cout
    w1 = jnp.transpose(p["w1"], (2, 3, 1, 0)).reshape(9, CIN, C1)
    w1 = jnp.pad(w1, ((0, 0), (0, CIN_PAD - CIN), (0, 0)))
    w1 = w1.reshape(9 * CIN_PAD, C1).astype(jnp.bfloat16)
    w2 = (jnp.transpose(p["w2"], (2, 3, 1, 0))
          .reshape(9 * C1, C2).astype(jnp.bfloat16))
    # fc1: PyTorch flattens NCHW (k = c*pos + p); the kernel builds its LHS in
    # (p, c) order, so pre-permute fc1's K axis offline.
    pos = dims["pos"]
    wf1 = (p["fc1_w"].reshape(F1, C2, pos)      # [m, c, p]
           .transpose(2, 1, 0)                  # [p, c, m]
           .reshape(pos * C2, F1).astype(jnp.bfloat16))
    # fc2: [out, in] -> [in, out], outputs padded to a full 128-lane tile.
    wf2 = jnp.pad(p["fc2_w"].T,
                  ((0, 0), (0, OUT_PAD - num_classes))).astype(jnp.bfloat16)
    bf2 = jnp.pad(p["fc2_b"], (0, OUT_PAD - num_classes)).reshape(1, OUT_PAD)
    return {
        "w1": w1, "b1": p["b1"].reshape(1, C1).astype(jnp.float32),
        "w2": w2, "b2": p["b2"].reshape(1, C2).astype(jnp.float32),
        "wf1": wf1, "bf1": p["fc1_b"].reshape(1, F1).astype(jnp.float32),
        "wf2": wf2, "bf2": bf2.astype(jnp.float32),
    }


# -----------------------------------------------------------------------------
# The fused per-image kernel: conv1+pool1+conv2+pool2+fc1+fc2
# -----------------------------------------------------------------------------
def _fused_cnn_kernel(x1_ref, w1_ref, b1_ref, w2_ref, b2_ref,
                      wf1_ref, bf1_ref, wf2_ref, bf2_ref,
                      out_ref, x2_ref, v1_ref, v2_ref, *, dims):
    f32, bf16 = jnp.float32, jnp.bfloat16
    wp1, e1, r1 = dims["wp1"], dims["e1"], dims["r1"]
    wp2, e2, r2 = dims["wp2"], dims["e2"], dims["r2"]

    def im2col(ref, e, wp, rows):
        # 3x3 taps are 9 uniform row shifts in the flattened padded layout;
        # concatenate them along lanes -> ONE large-K matmul per conv.
        pieces = []
        for t in range(9):
            s = e + (t // 3 - 1) * wp + (t % 3 - 1)
            pieces.append(ref[s:s + rows, :])
        return jnp.concatenate(pieces, axis=1)

    # ---- conv1 (3x3, pad=1): single K=72 matmul, bias+ReLU on f32 ----------
    y1 = jnp.dot(im2col(x1_ref, e1, wp1, r1), w1_ref[...],
                 preferred_element_type=f32)
    y1 = jnp.maximum(y1 + b1_ref[...], 0.0)

    # ---- maxpool1 (2x2/2): two shifted maxes, then strided anchor gather ---
    h1 = jnp.maximum(y1[:-1, :], y1[1:, :])
    v1_ref[...] = jnp.maximum(h1[:dims["v1_rows"], :], h1[wp1:, :])

    x2_ref[...] = jnp.zeros_like(x2_ref)       # conv2 'SAME' zero padding
    for io in range(dims["ho1"]):
        # anchors for this pooled row: stride-2 sublane read from v1
        src = v1_ref[pl.ds((2 * io + 1) * wp1 + 1, dims["wo1"], stride=2), :]
        dst = e2 + (io + 1) * wp2 + 1           # contiguous rows in x2 layout
        x2_ref[pl.ds(dst, dims["wo1"]), :] = src.astype(bf16)

    # ---- conv2 (3x3, pad=1): single K=288 matmul, bias+ReLU ----------------
    y2 = jnp.dot(im2col(x2_ref, e2, wp2, r2), w2_ref[...],
                 preferred_element_type=f32)
    y2 = jnp.maximum(y2 + b2_ref[...], 0.0)

    # ---- maxpool2 + flatten straight into fc1's lane-dense (1, pos*C2) LHS -
    h2 = jnp.maximum(y2[:-1, :], y2[1:, :])
    v2_ref[...] = jnp.maximum(h2[:dims["v2_rows"], :], h2[wp2:, :])

    pieces = []
    for io in range(dims["ho2"]):
        for jo in range(dims["wo2"]):
            r = (2 * io + 1) * wp2 + (2 * jo + 1)
            pieces.append(v2_ref[r:r + 1, :])          # one anchor row (1, C2)
    lhs = jnp.concatenate(pieces, axis=1).astype(bf16)  # (1, pos*C2)

    # ---- fc1 (+ReLU) and fc2: single full-K matmuls, lane-dense store ------
    hf = jnp.maximum(jnp.dot(lhs, wf1_ref[...], preferred_element_type=f32)
                     + bf1_ref[...], 0.0)
    out_ref[...] = (jnp.dot(hf.astype(bf16), wf2_ref[...],
                            preferred_element_type=f32) + bf2_ref[...])


def simple_cnn_forward(x_nchw, kp, *, num_classes):
    """Full SimpleCNN forward; all layer compute runs inside one pallas_call."""
    n, _, h, w = x_nchw.shape
    dims = _cnn_dims(h, w)
    # Input re-layout (cheap XLA plumbing on a tiny tensor): NCHW -> NHWC,
    # spatial pad 1, channel pad to 8, flatten per image, add `e1` zero rows on
    # both ends so every 3x3 tap is a uniform row shift.
    xh = jnp.transpose(x_nchw, (0, 2, 3, 1))
    xp = jnp.pad(xh, ((0, 0), (1, 1), (1, 1), (0, CIN_PAD - CIN)))
    x1 = xp.reshape(n, dims["r1"], CIN_PAD)
    x1 = jnp.pad(x1, ((0, 0), (dims["e1"], dims["e1"]), (0, 0))
                 ).astype(jnp.bfloat16)

    def full(shape):
        return pl.BlockSpec(shape, lambda i: (0,) * len(shape))

    out3 = pl.pallas_call(
        functools.partial(_fused_cnn_kernel, dims=dims),
        out_shape=jax.ShapeDtypeStruct((n, 1, OUT_PAD), jnp.float32),
        grid=(n,),
        in_specs=[
            # per-image activation block
            pl.BlockSpec((None, dims["x1_rows"], CIN_PAD), lambda i: (i, 0, 0)),
            # weights / biases stay resident (constant block index)
            full((9 * CIN_PAD, C1)), full((1, C1)),
            full((9 * C1, C2)), full((1, C2)),
            full((dims["pos"] * C2, F1)), full((1, F1)),
            full((F1, OUT_PAD)), full((1, OUT_PAD)),
        ],
        out_specs=pl.BlockSpec((None, 1, OUT_PAD), lambda i: (i, 0, 0)),
        scratch_shapes=[
            pltpu.VMEM((dims["x2_rows"], C1), jnp.bfloat16),   # conv2 input
            pltpu.VMEM((dims["v1_rows"], C1), jnp.float32),    # pool1 maxima
            pltpu.VMEM((dims["v2_rows"], C2), jnp.float32),    # pool2 maxima
        ],
        compiler_params=pltpu.CompilerParams(
            dimension_semantics=("parallel",)),   # both TCs busy on v7x
    )(x1, kp["w1"], kp["b1"], kp["w2"], kp["b2"],
      kp["wf1"], kp["bf1"], kp["wf2"], kp["bf2"])
    return out3.reshape(n, OUT_PAD)[:, :num_classes]


# -----------------------------------------------------------------------------
# Pure-JAX reference (f32, highest precision) for a correctness sanity check.
# -----------------------------------------------------------------------------
def reference_forward(x_nchw, p):
    hi = jax.lax.Precision.HIGHEST

    def conv(x, w, b):
        y = jax.lax.conv_general_dilated(
            x, w, window_strides=(1, 1), padding="SAME",
            dimension_numbers=("NCHW", "OIHW", "NCHW"), precision=hi)
        return jnp.maximum(y + b[None, :, None, None], 0.0)

    def pool(x):
        return jax.lax.reduce_window(x, -jnp.inf, jax.lax.max,
                                     (1, 1, 2, 2), (1, 1, 2, 2), "VALID")

    y = pool(conv(x_nchw, p["w1"], p["b1"]))
    y = pool(conv(y, p["w2"], p["b2"]))
    y = y.reshape(y.shape[0], -1)
    y = jnp.maximum(jnp.dot(y, p["fc1_w"].T, precision=hi) + p["fc1_b"], 0.0)
    return jnp.dot(y, p["fc2_w"].T, precision=hi) + p["fc2_b"]


if __name__ == "__main__":
    # Small shapes consistent with the module: batch=2, 3 input channels,
    # 16x16 spatial (two 2x2 pools -> 4x4), so fc1 in_features = 64*4*4.
    N, H, W = 2, 16, 16
    num_classes = 10
    fc_in = C2 * (H // 4) * (W // 4)

    key = jax.random.PRNGKey(0)
    ks = jax.random.split(key, 9)
    params = {
        "w1":    jax.random.normal(ks[0], (C1, CIN, 3, 3), jnp.float32) * 0.10,
        "b1":    jax.random.normal(ks[1], (C1,), jnp.float32) * 0.10,
        "w2":    jax.random.normal(ks[2], (C2, C1, 3, 3), jnp.float32) * 0.05,
        "b2":    jax.random.normal(ks[3], (C2,), jnp.float32) * 0.05,
        "fc1_w": jax.random.normal(ks[4], (F1, fc_in), jnp.float32) * 0.02,
        "fc1_b": jax.random.normal(ks[5], (F1,), jnp.float32) * 0.02,
        "fc2_w": jax.random.normal(ks[6], (num_classes, F1), jnp.float32) * 0.05,
        "fc2_b": jax.random.normal(ks[7], (num_classes,), jnp.float32) * 0.05,
    }
    x = jax.random.normal(ks[8], (N, CIN, H, W), jnp.float32)   # NCHW like PyTorch

    kparams = prepare_params(params, h=H, w=W, num_classes=num_classes)
    fwd = jax.jit(functools.partial(simple_cnn_forward, num_classes=num_classes))

    out = jax.block_until_ready(fwd(x, kparams))
    ref = jax.block_until_ready(reference_forward(x, params))

    assert out.shape == (N, num_classes), out.shape
    # bf16 MXU operands with f32 accumulation -> compare at bf16-level tolerance.
    assert jnp.allclose(out, ref, rtol=2e-2, atol=2e-2), (
        f"max abs diff = {jnp.max(jnp.abs(out - ref))}")
    print("KERNEL_OK")
</pallas_src>

<mosaic_0001>
module attributes {stable_mosaic.version = 11 : i64} {
  func.func @_fused_cnn_kernel(%arg0: i32, %arg1: memref<1x362x8xbf16, #tpu.memory_space<vmem>>, %arg2: memref<72x32xbf16, #tpu.memory_space<vmem>>, %arg3: memref<1x32xf32, #tpu.memory_space<vmem>>, %arg4: memref<288x64xbf16, #tpu.memory_space<vmem>>, %arg5: memref<1x64xf32, #tpu.memory_space<vmem>>, %arg6: memref<1024x512xbf16, #tpu.memory_space<vmem>>, %arg7: memref<1x512xf32, #tpu.memory_space<vmem>>, %arg8: memref<512x128xbf16, #tpu.memory_space<vmem>>, %arg9: memref<1x128xf32, #tpu.memory_space<vmem>>, %arg10: memref<1x1x128xf32, #tpu.memory_space<vmem>>, %arg11: memref<122x32xbf16, #tpu.memory_space<vmem>>, %arg12: memref<305x32xf32, #tpu.memory_space<vmem>>, %arg13: memref<89x64xf32, #tpu.memory_space<vmem>>) attributes {dimension_semantics = [#tpu.dimension_semantics<parallel>], iteration_bounds = array<i64: 2>, scalar_prefetch = 0 : i64, scratch_operands = 3 : i64, tpu.core_type = #tpu.core_type<tc>, window_params = [{transform_indices = @transform_0, window_bounds = array<i64: 1, 362, 8>}, {pipeline_mode = #tpu.pipeline_mode<synchronous>, transform_indices = @transform_1, window_bounds = array<i64: 72, 32>}, {pipeline_mode = #tpu.pipeline_mode<synchronous>, transform_indices = @transform_2, window_bounds = array<i64: 1, 32>}, {pipeline_mode = #tpu.pipeline_mode<synchronous>, transform_indices = @transform_3, window_bounds = array<i64: 288, 64>}, {pipeline_mode = #tpu.pipeline_mode<synchronous>, transform_indices = @transform_4, window_bounds = array<i64: 1, 64>}, {pipeline_mode = #tpu.pipeline_mode<synchronous>, transform_indices = @transform_5, window_bounds = array<i64: 1024, 512>}, {pipeline_mode = #tpu.pipeline_mode<synchronous>, transform_indices = @transform_6, window_bounds = array<i64: 1, 512>}, {pipeline_mode = #tpu.pipeline_mode<synchronous>, transform_indices = @transform_7, window_bounds = array<i64: 512, 128>}, {pipeline_mode = #tpu.pipeline_mode<synchronous>, transform_indices = @transform_8, window_bounds = array<i64: 1, 128>}, {transform_indices = @transform_9, window_bounds = array<i64: 1, 1, 128>}]} {
    %c0 = arith.constant 0 : index
    %c0_0 = arith.constant 0 : index
    %c0_1 = arith.constant 0 : index
    %0 = vector.load %arg1[%c0, %c0_0, %c0_1] : memref<1x362x8xbf16, #tpu.memory_space<vmem>>, vector<1x324x8xbf16>
    %1 = vector.shape_cast %0 : vector<1x324x8xbf16> to vector<324x8xbf16>
    %c0_2 = arith.constant 0 : index
    %c1 = arith.constant 1 : index
    %c0_3 = arith.constant 0 : index
    %2 = vector.load %arg1[%c0_2, %c1, %c0_3] : memref<1x362x8xbf16, #tpu.memory_space<vmem>>, vector<1x324x8xbf16>
    %3 = vector.shape_cast %2 : vector<1x324x8xbf16> to vector<324x8xbf16>
    %c0_4 = arith.constant 0 : index
    %c2 = arith.constant 2 : index
    %c0_5 = arith.constant 0 : index
    %4 = vector.load %arg1[%c0_4, %c2, %c0_5] : memref<1x362x8xbf16, #tpu.memory_space<vmem>>, vector<1x324x8xbf16>
    %5 = vector.shape_cast %4 : vector<1x324x8xbf16> to vector<324x8xbf16>
    %c0_6 = arith.constant 0 : index
    %c18 = arith.constant 18 : index
    %c0_7 = arith.constant 0 : index
    %6 = vector.load %arg1[%c0_6, %c18, %c0_7] : memref<1x362x8xbf16, #tpu.memory_space<vmem>>, vector<1x324x8xbf16>
    %7 = vector.shape_cast %6 : vector<1x324x8xbf16> to vector<324x8xbf16>
    %c0_8 = arith.constant 0 : index
    %c19 = arith.constant 19 : index
    %c0_9 = arith.constant 0 : index
    %8 = vector.load %arg1[%c0_8, %c19, %c0_9] : memref<1x362x8xbf16, #tpu.memory_space<vmem>>, vector<1x324x8xbf16>
    %9 = vector.shape_cast %8 : vector<1x324x8xbf16> to vector<324x8xbf16>
    %c0_10 = arith.constant 0 : index
    %c20 = arith.constant 20 : index
    %c0_11 = arith.constant 0 : index
    %10 = vector.load %arg1[%c0_10, %c20, %c0_11] : memref<1x362x8xbf16, #tpu.memory_space<vmem>>, vector<1x324x8xbf16>
    %11 = vector.shape_cast %10 : vector<1x324x8xbf16> to vector<324x8xbf16>
    %c0_12 = arith.constant 0 : index
    %c36 = arith.constant 36 : index
    %c0_13 = arith.constant 0 : index
    %12 = vector.load %arg1[%c0_12, %c36, %c0_13] : memref<1x362x8xbf16, #tpu.memory_space<vmem>>, vector<1x324x8xbf16>
    %13 = vector.shape_cast %12 : vector<1x324x8xbf16> to vector<324x8xbf16>
    %c0_14 = arith.constant 0 : index
    %c37 = arith.constant 37 : index
    %c0_15 = arith.constant 0 : index
    %14 = vector.load %arg1[%c0_14, %c37, %c0_15] : memref<1x362x8xbf16, #tpu.memory_space<vmem>>, vector<1x324x8xbf16>
    %15 = vector.shape_cast %14 : vector<1x324x8xbf16> to vector<324x8xbf16>
    %c0_16 = arith.constant 0 : index
    %c38 = arith.constant 38 : index
    %c0_17 = arith.constant 0 : index
    %16 = vector.load %arg1[%c0_16, %c38, %c0_17] : memref<1x362x8xbf16, #tpu.memory_space<vmem>>, vector<1x324x8xbf16>
    %17 = vector.shape_cast %16 : vector<1x324x8xbf16> to vector<324x8xbf16>
    %18 = tpu.concatenate %1, %3, %5, %7, %9, %11, %13, %15, %17 in 1 : vector<324x8xbf16>, vector<324x8xbf16>, vector<324x8xbf16>, vector<324x8xbf16>, vector<324x8xbf16>, vector<324x8xbf16>, vector<324x8xbf16>, vector<324x8xbf16>, vector<324x8xbf16> -> vector<324x72xbf16>
    %c0_18 = arith.constant 0 : index
    %c0_19 = arith.constant 0 : index
    %19 = vector.load %arg2[%c0_18, %c0_19] : memref<72x32xbf16, #tpu.memory_space<vmem>>, vector<72x32xbf16>
    %cst = arith.constant dense<0.000000e+00> : vector<324x32xf32>
    %20 = tpu.matmul %18, %19, %cst {dimension_numbers = #tpu.dot_dimension_numbers<[1], [0], [0], [1], [0, 0, 1, 1], [], []>} : vector<324x72xbf16>, vector<72x32xbf16>, vector<324x32xf32> -> vector<324x32xf32>
    %c0_20 = arith.constant 0 : index
    %c0_21 = arith.constant 0 : index
    %21 = vector.load %arg3[%c0_20, %c0_21] : memref<1x32xf32, #tpu.memory_space<vmem>>, vector<1x32xf32>
    %22 = vector.broadcast %21 : vector<1x32xf32> to vector<324x32xf32>
    %23 = arith.addf %20, %22 : vector<324x32xf32>
    %cst_22 = arith.constant 0.000000e+00 : f32
    %24 = vector.broadcast %cst_22 : f32 to vector<324x32xf32>
    %25 = arith.maximumf %23, %24 : vector<324x32xf32>
    %26 = vector.extract_strided_slice %25 {offsets = [0, 0], sizes = [323, 32], strides = [1, 1]} : vector<324x32xf32> to vector<323x32xf32>
    %27 = vector.extract_strided_slice %25 {offsets = [1, 0], sizes = [323, 32], strides = [1, 1]} : vector<324x32xf32> to vector<323x32xf32>
    %28 = arith.maximumf %26, %27 : vector<323x32xf32>
    %29 = vector.extract_strided_slice %28 {offsets = [0, 0], sizes = [305, 32], strides = [1, 1]} : vector<323x32xf32> to vector<305x32xf32>
    %30 = vector.extract_strided_slice %28 {offsets = [18, 0], sizes = [305, 32], strides = [1, 1]} : vector<323x32xf32> to vector<305x32xf32>
    %31 = arith.maximumf %29, %30 : vector<305x32xf32>
    %c0_23 = arith.constant 0 : index
    %c0_24 = arith.constant 0 : index
    %32 = vector.load %arg12[%c0_23, %c0_24] : memref<305x32xf32, #tpu.memory_space<vmem>>, vector<305x32xf32>
    tpu.vector_store %arg12[%c0_23, %c0_24], %31 {strides = array<i32>} : memref<305x32xf32, #tpu.memory_space<vmem>>, vector<305x32xf32>,
    %cst_25 = arith.constant 0.000000e+00 : bf16
    %33 = vector.broadcast %cst_25 : bf16 to vector<122x32xbf16>
    %c0_26 = arith.constant 0 : index
    %c0_27 = arith.constant 0 : index
    %34 = vector.load %arg11[%c0_26, %c0_27] : memref<122x32xbf16, #tpu.memory_space<vmem>>, vector<122x32xbf16>
    tpu.vector_store %arg11[%c0_26, %c0_27], %33 {strides = array<i32>} : memref<122x32xbf16, #tpu.memory_space<vmem>>, vector<122x32xbf16>,
    %c19_28 = arith.constant 19 : index
    %c0_29 = arith.constant 0 : index
    %35 = tpu.strided_load %arg12[%c19_28, %c0_29] {strides = array<i32: 2, 1>} : memref<305x32xf32, #tpu.memory_space<vmem>>, vector<8x32xf32>
    %36 = arith.truncf %35 : vector<8x32xf32> to vector<8x32xbf16>
    %c22 = arith.constant 22 : index
    %c0_30 = arith.constant 0 : index
    %37 = vector.load %arg11[%c22, %c0_30] : memref<122x32xbf16, #tpu.memory_space<vmem>>, vector<8x32xbf16>
    tpu.vector_store %arg11[%c22, %c0_30], %36 {strides = array<i32>} : memref<122x32xbf16, #tpu.memory_space<vmem>>, vector<8x32xbf16>,
    %c55 = arith.constant 55 : index
    %c0_31 = arith.constant 0 : index
    %38 = tpu.strided_load %arg12[%c55, %c0_31] {strides = array<i32: 2, 1>} : memref<305x32xf32, #tpu.memory_space<vmem>>, vector<8x32xf32>
    %39 = arith.truncf %38 : vector<8x32xf32> to vector<8x32xbf16>
    %c32 = arith.constant 32 : index
    %c0_32 = arith.constant 0 : index
    %40 = vector.load %arg11[%c32, %c0_32] : memref<122x32xbf16, #tpu.memory_space<vmem>>, vector<8x32xbf16>
    tpu.vector_store %arg11[%c32, %c0_32], %39 {strides = array<i32>} : memref<122x32xbf16, #tpu.memory_space<vmem>>, vector<8x32xbf16>,
    %c91 = arith.constant 91 : index
    %c0_33 = arith.constant 0 : index
    %41 = tpu.strided_load %arg12[%c91, %c0_33] {strides = array<i32: 2, 1>} : memref<305x32xf32, #tpu.memory_space<vmem>>, vector<8x32xf32>
    %42 = arith.truncf %41 : vector<8x32xf32> to vector<8x32xbf16>
    %c42 = arith.constant 42 : index
    %c0_34 = arith.constant 0 : index
    %43 = vector.load %arg11[%c42, %c0_34] : memref<122x32xbf16, #tpu.memory_space<vmem>>, vector<8x32xbf16>
    tpu.vector_store %arg11[%c42, %c0_34], %42 {strides = array<i32>} : memref<122x32xbf16, #tpu.memory_space<vmem>>, vector<8x32xbf16>,
    %c127 = arith.constant 127 : index
    %c0_35 = arith.constant 0 : index
    %44 = tpu.strided_load %arg12[%c127, %c0_35] {strides = array<i32: 2, 1>} : memref<305x32xf32, #tpu.memory_space<vmem>>, vector<8x32xf32>
    %45 = arith.truncf %44 : vector<8x32xf32> to vector<8x32xbf16>
    %c52 = arith.constant 52 : index
    %c0_36 = arith.constant 0 : index
    %46 = vector.load %arg11[%c52, %c0_36] : memref<122x32xbf16, #tpu.memory_space<vmem>>, vector<8x32xbf16>
    tpu.vector_store %arg11[%c52, %c0_36], %45 {strides = array<i32>} : memref<122x32xbf16, #tpu.memory_space<vmem>>, vector<8x32xbf16>,
    %c163 = arith.constant 163 : index
    %c0_37 = arith.constant 0 : index
    %47 = tpu.strided_load %arg12[%c163, %c0_37] {strides = array<i32: 2, 1>} : memref<305x32xf32, #tpu.memory_space<vmem>>, vector<8x32xf32>
    %48 = arith.truncf %47 : vector<8x32xf32> to vector<8x32xbf16>
    %c62 = arith.constant 62 : index
    %c0_38 = arith.constant 0 : index
    %49 = vector.load %arg11[%c62, %c0_38] : memref<122x32xbf16, #tpu.memory_space<vmem>>, vector<8x32xbf16>
    tpu.vector_store %arg11[%c62, %c0_38], %48 {strides = array<i32>} : memref<122x32xbf16, #tpu.memory_space<vmem>>, vector<8x32xbf16>,
    %c199 = arith.constant 199 : index
    %c0_39 = arith.constant 0 : index
    %50 = tpu.strided_load %arg12[%c199, %c0_39] {strides = array<i32: 2, 1>} : memref<305x32xf32, #tpu.memory_space<vmem>>, vector<8x32xf32>
    %51 = arith.truncf %50 : vector<8x32xf32> to vector<8x32xbf16>
    %c72 = arith.constant 72 : index
    %c0_40 = arith.constant 0 : index
    %52 = vector.load %arg11[%c72, %c0_40] : memref<122x32xbf16, #tpu.memory_space<vmem>>, vector<8x32xbf16>
    tpu.vector_store %arg11[%c72, %c0_40], %51 {strides = array<i32>} : memref<122x32xbf16, #tpu.memory_space<vmem>>, vector<8x32xbf16>,
    %c235 = arith.constant 235 : index
    %c0_41 = arith.constant 0 : index
    %53 = tpu.strided_load %arg12[%c235, %c0_41] {strides = array<i32: 2, 1>} : memref<305x32xf32, #tpu.memory_space<vmem>>, vector<8x32xf32>
    %54 = arith.truncf %53 : vector<8x32xf32> to vector<8x32xbf16>
    %c82 = arith.constant 82 : index
    %c0_42 = arith.constant 0 : index
    %55 = vector.load %arg11[%c82, %c0_42] : memref<122x32xbf16, #tpu.memory_space<vmem>>, vector<8x32xbf16>
    tpu.vector_store %arg11[%c82, %c0_42], %54 {strides = array<i32>} : memref<122x32xbf16, #tpu.memory_space<vmem>>, vector<8x32xbf16>,
    %c271 = arith.constant 271 : index
    %c0_43 = arith.constant 0 : index
    %56 = tpu.strided_load %arg12[%c271, %c0_43] {strides = array<i32: 2, 1>} : memref<305x32xf32, #tpu.memory_space<vmem>>, vector<8x32xf32>
    %57 = arith.truncf %56 : vector<8x32xf32> to vector<8x32xbf16>
    %c92 = arith.constant 92 : index
    %c0_44 = arith.constant 0 : index
    %58 = vector.load %arg11[%c92, %c0_44] : memref<122x32xbf16, #tpu.memory_space<vmem>>, vector<8x32xbf16>
    tpu.vector_store %arg11[%c92, %c0_44], %57 {strides = array<i32>} : memref<122x32xbf16, #tpu.memory_space<vmem>>, vector<8x32xbf16>,
    %c0_45 = arith.constant 0 : index
    %c0_46 = arith.constant 0 : index
    %59 = vector.load %arg11[%c0_45, %c0_46] : memref<122x32xbf16, #tpu.memory_space<vmem>>, vector<100x32xbf16>
    %c1_47 = arith.constant 1 : index
    %c0_48 = arith.constant 0 : index
    %60 = vector.load %arg11[%c1_47, %c0_48] : memref<122x32xbf16, #tpu.memory_space<vmem>>, vector<100x32xbf16>
    %c2_49 = arith.constant 2 : index
    %c0_50 = arith.constant 0 : index
    %61 = vector.load %arg11[%c2_49, %c0_50] : memref<122x32xbf16, #tpu.memory_space<vmem>>, vector<100x32xbf16>
    %c10 = arith.constant 10 : index
    %c0_51 = arith.constant 0 : index
    %62 = vector.load %arg11[%c10, %c0_51] : memref<122x32xbf16, #tpu.memory_space<vmem>>, vector<100x32xbf16>
    %c11 = arith.constant 11 : index
    %c0_52 = arith.constant 0 : index
    %63 = vector.load %arg11[%c11, %c0_52] : memref<122x32xbf16, #tpu.memory_space<vmem>>, vector<100x32xbf16>
    %c12 = arith.constant 12 : index
    %c0_53 = arith.constant 0 : index
    %64 = vector.load %arg11[%c12, %c0_53] : memref<122x32xbf16, #tpu.memory_space<vmem>>, vector<100x32xbf16>
    %c20_54 = arith.constant 20 : index
    %c0_55 = arith.constant 0 : index
    %65 = vector.load %arg11[%c20_54, %c0_55] : memref<122x32xbf16, #tpu.memory_space<vmem>>, vector<100x32xbf16>
    %c21 = arith.constant 21 : index
    %c0_56 = arith.constant 0 : index
    %66 = vector.load %arg11[%c21, %c0_56] : memref<122x32xbf16, #tpu.memory_space<vmem>>, vector<100x32xbf16>
    %c22_57 = arith.constant 22 : index
    %c0_58 = arith.constant 0 : index
    %67 = vector.load %arg11[%c22_57, %c0_58] : memref<122x32xbf16, #tpu.memory_space<vmem>>, vector<100x32xbf16>
    %68 = tpu.concatenate %59, %60, %61, %62, %63, %64, %65, %66, %67 in 1 : vector<100x32xbf16>, vector<100x32xbf16>, vector<100x32xbf16>, vector<100x32xbf16>, vector<100x32xbf16>, vector<100x32xbf16>, vector<100x32xbf16>, vector<100x32xbf16>, vector<100x32xbf16> -> vector<100x288xbf16>
    %c0_59 = arith.constant 0 : index
    %c0_60 = arith.constant 0 : index
    %69 = vector.load %arg4[%c0_59, %c0_60] : memref<288x64xbf16, #tpu.memory_space<vmem>>, vector<288x64xbf16>
    %cst_61 = arith.constant dense<0.000000e+00> : vector<100x64xf32>
    %70 = tpu.matmul %68, %69, %cst_61 {dimension_numbers = #tpu.dot_dimension_numbers<[1], [0], [0], [1], [0, 0, 1, 1], [], []>} : vector<100x288xbf16>, vector<288x64xbf16>, vector<100x64xf32> -> vector<100x64xf32>
    %c0_62 = arith.constant 0 : index
    %c0_63 = arith.constant 0 : index
    %71 = vector.load %arg5[%c0_62, %c0_63] : memref<1x64xf32, #tpu.memory_space<vmem>>, vector<1x64xf32>
    %72 = vector.broadcast %71 : vector<1x64xf32> to vector<100x64xf32>
    %73 = arith.addf %70, %72 : vector<100x64xf32>
    %cst_64 = arith.constant 0.000000e+00 : f32
    %74 = vector.broadcast %cst_64 : f32 to vector<100x64xf32>
    %75 = arith.maximumf %73, %74 : vector<100x64xf32>
    %76 = vector.extract_strided_slice %75 {offsets = [0, 0], sizes = [99, 64], strides = [1, 1]} : vector<100x64xf32> to vector<99x64xf32>
    %77 = vector.extract_strided_slice %75 {offsets = [1, 0], sizes = [99, 64], strides = [1, 1]} : vector<100x64xf32> to vector<99x64xf32>
    %78 = arith.maximumf %76, %77 : vector<99x64xf32>
    %79 = vector.extract_strided_slice %78 {offsets = [0, 0], sizes = [89, 64], strides = [1, 1]} : vector<99x64xf32> to vector<89x64xf32>
    %80 = vector.extract_strided_slice %78 {offsets = [10, 0], sizes = [89, 64], strides = [1, 1]} : vector<99x64xf32> to vector<89x64xf32>
    %81 = arith.maximumf %79, %80 : vector<89x64xf32>
    %c0_65 = arith.constant 0 : index
    %c0_66 = arith.constant 0 : index
    %82 = vector.load %arg13[%c0_65, %c0_66] : memref<89x64xf32, #tpu.memory_space<vmem>>, vector<89x64xf32>
    tpu.vector_store %arg13[%c0_65, %c0_66], %81 {strides = array<i32>} : memref<89x64xf32, #tpu.memory_space<vmem>>, vector<89x64xf32>,
    %c11_67 = arith.constant 11 : index
    %c0_68 = arith.constant 0 : index
    %83 = vector.load %arg13[%c11_67, %c0_68] : memref<89x64xf32, #tpu.memory_space<vmem>>, vector<1x64xf32>
    %c13 = arith.constant 13 : index
    %c0_69 = arith.constant 0 : index
    %84 = vector.load %arg13[%c13, %c0_69] : memref<89x64xf32, #tpu.memory_space<vmem>>, vector<1x64xf32>
    %c15 = arith.constant 15 : index
    %c0_70 = arith.constant 0 : index
    %85 = vector.load %arg13[%c15, %c0_70] : memref<89x64xf32, #tpu.memory_space<vmem>>, vector<1x64xf32>
    %c17 = arith.constant 17 : index
    %c0_71 = arith.constant 0 : index
    %86 = vector.load %arg13[%c17, %c0_71] : memref<89x64xf32, #tpu.memory_space<vmem>>, vector<1x64xf32>
    %c31 = arith.constant 31 : index
    %c0_72 = arith.constant 0 : index
    %87 = vector.load %arg13[%c31, %c0_72] : memref<89x64xf32, #tpu.memory_space<vmem>>, vector<1x64xf32>
    %c33 = arith.constant 33 : index
    %c0_73 = arith.constant 0 : index
    %88 = vector.load %arg13[%c33, %c0_73] : memref<89x64xf32, #tpu.memory_space<vmem>>, vector<1x64xf32>
    %c35 = arith.constant 35 : index
    %c0_74 = arith.constant 0 : index
    %89 = vector.load %arg13[%c35, %c0_74] : memref<89x64xf32, #tpu.memory_space<vmem>>, vector<1x64xf32>
    %c37_75 = arith.constant 37 : index
    %c0_76 = arith.constant 0 : index
    %90 = vector.load %arg13[%c37_75, %c0_76] : memref<89x64xf32, #tpu.memory_space<vmem>>, vector<1x64xf32>
    %c51 = arith.constant 51 : index
    %c0_77 = arith.constant 0 : index
    %91 = vector.load %arg13[%c51, %c0_77] : memref<89x64xf32, #tpu.memory_space<vmem>>, vector<1x64xf32>
    %c53 = arith.constant 53 : index
    %c0_78 = arith.constant 0 : index
    %92 = vector.load %arg13[%c53, %c0_78] : memref<89x64xf32, #tpu.memory_space<vmem>>, vector<1x64xf32>
    %c55_79 = arith.constant 55 : index
    %c0_80 = arith.constant 0 : index
    %93 = vector.load %arg13[%c55_79, %c0_80] : memref<89x64xf32, #tpu.memory_space<vmem>>, vector<1x64xf32>
    %c57 = arith.constant 57 : index
    %c0_81 = arith.constant 0 : index
    %94 = vector.load %arg13[%c57, %c0_81] : memref<89x64xf32, #tpu.memory_space<vmem>>, vector<1x64xf32>
    %c71 = arith.constant 71 : index
    %c0_82 = arith.constant 0 : index
    %95 = vector.load %arg13[%c71, %c0_82] : memref<89x64xf32, #tpu.memory_space<vmem>>, vector<1x64xf32>
    %c73 = arith.constant 73 : index
    %c0_83 = arith.constant 0 : index
    %96 = vector.load %arg13[%c73, %c0_83] : memref<89x64xf32, #tpu.memory_space<vmem>>, vector<1x64xf32>
    %c75 = arith.constant 75 : index
    %c0_84 = arith.constant 0 : index
    %97 = vector.load %arg13[%c75, %c0_84] : memref<89x64xf32, #tpu.memory_space<vmem>>, vector<1x64xf32>
    %c77 = arith.constant 77 : index
    %c0_85 = arith.constant 0 : index
    %98 = vector.load %arg13[%c77, %c0_85] : memref<89x64xf32, #tpu.memory_space<vmem>>, vector<1x64xf32>
    %99 = tpu.concatenate %83, %84, %85, %86, %87, %88, %89, %90, %91, %92, %93, %94, %95, %96, %97, %98 in 1 : vector<1x64xf32>, vector<1x64xf32>, vector<1x64xf32>, vector<1x64xf32>, vector<1x64xf32>, vector<1x64xf32>, vector<1x64xf32>, vector<1x64xf32>, vector<1x64xf32>, vector<1x64xf32>, vector<1x64xf32>, vector<1x64xf32>, vector<1x64xf32>, vector<1x64xf32>, vector<1x64xf32>, vector<1x64xf32> -> vector<1x1024xf32>
    %100 = arith.truncf %99 : vector<1x1024xf32> to vector<1x1024xbf16>
    %c0_86 = arith.constant 0 : index
    %c0_87 = arith.constant 0 : index
    %101 = vector.load %arg6[%c0_86, %c0_87] : memref<1024x512xbf16, #tpu.memory_space<vmem>>, vector<1024x512xbf16>
    %cst_88 = arith.constant dense<0.000000e+00> : vector<1x512xf32>
    %102 = tpu.matmul %100, %101, %cst_88 {dimension_numbers = #tpu.dot_dimension_numbers<[1], [0], [0], [1], [0, 0, 1, 1], [], []>} : vector<1x1024xbf16>, vector<1024x512xbf16>, vector<1x512xf32> -> vector<1x512xf32>
    %c0_89 = arith.constant 0 : index
    %c0_90 = arith.constant 0 : index
    %103 = vector.load %arg7[%c0_89, %c0_90] : memref<1x512xf32, #tpu.memory_space<vmem>>, vector<1x512xf32>
    %104 = arith.addf %102, %103 : vector<1x512xf32>
    %cst_91 = arith.constant 0.000000e+00 : f32
    %105 = vector.broadcast %cst_91 : f32 to vector<1x512xf32>
    %106 = arith.maximumf %104, %105 : vector<1x512xf32>
    %107 = arith.truncf %106 : vector<1x512xf32> to vector<1x512xbf16>
    %c0_92 = arith.constant 0 : index
    %c0_93 = arith.constant 0 : index
    %108 = vector.load %arg8[%c0_92, %c0_93] : memref<512x128xbf16, #tpu.memory_space<vmem>>, vector<512x128xbf16>
    %cst_94 = arith.constant dense<0.000000e+00> : vector<1x128xf32>
    %109 = tpu.matmul %107, %108, %cst_94 {dimension_numbers = #tpu.dot_dimension_numbers<[1], [0], [0], [1], [0, 0, 1, 1], [], []>} : vector<1x512xbf16>, vector<512x128xbf16>, vector<1x128xf32> -> vector<1x128xf32>
    %c0_95 = arith.constant 0 : index
    %c0_96 = arith.constant 0 : index
    %110 = vector.load %arg9[%c0_95, %c0_96] : memref<1x128xf32, #tpu.memory_space<vmem>>, vector<1x128xf32>
    %111 = arith.addf %109, %110 : vector<1x128xf32>
    %c0_97 = arith.constant 0 : index
    %c0_98 = arith.constant 0 : index
    %c0_99 = arith.constant 0 : index
    %112 = vector.load %arg10[%c0_97, %c0_98, %c0_99] : memref<1x1x128xf32, #tpu.memory_space<vmem>>, vector<1x1x128xf32>
    %113 = vector.shape_cast %112 : vector<1x1x128xf32> to vector<1x128xf32>
    %114 = vector.shape_cast %111 : vector<1x128xf32> to vector<1x1x128xf32>
    tpu.vector_store %arg10[%c0_97, %c0_98, %c0_99], %114 {strides = array<i32>} : memref<1x1x128xf32, #tpu.memory_space<vmem>>, vector<1x1x128xf32>,
    return
  }
  func.func @transform_0(%arg0: i32) -> (i32, i32, i32) {
    %c0_i32 = arith.constant 0 : i32
    %c0_i32_0 = arith.constant 0 : i32
    %c0_i32_1 = arith.constant 0 : i32
    return %arg0, %c0_i32, %c0_i32_0 : i32, i32, i32
  }
  func.func @transform_1(%arg0: i32) -> (i32, i32) {
    %c0_i32 = arith.constant 0 : i32
    %c0_i32_0 = arith.constant 0 : i32
    %c0_i32_1 = arith.constant 0 : i32
    return %c0_i32, %c0_i32_0 : i32, i32
  }
  func.func @transform_2(%arg0: i32) -> (i32, i32) {
    %c0_i32 = arith.constant 0 : i32
    %c0_i32_0 = arith.constant 0 : i32
    %c0_i32_1 = arith.constant 0 : i32
    return %c0_i32, %c0_i32_0 : i32, i32
  }
  func.func @transform_3(%arg0: i32) -> (i32, i32) {
    %c0_i32 = arith.constant 0 : i32
    %c0_i32_0 = arith.constant 0 : i32
    %c0_i32_1 = arith.constant 0 : i32
    return %c0_i32, %c0_i32_0 : i32, i32
  }
  func.func @transform_4(%arg0: i32) -> (i32, i32) {
    %c0_i32 = arith.constant 0 : i32
    %c0_i32_0 = arith.constant 0 : i32
    %c0_i32_1 = arith.constant 0 : i32
    return %c0_i32, %c0_i32_0 : i32, i32
  }
  func.func @transform_5(%arg0: i32) -> (i32, i32) {
    %c0_i32 = arith.constant 0 : i32
    %c0_i32_0 = arith.constant 0 : i32
    %c0_i32_1 = arith.constant 0 : i32
    return %c0_i32, %c0_i32_0 : i32, i32
  }
  func.func @transform_6(%arg0: i32) -> (i32, i32) {
    %c0_i32 = arith.constant 0 : i32
    %c0_i32_0 = arith.constant 0 : i32
    %c0_i32_1 = arith.constant 0 : i32
    return %c0_i32, %c0_i32_0 : i32, i32
  }
  func.func @transform_7(%arg0: i32) -> (i32, i32) {
    %c0_i32 = arith.constant 0 : i32
    %c0_i32_0 = arith.constant 0 : i32
    %c0_i32_1 = arith.constant 0 : i32
    return %c0_i32, %c0_i32_0 : i32, i32
  }
  func.func @transform_8(%arg0: i32) -> (i32, i32) {
    %c0_i32 = arith.constant 0 : i32
    %c0_i32_0 = arith.constant 0 : i32
    %c0_i32_1 = arith.constant 0 : i32
    return %c0_i32, %c0_i32_0 : i32, i32
  }
  func.func @transform_9(%arg0: i32) -> (i32, i32, i32) {
    %c0_i32 = arith.constant 0 : i32
    %c0_i32_0 = arith.constant 0 : i32
    %c0_i32_1 = arith.constant 0 : i32
    return %arg0, %c0_i32, %c0_i32_0 : i32, i32, i32
  }
}

</mosaic_0001>

<bundles_post_ra>
// kernel: simple_cnn_forward.1
= control target key start
LH: loop header
LB: loop body
LE: loop exit
PB: predicated region body
PF: predicated region fallthrough
CT: control target
= control target key end

     0   :  { %14 = vsyncpa [#allocation6], 0  ;;  %s9576_s0 = inlined_call_operand.vmem [shape: bf16[2,362,8], index: 0, kind: input, shape index: {}]   ;;  %s9577_s1 = inlined_call_operand.vmem [shape: bf16[72,32], index: 1, kind: input, shape index: {}]   ;;  %s9578_s2 = inlined_call_operand.vmem [shape: f32[1,32], index: 2, kind: input, shape index: {}]   ;;  %s9579_s3 = inlined_call_operand.vmem [shape: bf16[288,64], index: 3, kind: input, shape index: {}]   ;;  %s9580_s4 = inlined_call_operand.vmem [shape: f32[1,64], index: 4, kind: input, shape index: {}]   ;;  %s9581_s5 = inlined_call_operand.hbm [shape: bf16[1024,512], index: 5, kind: input, shape index: {}]   ;;  %s9582_s6 = inlined_call_operand.vmem [shape: f32[1,512], index: 6, kind: input, shape index: {}]   ;;  %s9583_s7 = inlined_call_operand.vmem [shape: bf16[512,128], index: 7, kind: input, shape index: {}]   ;;  %s9584_s8 = inlined_call_operand.vmem [shape: f32[1,128], index: 8, kind: input, shape index: {}]   ;;  %s9585_s9 = inlined_call_operand.hbm [shape: f32[2,1,128], index: 9, kind: output, shape index: {}]  }
   0x1   :  { %15 = vsyncpa [#allocation7], 0 }
   0x2   :  { %17 = vsyncpa [#allocation7 + $0x1], 0  ;;  %s7440_s30 = smov 0   ;;  %s7442_s10 = smov 0  }
   0x3   :  { %s7444_s11 = smov 0   ;;  %s7446_s12 = smov 0  }
   0x4 LB: > { %s7461_s13 = sadd.s32 4294967295, %s7372_s12   ;;  %s5982_s14 = sadd.s32 4294967294, %s7372_s12   ;;  %s7372_s12 = sphi %s7446_s12, %s9637_s12   ;;  %s7368_s11 = sphi %s7444_s11, %s9636_s11   ;;  %s7364_s10 = sphi %s7442_s10, %s9635_s10   ;;  %s7360_s30 = sphi %s7440_s30, %s9634_s30  }
   0x5   : > { %s7465_s15 = sadd.s32 1, %s7372_s12   ;;  %s224_s16 = sadd.s32 1, %s7368_s11 }
   0x6   : > { %s221_s17 = ssub.s32 %s7372_s12, %s7465_s15  ;;  %p234_p0 = scmp.ne.s32.totalorder %s7368_s11, %s7364_s10 }
   0x7   : > { %p222_p1 = scmp.eq.s32.totalorder %s221_s17, 0  ;;  %p235_p2 = scmp.eq.s32.totalorder %s7461_s13, 1 }
   0x8   : > { %p240_p3 = scmp.ne.s32.totalorder %s7364_s10, %s7360_s30  ;;  %p241_p4 = scmp.eq.s32.totalorder %s5982_s14, 1 }
   0x9   : > { %s7476_s18 = scalar_select %p222_p1, %s7368_s11, %s224_s16  }
   0xa   : > { %p7478_p5 = por %p235_p2, %p234_p0  ;;  %p7482_p6 = por %p241_p4, %p240_p3 }
   0xb   : > { %p5983_p7 = scmp.ge.s32.totalorder %s7372_s12, 1  ;;  %p248_p8 = scmp.lt.s32.totalorder %s7372_s12, 3 }
   0xc   : > { %s9601_s19 = scalar_select %p7478_p5, 1, 0 }
   0xd   : > { %s9602_s20 = scalar_select %p7482_p6, 1, 0 }
   0xe   : > { %p9586_p9 = scmp.eq.s32.totalorder %s7461_s13, 0  ;;  %p7489_p10 = pnand %p5983_p7, %p248_p8 }
   0xf   : > { %s7374_s22 = smov [#allocation5]   ;;  %s7278_s27 = scalar_lea.hbm %s9581_s5, 32768 }
  0x10   : > { %s9603_s21 = scalar_select %p7489_p10, 1, 0 }
  0x11   : > { %s272_s23 = sshll.u32 %s7374_s22, 4  ;;  %p6699_p11 = pneg %p7489_p10  ;;  %s273_s23 = int_to_ptr.vmem [resolvable:$true] %s272_s23 }
  0x12   : > { %p7279_p13 = scmp.ne.s32.totalorder %s9581_s5, %s7278_s27  ;;  %p7285_p3 = scmp.lt.u32.totalorder %s7278_s27, %s9581_s5 }
  0x13   : > { %p7497_p12 = pnand %p9586_p9, %p6699_p11 }
  0x15   : > { %p7280_p0 = pneg %p7497_p12 }
  0x17   : > { %p7281_p1 = pnand %p7280_p0, %p7279_p13 }
  0x19   : > { %p7282_p2 = pneg %p7281_p1 }
  0x1b   : > { %p7287_p4 = pnand %p7285_p3, %p7282_p2 }
  0x1d   : > { %7290 = shalt.err (!%p7287_p4)
}
  0x1e   : > { %s7291_s17 = scalar_lea.vmem %s273_s23, 32768  ;;  %p7299_p9 = scmp.lt.s32.totalorder %s273_s23, %s273_s23 }
  0x1f   : > { %p7292_p7 = scmp.ne.s32.totalorder %s273_s23, %s7291_s17  ;;  %p7300_p6 = scmp.lt.s32.totalorder %s7291_s17, %s7291_s17 }
  0x21   : > { %p7294_p8 = pnand %p7292_p7, %p7280_p0  ;;  %p7301_p5 = por %p7300_p6, %p7299_p9 }
  0x23   : > { %p7295_p11 = pneg %p7294_p8 }
  0x25   : > { %p7302_p10 = pnand %p7301_p5, %p7295_p11 }
  0x27   : > { %7305 = shalt.err (!%p7302_p10)
}
  0x28   : > { %s7375_s22 = smov 256   ;;  %s7376_s25 = smov 16  }
  0x29   : > { %6702 = dma.hbm_to_vmem [thread:$0]  (!%p7497_p12), %s9581_s5, 32768, %s273_s23, [#allocation6], %s7375_s22, %s7375_s22, %s7376_s25  }
  0x2a   : > { %p9605_p13 = scmp.ne.s32.totalorder %s9603_s21, 0 }
  0x2b   : > { %p9606_p1 = scmp.eq.s32.totalorder (!%p9605_p13), %s7461_s13, 0 }
  0x2c   : > { %305 = sbr.rel (%p9605_p13) target bundleno = 1968 (0x7b0), region = 56 }
  0x33   : > { %7351 = dma.done.wait (%p9606_p1), [#allocation6], 32768   ;;  %p9607_p0 = pmov %p9606_p1 }
  0x34   : > { %p340_p5 = scmp.lt.s32.totalorder %s7461_s13, 1  ;;  %v7377_v0 = vmov 0.0   ;;  %vm719_vm0 = vcmask 1046528   ;;  %vm1009_vm1 = vcmask 1045504   ;;  %vm9591_vm2 = vcmask 1044480   ;;  %s9598_s21 = smov 24  }
  0x35   : > { %7353 = vsyncadd (%p9607_p0), [#allocation6], 4294934528  ;;  %6538 = vmatprep.subr.bf16.mxu0 %v7377_v0  ;;  %vm506_vm3 = vsmask.f32 7424  ;;  %vm1153_vm4 = vsmask.f32 5376 }
  0x36   : > { %s341_s27 = scalar_select %p340_p5, %s7461_s13, 1  ;;  %v6792_v62 = vld [vmem:[%s9577_s1] sm:$0xff]   ;;  %vm9590_vm5 = vsmask.f32 6400  ;;  %vm1812_vm6 = vcmask 1043456   ;;  %vm7386_vm7 = vmmov 0  }
  0x37   : > { %s9595_s16 = smov 16   ;;  %s9594_s17 = smov 48   ;;  %6539 = vmatpush3.bf16.msra.mxu0 %v6792_v62  ;;  %6548 = vmatprep.mubr.msk.bf16.mxu0 %vm7386_vm7, %v7377_v0  ;;  %vm1381_vm8 = vcmask 64512   ;;  %vm9592_vm9 = vcmask 130048   ;;  %vm9593_vm10 = vcmask 195584   ;;  %vm1511_vm11 = vcmask 261120  }
  0x38   : > { %s6692_s24 = smul.u32 184, %s341_s27  ;;  %s9597_s22 = smov 40   ;;  %6540 = vmatprep.subr.bf16.mxu0 %v7377_v0  ;;  %vm9589_vm12 = vcmask 326656   ;;  %vm1597_vm13 = vcmask 392192   ;;  %vm9600_vm14 = vcmask 457728   ;;  %vm1683_vm15 = vcmask 523264  }
  0x39   : > { %s7382_s28 = smov 64   ;;  %s7383_s27 = smov 8  }
  0x3a   : > { %s7529_s23 = scalar_lea.vmem %s9576_s0, %s6692_s24  ;;  %s9596_s14 = smov 56  }
  0x3b   : > { %v349_v1 = vld [vmem:[%s7529_s23 + $0xc] sm:$0xf]  ;;  %v350_v2 = vld [vmem:[%s7529_s23 + $0x10] sm:$0xf]  ;;  %v351_v3 = vld [vmem:[%s7529_s23 + $0x14] sm:$0xf] }
  0x3c   : > { %v389_v4 = vld [vmem:[%s7529_s23 + $0x8] sm:$0xe]  ;;  %v7535_v5 = vcombine.low %v350_v2, %v351_v3  ;;  %v347_v6 = vld [vmem:[%s7529_s23 + $0x4] sm:$0xf]  ;;  %v388_v9 = vld [vmem:[%s7529_s23] sm:$0xe] }
  0x3d   : > { %v348_v7 = vld [vmem:[%s7529_s23 + $0x8] sm:$0xf]  ;;  %v6012_v8 = vcombine.low %v389_v4, %v349_v1  ;;  %v346_v11 = vld [vmem:[%s7529_s23] sm:$0xf]  ;;  %v6011_v13 = vcombine.low %v388_v9, %v347_v6  ;;  %v395_v15 = vld [vmem:[%s7529_s23 + $0x10] sm:$0xc] }
  0x3e   : > { %v7540_v10 = vcombine.low %v348_v7, %v349_v1  ;;  %v7544_v12 = vrot.slane %v7535_v5, 1  ;;  %v7546_v14 = vcombine.low %v346_v11, %v347_v6  ;;  %v7550_v16 = vld [vmem:[%s7529_s23 + $0x18] sm:$0xff]   ;;  %v6017_v19 = vcombine.low %v395_v15, %v351_v3  ;;  %v394_v20 = vld [vmem:[%s7529_s23 + $0x8] sm:$0xc]  ;;  %v399_v25 = vld [vmem:[%s7529_s23 + $0x10] sm:$0x8] }
  0x3f   : > { %v814_v17 = vrot.slane %v6012_v8, 1  ;;  %v1011_v21 = vrot.slane %v7535_v5, 2  ;;  %v720_v22 = vrot.slane %v6011_v13, 1  ;;  %v7556_v23 = vrot.slane %v7550_v16, 2  ;;  %v6793_v6 = vld [vmem:[%s9577_s1 + $0x8] sm:$0xff]   ;;  %v7609_v11 = vld [vmem:[%s7529_s23 + $0x20] sm:$0xff]  }
  0x40   : > { %v721_v18 = vrot.slane %v7540_v10, 1  ;;  %v6016_v24 = vcombine.low %v394_v20, %v349_v1  ;;  %v1299_v26 = vrot.slane %v7550_v16, 3  ;;  %v1102_v28 = vrot.slane %v6017_v19, 2  ;;  %6541 = vmatpush3.bf16.msra.mxu0 %v6793_v6  ;;  %s7385_s24 = smov 32   ;;  %s7388_s26 = smov 96  }
  0x41   : > { %v815_v27 = vsel %vm719_vm0, %v814_v17, %v7544_v12  ;;  %v6021_v29 = vcombine.low %v399_v25, %v351_v3  ;;  %v508_v30 = vshrl.u32 %v7546_v14, 16  ;;  %v510_v33 = vshll.u32 %v7546_v14, 16  ;;  %v6795_v17 = vld [vmem:[%s9577_s1 + $0x10] sm:$0xff]   ;;  %6542 = vmatprep.subr.bf16.mxu0 %v7377_v0  ;;  %s9623_s29 = smov 40   ;;  %s9624_s25 = smov 56  }
  0x42   : > { %820 = vrot.lane.b32.xlu1 %v815_v27, %s9598_s21  ;;  %v722_v31 = vsel %vm719_vm0, %v720_v22, %v721_v18  ;;  %v1010_v32 = vrot.slane %v6016_v24, 2  ;;  %v515_v34 = vshll.u32 %v7540_v10, 16  ;;  %v1103_v35 = vsel %vm1009_vm1, %v1102_v28, %v7556_v23  ;;  %v6796_v27 = vld [vmem:[%s9577_s1 + $0x18] sm:$0xff]   ;;  %p9632_p9 = scmp.ne.s32.totalorder %s9601_s19, 0 }
  0x43   : > { %761 = vrot.lane.b32.xlu0 %v722_v31, %s9595_s16  ;;  %v1298_v36 = vrot.slane %v6021_v29, 3  ;;  %v7571_v37 = vshll.u32 %v7550_v16, 16  ;;  %v512_v39 = vrot.slane %v510_v33, 1  ;;  %v7577_v41 = vshrl.u32 %v7550_v16, 16 }
  0x44   : > { %v1012_v38 = vsel %vm1009_vm1, %v1010_v32, %v1011_v21  ;;  %v517_v40 = vrot.slane %v515_v34, 1  ;;  %v1155_v43 = vshrl.u32 %v6017_v19, 16  ;;  %v1158_v44 = vshll.u32 %v6017_v19, 16  ;;  %6543 = vmatpush3.bf16.msra.mxu0 %v6795_v17  ;;  %v7651_v34 = vld [vmem:[%s7529_s23 + $0x28] sm:$0xff]  }
  0x45   : > { %v1300_v42 = vsel %vm9591_vm2, %v1298_v36, %v1299_v26  ;;  %v1163_v45 = vrot.slane %v7571_v37, 3  ;;  %v513_v46 = vor.u32 %v512_v39, %v508_v30  ;;  %v1162_v47 = vrot.slane %v7577_v41, 2  ;;  %6544 = vmatprep.subr.bf16.mxu0 %v7377_v0 }
  0x46   : > { %1108 = vrot.lane.b32.xlu1 %v1103_v35, %s9594_s17  ;;  %v523_v48 = vshll.u32 %v7535_v5, 16  ;;  %v527_v49 = vshrl.u32 %v7535_v5, 16  ;;  %v1157_v50 = vrot.slane %v1155_v43, 2  ;;  %v1160_v51 = vrot.slane %v1158_v44, 3 }
  0x47   : > { %1051 = vrot.lane.b32.xlu0 %v1012_v38, %s9597_s22  ;;  %v867_v52 = vshrl.u32 %v6012_v8, 16  ;;  %v870_v53 = vshll.u32 %v6012_v8, 16  ;;  %v518_v54 = vsel %vm506_vm3, %v513_v46, %v517_v40  ;;  %v7589_v55 = vor.u32 %v1163_v45, %v1162_v47 }
  0x48   : > { %v874_v56 = vrot.slane %v527_v49, 1  ;;  %v875_v57 = vrot.slane %v523_v48, 2  ;;  %v1161_v58 = vor.u32 %v1160_v51, %v1157_v50  ;;  %v519_v61 = vshrl.u32 %v7540_v10, 16  ;;  %6545 = vmatpush3.bf16.msra.mxu0 %v6796_v27  ;;  %v6797_v51 = vld [vmem:[%s9577_s1 + $0x20] ss:$0 sps:$4 sm:$0xff]  }
  0x49   : > { %v869_v59 = vrot.slane %v867_v52, 1  ;;  %v872_v60 = vrot.slane %v870_v53, 2  ;;  %v878_v63 = vrot.slane %v7577_v41, 1  ;;  %v724_v1 = vsel %vm719_vm0, %v721_v18, %v7544_v12  ;;  %6546 = vmatprep.subr.bf16.mxu0 %v7377_v0 }
  0x4a   : > { %1339 = vrot.lane.b32.xlu1 %v1300_v42, %s7382_s28  ;;  %v876_v3 = vor.u32 %v875_v57, %v874_v56  ;;  %v879_v4 = vrot.slane %v7571_v37, 2  ;;  %v1165_v7 = vsel %vm1153_vm4, %v1161_v58, %v7589_v55  ;;  %v521_v8 = vor.u32 %v519_v61, %v517_v40  ;;  %v7697_v58 = vld [vmem:[%s7529_s23 + $0x30] sm:$0xff]  }
  0x4b   : > { %674 = vrot.lane.b32.xlu0 %v518_v54, %s7383_s27  ;;  %v873_v2 = vor.u32 %v872_v60, %v869_v59  ;;  %v525_v9 = vrot.slane %v523_v48, 1  ;;  %v725_v19 = vrot.slane %v7550_v16, 1  ;;  %v7621_v20 = vshll.u32 %v7609_v11, 16 }
  0x4c   : > { %v880_v15 = vor.u32 %v879_v4, %v878_v63  ;;  %v7624_v22 = vshrl.u32 %v7609_v11, 16  ;;  %v1015_v25 = vrot.slane %v7609_v11, 2  ;;  %v1301_v32 = vrot.slane %v7609_v11, 3 }
  0x4d   : > { %v877_v13 = vsel %vm9590_vm5, %v873_v2, %v876_v3  ;;  %v526_v18 = vsel %vm506_vm3, %v521_v8, %v525_v9  ;;  %v726_v28 = vsel %vm719_vm0, %v7544_v12, %v725_v19  ;;  %v1167_v30 = vrot.slane %v7621_v20, 3 }
  0x4e   : > { %763 = vrot.lane.b32.xlu1 %v724_v1, %s9595_s16  ;;  %v881_v24 = vsel %vm9590_vm5, %v876_v3, %v880_v15  ;;  %v1166_v29 = vrot.slane %v7624_v22, 2  ;;  %v1016_v31 = vsel %vm1009_vm1, %v7556_v23, %v1015_v25  ;;  %v1014_v12 = vsel %vm1009_vm1, %v1011_v21, %v7556_v23 }
  0x4f   : > { %1252 = vrot.lane.b32.xlu0 %v1165_v7, %s9596_s14  ;;  %v1302_v35 = vsel %vm9591_vm2, %v1299_v26, %v1301_v32  ;;  %v533_v36 = vrot.slane %v7571_v37, 1  ;;  %v882_v38 = vrot.slane %v7624_v22, 1  ;;  %v883_v39 = vrot.slane %v7621_v20, 2 }
  0x50   : > { %v1168_v33 = vor.u32 %v1167_v30, %v1166_v29  ;;  %v529_v23 = vor.u32 %v527_v49, %v525_v9  ;;  %v727_v16 = vrot.slane %v7609_v11, 1  ;;  %v7669_v37 = vshll.u32 %v7651_v34, 16  ;;  %v7724_v11 = vld [vmem:[%s7529_s23 + $0x38] sm:$0xff]  }
  0x51   : > { %v884_v40 = vor.u32 %v883_v39, %v882_v38  ;;  %v7672_v42 = vshrl.u32 %v7651_v34, 16  ;;  %v1017_v44 = vrot.slane %v7651_v34, 2  ;;  %v1303_v49 = vrot.slane %v7651_v34, 3 }
  0x52   : > { %964 = vrot.lane.b32.xlu1 %v877_v13, %s7385_s24  ;;  %v1169_v21 = vsel %vm1153_vm4, %v7589_v55, %v1168_v33  ;;  %v534_v26 = vsel %vm506_vm3, %v529_v23, %v533_v36  ;;  %v728_v45 = vsel %vm719_vm0, %v725_v19, %v727_v16  ;;  %v1171_v47 = vrot.slane %v7669_v37, 3 }
  0x53   : > { %676 = vrot.lane.b32.xlu0 %v526_v18, %s7383_s27  ;;  %v885_v43 = vsel %vm9590_vm5, %v880_v15, %v884_v40  ;;  %v1170_v46 = vrot.slane %v7672_v42, 2  ;;  %v1018_v48 = vsel %vm1009_vm1, %v1015_v25, %v1017_v44  ;;  %v1304_v52 = vsel %vm9591_vm2, %v1301_v32, %v1303_v49 }
  0x54   : > { %v886_v53 = vrot.slane %v7672_v42, 1  ;;  %v887_v54 = vrot.slane %v7669_v37, 2  ;;  %v537_v56 = vor.u32 %v7577_v41, %v533_v36  ;;  %v541_v57 = vrot.slane %v7621_v20, 1  ;;  %v7756_v36 = vld [vmem:[%s7529_s23 + $0x40] sm:$0xff]  }
  0x55   : > { %v1172_v50 = vor.u32 %v1171_v47, %v1170_v46  ;;  %v1814_v60 = vsel %vm1812_vm6, %v6797_v51, 0  ;;  %v729_v62 = vrot.slane %v7651_v34, 1  ;;  %v7704_v63 = vshll.u32 %v7697_v58, 16 }
  0x56   : > { %966 = vrot.lane.b32.xlu1 %v881_v24, %s7385_s24  ;;  %v888_v59 = vor.u32 %v887_v54, %v886_v53  ;;  %v542_v61 = vsel %vm506_vm3, %v537_v56, %v541_v57  ;;  %v7707_v41 = vshrl.u32 %v7697_v58, 16  ;;  %6547 = vmatpush3.bf16.msra.mxu0 %v1814_v60  ;;  %v1019_v2 = vrot.slane %v7697_v58, 2  ;;  %v7788_v53 = vld [vmem:[%s7529_s23 + $0x48] sm:$0xff]  }
  0x57   : > { %822 = vrot.lane.b32.xlu0 %v726_v28, %s9598_s21  ;;  %v1173_v55 = vsel %vm1153_vm4, %v1168_v33, %v1172_v50  ;;  %v730_v3 = vsel %vm719_vm0, %v727_v16, %v729_v62  ;;  %v1175_v6 = vrot.slane %v7704_v63, 3  ;;  %v1305_v8 = vrot.slane %v7697_v58, 3 }
  0x58   : > { %v889_v1 = vsel %vm9590_vm5, %v884_v40, %v888_v59  ;;  %v1174_v4 = vrot.slane %v7707_v41, 2  ;;  %v1020_v7 = vsel %vm1009_vm1, %v1017_v44, %v1019_v2  ;;  %v890_v15 = vrot.slane %v7707_v41, 1 }
  0x59   : > { %v1306_v13 = vsel %vm9591_vm2, %v1303_v49, %v1305_v8  ;;  %v891_v17 = vrot.slane %v7704_v63, 2  ;;  %v545_v19 = vor.u32 %v7624_v22, %v541_v57  ;;  %v549_v20 = vrot.slane %v7669_v37, 1 }
  0x5a   : > { %1110 = vrot.lane.b32.xlu1 %v1016_v31, %s9594_s17  ;;  %v1176_v9 = vor.u32 %v1175_v6, %v1174_v4  ;;  %v731_v24 = vrot.slane %v7697_v58, 1  ;;  %v7741_v29 = vshrl.u32 %v7724_v11, 16  ;;  %v1021_v30 = vrot.slane %v7724_v11, 2 }
  0x5b   : > { %1053 = vrot.lane.b32.xlu0 %v1014_v12, %s9597_s22  ;;  %v892_v25 = vor.u32 %v891_v17, %v890_v15  ;;  %v550_v27 = vsel %vm506_vm3, %v545_v19, %v549_v20  ;;  %v1307_v34 = vrot.slane %v7724_v11, 3  ;;  %v553_v16 = vor.u32 %v7672_v42, %v549_v20 }
  0x5c   : > { %v1177_v18 = vsel %vm1153_vm4, %v1172_v50, %v1176_v9  ;;  %v1178_v32 = vrot.slane %v7741_v29, 2  ;;  %v1022_v33 = vsel %vm1009_vm1, %v1019_v2, %v1021_v30  ;;  %v894_v39 = vrot.slane %v7741_v29, 1 }
  0x5d   : > { %v893_v22 = vsel %vm9590_vm5, %v888_v59, %v892_v25  ;;  %v1308_v38 = vsel %vm9591_vm2, %v1305_v8, %v1307_v34  ;;  %v557_v40 = vrot.slane %v7704_v63, 1  ;;  %v7770_v44 = vshll.u32 %v7756_v36, 16 }
  0x5e   : > { %1341 = vrot.lane.b32.xlu1 %v1302_v35, %s7382_s28  ;;  %v1023_v46 = vrot.slane %v7756_v36, 2  ;;  %v1309_v51 = vrot.slane %v7756_v36, 3  ;;  %v7802_v63 = vshll.u32 %v7788_v53, 16  ;;  %v1025_v2 = vrot.slane %v7788_v53, 2 }
  0x5f   : > { %1254 = vrot.lane.b32.xlu0 %v1169_v21, %s9596_s14  ;;  %v558_v37 = vsel %vm506_vm3, %v553_v16, %v557_v40  ;;  %v1183_v49 = vrot.slane %v7770_v44, 3  ;;  %v899_v56 = vrot.slane %v7770_v44, 2  ;;  %v561_v58 = vor.u32 %v7707_v41, %v557_v40 }
  0x60   : > { %v1024_v50 = vsel %vm1009_vm1, %v1021_v30, %v1023_v46  ;;  %v1310_v54 = vsel %vm9591_vm2, %v1307_v34, %v1309_v51  ;;  %v1187_v6 = vrot.slane %v7802_v63, 3  ;;  %v1311_v8 = vrot.slane %v7788_v53, 3 }
  0x61   : > { %v903_v17 = vrot.slane %v7802_v63, 2  ;;  %v573_v20 = vrot.slane %v7770_v44, 1  ;;  %vm9599_vm6 = vcmask 588800  }
  0x62   : > { %765 = vrot.lane.b32.xlu1 %v726_v28, %s9595_s16  ;;  %v7738_v28 = vshll.u32 %v7724_v11, 16 }
  0x63   : > { %678 = vrot.lane.b32.xlu0 %v534_v26, %s7383_s27 }
  0x64   : > { %v1179_v12 = vrot.slane %v7738_v28, 3  ;;  %v895_v21 = vrot.slane %v7738_v28, 2  ;;  %v565_v59 = vrot.slane %v7738_v28, 1 }
  0x66   : > { %968 = vrot.lane.b32.xlu1 %v885_v43, %s7385_s24  ;;  %v1180_v35 = vor.u32 %v1179_v12, %v1178_v32  ;;  %v896_v26 = vor.u32 %v895_v21, %v894_v39  ;;  %v733_v43 = vrot.slane %v7724_v11, 1  ;;  %v7820_v11 = vld [vmem:[%s7529_s23 + $0x50] sm:$0xff]   ;;  %v569_v19 = vor.u32 %v7741_v29, %v565_v59 }
  0x67   : > { %824 = vrot.lane.b32.xlu0 %v728_v45, %s9598_s21  ;;  %v7834_v28 = vshll.u32 %v7820_v11, 16  ;;  %v1027_v30 = vrot.slane %v7820_v11, 2 }
  0x68   : > { %v1181_v23 = vsel %vm1153_vm4, %v1176_v9, %v1180_v35  ;;  %v897_v42 = vsel %vm9590_vm5, %v892_v25, %v896_v26  ;;  %v734_v47 = vsel %vm719_vm0, %v731_v24, %v733_v43  ;;  %v574_v25 = vsel %vm506_vm3, %v569_v19, %v573_v20 }
  0x6a   : > { %1112 = vrot.lane.b32.xlu1 %v1018_v48, %s9594_s17 }
  0x6b   : > { %1055 = vrot.lane.b32.xlu0 %v1016_v31, %s9597_s22  ;;  %v732_v31 = vsel %vm719_vm0, %v729_v62, %v731_v24  ;;  %v735_v62 = vrot.slane %v7756_v36, 1 }
  0x6e   : > { %1343 = vrot.lane.b32.xlu1 %v1304_v52, %s7382_s28 }
  0x6f   : > { %1256 = vrot.lane.b32.xlu0 %v1173_v55, %s9596_s14 }
  0x72   : > { %767 = vrot.lane.b32.xlu1 %v728_v45, %s9595_s16  ;;  %v7773_v45 = vshrl.u32 %v7756_v36, 16  ;;  %v1313_v36 = vrot.slane %v7820_v11, 3 }
  0x73   : > { %680 = vrot.lane.b32.xlu0 %v542_v61, %s7383_s27  ;;  %v566_v61 = vsel %vm506_vm3, %v561_v58, %v565_v59 }
  0x74   : > { %v898_v55 = vrot.slane %v7773_v45, 1  ;;  %v1314_v16 = vsel %vm9591_vm2, %v1311_v8, %v1313_v36  ;;  %v577_v44 = vor.u32 %v7773_v45, %v573_v20  ;;  %v7916_v20 = vld [vmem:[%s7529_s23 + $0x60] sm:$0xff]  }
  0x76   : > { %970 = vrot.lane.b32.xlu1 %v889_v1, %s7385_s24  ;;  %v900_v60 = vor.u32 %v899_v56, %v898_v55  ;;  %v7805_v1 = vshrl.u32 %v7788_v53, 16 }
  0x77   : > { %826 = vrot.lane.b32.xlu0 %v730_v3, %s9598_s21 }
  0x78   : > { %v901_v41 = vsel %vm9590_vm5, %v896_v26, %v900_v60  ;;  %v1186_v4 = vrot.slane %v7805_v1, 2  ;;  %v902_v15 = vrot.slane %v7805_v1, 1  ;;  %v907_v26 = vrot.slane %v7834_v28, 2 }
  0x7a   : > { %1114 = vrot.lane.b32.xlu1 %v1020_v7, %s9594_s17  ;;  %v1188_v9 = vor.u32 %v1187_v6, %v1186_v4  ;;  %v904_v24 = vor.u32 %v903_v17, %v902_v15  ;;  %v589_v15 = vrot.slane %v7834_v28, 1 }
  0x7b   : > { %1057 = vrot.lane.b32.xlu0 %v1018_v48, %s9597_s22  ;;  %v1182_v48 = vrot.slane %v7773_v45, 2 }
  0x7c   : > { %v905_v29 = vsel %vm9590_vm5, %v900_v60, %v904_v24 }
  0x7d   : > { %v1184_v52 = vor.u32 %v1183_v49, %v1182_v48 }
  0x7e   : > { %1345 = vrot.lane.b32.xlu1 %v1306_v13, %s7382_s28  ;;  %v1312_v13 = vsel %vm9591_vm2, %v1309_v51, %v1311_v8  ;;  %v739_v51 = vrot.slane %v7820_v11, 1 }
  0x7f   : > { %1258 = vrot.lane.b32.xlu0 %v1177_v18, %s9596_s14  ;;  %v1185_v57 = vsel %vm1153_vm4, %v1180_v35, %v1184_v52  ;;  %v1189_v18 = vsel %vm1153_vm4, %v1184_v52, %v1188_v9  ;;  %v7849_v35 = vsel %vm1009_vm1, %v1025_v2, %v1027_v30 }
  0x82   : > { %769 = vrot.lane.b32.xlu1 %v730_v3, %s9595_s16  ;;  %v736_v3 = vsel %vm719_vm0, %v733_v43, %v735_v62 }
  0x83   : > { %682 = vrot.lane.b32.xlu0 %v550_v27, %s7383_s27  ;;  %v737_v27 = vrot.slane %v7788_v53, 1 }
  0x85   : > { %v738_v32 = vsel %vm719_vm0, %v735_v62, %v737_v27  ;;  %v740_v58 = vsel %vm719_vm0, %v737_v27, %v739_v51 }
  0x86   : > { %972 = vrot.lane.b32.xlu1 %v893_v22, %s7385_s24  ;;  %v7837_v22 = vshrl.u32 %v7820_v11, 16 }
  0x87   : > { %828 = vrot.lane.b32.xlu0 %v732_v31, %s9598_s21 }
  0x88   : > { %v1190_v12 = vrot.slane %v7837_v22, 2  ;;  %v906_v40 = vrot.slane %v7837_v22, 1 }
  0x8a   : > { %1116 = vrot.lane.b32.xlu1 %v1022_v33, %s9594_s17  ;;  %v7873_v48 = vor.u32 %v907_v26, %v906_v40  ;;  %v1031_v40 = vrot.slane %v7916_v20, 2 }
  0x8b   : > { %1059 = vrot.lane.b32.xlu0 %v1020_v7, %s9597_s22  ;;  %v1026_v7 = vsel %vm1009_vm1, %v1023_v46, %v1025_v2 }
  0x8e   : > { %1347 = vrot.lane.b32.xlu1 %v1308_v38, %s7382_s28 }
  0x8f   : > { %1260 = vrot.lane.b32.xlu0 %v1181_v23, %s9596_s14  ;;  %v7857_v23 = vld [vmem:[%s7529_s23 + $0x58] sm:$0xff]  }
  0x90   : > { %v7878_v45 = vshll.u32 %v7857_v23, 16  ;;  %v7881_v52 = vshrl.u32 %v7857_v23, 16  ;;  %v1029_v55 = vrot.slane %v7857_v23, 2  ;;  %v1315_v4 = vrot.slane %v7857_v23, 3 }
  0x92   : > { %771 = vrot.lane.b32.xlu1 %v732_v31, %s9595_s16  ;;  %v1194_v59 = vrot.slane %v7881_v52, 2  ;;  %v1195_v60 = vrot.slane %v7878_v45, 3  ;;  %v911_v19 = vrot.slane %v7878_v45, 2  ;;  %v1032_v11 = vsel %vm1009_vm1, %v1029_v55, %v1031_v40 }
  0x93   : > { %684 = vrot.lane.b32.xlu0 %v558_v37, %s7383_s27 }
  0x94   : > { %v1196_v8 = vor.u32 %v1195_v60, %v1194_v59 }
  0x96   : > { %974 = vrot.lane.b32.xlu1 %v897_v42, %s7385_s24  ;;  %v581_v42 = vrot.slane %v7802_v63, 1 }
  0x97   : > { %830 = vrot.lane.b32.xlu0 %v734_v47, %s9598_s21 }
  0x9a   : > { %1118 = vrot.lane.b32.xlu1 %v1024_v50, %s9594_s17 }
  0x9b   : > { %1061 = vrot.lane.b32.xlu0 %v1022_v33, %s9597_s22  ;;  %v1191_v33 = vrot.slane %v7834_v28, 3  ;;  %v585_v28 = vor.u32 %v7805_v1, %v581_v42  ;;  %v7940_v1 = vshrl.u32 %v7916_v20, 16 }
  0x9d   : > { %v7852_v39 = vor.u32 %v1191_v33, %v1190_v12 }
  0x9e   : > { %1349 = vrot.lane.b32.xlu1 %v1310_v54, %s7382_s28  ;;  %v909_v54 = vsel %vm9590_vm5, %v904_v24, %v7873_v48  ;;  %v1316_v24 = vsel %vm9591_vm2, %v1313_v36, %v1315_v4 }
  0x9f   : > { %1262 = vrot.lane.b32.xlu0 %v1185_v57, %s9596_s14  ;;  %v1193_v43 = vsel %vm1153_vm4, %v1188_v9, %v7852_v39  ;;  %v1197_v27 = vsel %vm1153_vm4, %v7852_v39, %v1196_v8 }
  0xa2   : > { %773 = vrot.lane.b32.xlu1 %v734_v47, %s9595_s16 }
  0xa3   : > { %686 = vrot.lane.b32.xlu0 %v566_v61, %s7383_s27 }
  0xa6   : > { %976 = vrot.lane.b32.xlu1 %v901_v41, %s7385_s24 }
  0xa7   : > { %832 = vrot.lane.b32.xlu0 %v736_v3, %s9598_s21 }
  0xaa   : > { %1120 = vrot.lane.b32.xlu1 %v1026_v7, %s9594_s17 }
  0xab   : > { %1063 = vrot.lane.b32.xlu0 %v1024_v50, %s9597_s22  ;;  %v582_v50 = vsel %vm506_vm3, %v577_v44, %v581_v42 }
  0xae   : > { %1351 = vrot.lane.b32.xlu1 %v1312_v13, %s7382_s28 }
  0xaf   : > { %1264 = vrot.lane.b32.xlu0 %v1189_v18, %s9596_s14  ;;  %v910_v18 = vrot.slane %v7881_v52, 1 }
  0xb1   : > { %v912_v12 = vor.u32 %v911_v19, %v910_v18 }
  0xb2   : > { %775 = vrot.lane.b32.xlu1 %v736_v3, %s9595_s16  ;;  %v1030_v3 = vsel %vm1009_vm1, %v1027_v30, %v1029_v55 }
  0xb3   : > { %688 = vrot.lane.b32.xlu0 %v574_v25, %s7383_s27 }
  0xb4   : > { %v821_v31 = vpop.permute.xlu1 %820 }
  0xb5   : > { %v762_v34 = vpop.permute.xlu0 %761 }
  0xb6   : > { %978 = vrot.lane.b32.xlu1 %v905_v29, %s7385_s24 }
  0xb7   : > { %834 = vrot.lane.b32.xlu0 %v738_v32, %s9598_s21 }
  0xb8   : > { %v1109_v38 = vpop.permute.xlu1 %1108 }
  0xb9   : > { %v1052_v21 = vpop.permute.xlu0 %1051 }
  0xba   : > { %1122 = vrot.lane.b32.xlu1 %v7849_v35, %s9594_s17 }
  0xbb   : > { %1065 = vrot.lane.b32.xlu0 %v1026_v7, %s9597_s22 }
  0xbc   : > { %v1340_v37 = vpop.permute.xlu1 %1339 }
  0xbd   : > { %v675_v46 = vpop.permute.xlu0 %674 }
  0xbe   : > { %v1383_v47 = vsel %vm1381_vm8, %v7546_v14, %v675_v46  ;;  %1353 = vrot.lane.b32.xlu1 %v1314_v16, %s7382_s28  ;;  %v913_v16 = vsel %vm9590_vm5, %v7873_v48, %v912_v12 }
  0xbf   : > { %1266 = vrot.lane.b32.xlu0 %v1193_v43, %s9596_s14  ;;  %v1427_v53 = vsel %vm9592_vm9, %v1383_v47, %v762_v34  ;;  %v590_v34 = vsel %vm506_vm3, %v585_v28, %v589_v15  ;;  %v1198_v43 = vrot.slane %v7940_v1, 2  ;;  %v1317_v47 = vrot.slane %v7916_v20, 3 }
  0xc0   : > { %v764_v49 = vpop.permute.xlu1 %763  ;;  %v1470_v57 = vsel %vm9593_vm10, %v1427_v53, %v821_v31  ;;  %v741_v31 = vrot.slane %v7857_v23, 1  ;;  %v597_v53 = vrot.slane %v7878_v45, 1  ;;  %v593_v45 = vor.u32 %v7837_v22, %v589_v15 }
  0xc1   : > { %v1253_v14 = vpop.permute.xlu0 %1252  ;;  %v1318_v55 = vsel %vm9591_vm2, %v1315_v4, %v1317_v47 }
  0xc2   : > { %777 = vrot.lane.b32.xlu1 %v738_v32, %s9595_s16 }
  0xc3   : > { %690 = vrot.lane.b32.xlu0 %v582_v50, %s7383_s27 }
  0xc4   : > { %v965_v56 = vpop.permute.xlu1 %964 }
  0xc5   : > { %v1513_v61 = vsel %vm1511_vm11, %v1470_v57, %v965_v56  ;;  %v677_v62 = vpop.permute.xlu0 %676  ;;  %v7975_v56 = vld [vmem:[%s7529_s23 + $0x68] sm:$0xff]  }
  0xc6   : > { %v1556_v63 = vsel %vm9589_vm12, %v1513_v61, %v1052_v21  ;;  %v1385_v41 = vsel %vm1381_vm8, %v7540_v10, %v677_v62  ;;  %980 = vrot.lane.b32.xlu1 %v909_v54, %s7385_s24  ;;  %v743_v61 = vrot.slane %v7916_v20, 1  ;;  %v7993_v22 = vshrl.u32 %v7975_v56, 16 }
  0xc7   : > { %v1599_v2 = vsel %vm1597_vm13, %v1556_v63, %v1109_v38  ;;  %836 = vrot.lane.b32.xlu0 %v740_v58, %s9598_s21  ;;  %v1429_v10 = vsel %vm9592_vm9, %v1385_v41, %v764_v49  ;;  %v1319_v23 = vrot.slane %v7975_v56, 3 }
  0xc8   : > { %v967_v6 = vpop.permute.xlu1 %966  ;;  %v1642_v7 = vsel %vm9600_vm14, %v1599_v2, %v1253_v14  ;;  %v598_v2 = vsel %vm506_vm3, %v593_v45, %v597_v53  ;;  %v744_v15 = vsel %vm719_vm0, %v741_v31, %v743_v61 }
  0xc9   : > { %v823_v9 = vpop.permute.xlu0 %822  ;;  %v1685_v13 = vsel %vm1683_vm15, %v1642_v7, %v1340_v37  ;;  %v742_v37 = vsel %vm719_vm0, %v739_v51, %v741_v31 }
  0xca   : > { %v1472_v17 = vsel %vm9593_vm10, %v1429_v10, %v823_v9  ;;  %6549 = vmatmul.mubr.msk.bf16.vlgmr.msra.gmra.mrb[0].mxu0 %vm9599_vm6, %v1685_v13  ;;  %1124 = vrot.lane.b32.xlu1 %v1030_v3, %s9594_s17  ;;  %v1033_v9 = vrot.slane %v7975_v56, 2 }
  0xcb   : > { %1067 = vrot.lane.b32.xlu0 %v7849_v35, %s9597_s22  ;;  %6552 = vmatprep.mubr.msk.bf16.mxu0 %vm7386_vm7, %v7377_v0  ;;  %v1515_v29 = vsel %vm1511_vm11, %v1472_v17, %v967_v6  ;;  %v7937_v35 = vshll.u32 %v7916_v20, 16  ;;  %v1202_v17 = vrot.slane %v7993_v22, 2 }
  0xcc   : > { %v1111_v25 = vpop.permute.xlu1 %1110 }
  0xcd   : > { %v1054_v30 = vpop.permute.xlu0 %1053  ;;  %v1199_v44 = vrot.slane %v7937_v35, 3  ;;  %v915_v54 = vrot.slane %v7937_v35, 2 }
  0xce   : > { %v1558_v32 = vsel %vm9589_vm12, %v1515_v29, %v1054_v30  ;;  %1355 = vrot.lane.b32.xlu1 %v1316_v24, %s7382_s28  ;;  %v7263_v24 = vld [vmem:[%s7529_s23 + $0x18] sm:$0xff]  }
  0xcf   : > { %1268 = vrot.lane.b32.xlu0 %v1197_v27, %s9596_s14  ;;  %v1601_v36 = vsel %vm1597_vm13, %v1558_v32, %v1111_v25  ;;  %v1200_v49 = vor.u32 %v1199_v44, %v1198_v43  ;;  %v1034_v27 = vsel %vm1009_vm1, %v1031_v40, %v1033_v9 }
  0xd0   : > { %v1342_v33 = vpop.permute.xlu1 %1341 }
  0xd1   : > { %v1255_v38 = vpop.permute.xlu0 %1254 }
  0xd2   : > { %v1644_v39 = vsel %vm9600_vm14, %v1601_v36, %v1255_v38  ;;  %779 = vrot.lane.b32.xlu1 %v740_v58, %s9595_s16  ;;  %v1201_v58 = vsel %vm1153_vm4, %v1196_v8, %v1200_v49 }
  0xd3   : > { %v1687_v21 = vsel %vm1683_vm15, %v1644_v39, %v1342_v33  ;;  %692 = vrot.lane.b32.xlu0 %v590_v34, %s7383_s27  ;;  %v918_v33 = vrot.slane %v7993_v22, 1  ;;  %v601_v39 = vor.u32 %v7881_v52, %v597_v53 }
  0xd4   : > { %6553 = vmatmul.mubr.msk.bf16.gmra.mrb[4].mxu0 %vm9599_vm6, %v1687_v21  ;;  %v766_v26 = vpop.permute.xlu1 %765  ;;  %v605_v21 = vrot.slane %v7937_v35, 1 }
  0xd5   : > { %v679_v42 = vpop.permute.xlu0 %678  ;;  %6556 = vmatprep.mubr.msk.bf16.mxu0 %vm7386_vm7, %v7377_v0 }
  0xd6   : > { %v1387_v46 = vsel %vm1381_vm8, %v7535_v5, %v679_v42  ;;  %982 = vrot.lane.b32.xlu1 %v913_v16, %s7385_s24  ;;  %v914_v5 = vrot.slane %v7940_v1, 1  ;;  %v8029_v16 = vld [vmem:[%s7529_s23 + $0x70] sm:$0xff]   ;;  %v606_v42 = vsel %vm506_vm3, %v601_v39, %v605_v21 }
  0xd7   : > { %838 = vrot.lane.b32.xlu0 %v742_v37, %s9598_s21  ;;  %v1431_v50 = vsel %vm9592_vm9, %v1387_v46, %v766_v26  ;;  %v745_v46 = vrot.slane %v7975_v56, 1  ;;  %v8038_v52 = vshll.u32 %v8029_v16, 16  ;;  %v8041_v35 = vshrl.u32 %v8029_v16, 16 }
  0xd8   : > { %v969_v48 = vpop.permute.xlu1 %968  ;;  %v916_v63 = vor.u32 %v915_v54, %v914_v5  ;;  %v1321_v20 = vrot.slane %v8029_v16, 3 }
  0xd9   : > { %v825_v51 = vpop.permute.xlu0 %824  ;;  %v1206_v5 = vrot.slane %v8041_v35, 2  ;;  %v1207_v54 = vrot.slane %v8038_v52, 3 }
  0xda   : > { %v1474_v14 = vsel %vm9593_vm10, %v1431_v50, %v825_v51  ;;  %1126 = vrot.lane.b32.xlu1 %v1032_v11, %s9594_s17  ;;  %v917_v10 = vsel %vm9590_vm5, %v912_v12, %v916_v63  ;;  %v1320_v12 = vsel %vm9591_vm2, %v1317_v47, %v1319_v23  ;;  %v1035_v51 = vrot.slane %v8029_v16, 2 }
  0xdb   : > { %1069 = vrot.lane.b32.xlu0 %v1030_v3, %s9597_s22  ;;  %v1517_v59 = vsel %vm1511_vm11, %v1474_v14, %v969_v48  ;;  %v7990_v3 = vshll.u32 %v7975_v56, 16  ;;  %v746_v14 = vsel %vm719_vm0, %v743_v61, %v745_v46 }
  0xdc   : > { %v1113_v57 = vpop.permute.xlu1 %1112 }
  0xdd   : > { %v1056_v60 = vpop.permute.xlu0 %1055  ;;  %v1203_v18 = vrot.slane %v7990_v3, 3  ;;  %v919_v34 = vrot.slane %v7990_v3, 2 }
  0xde   : > { %v1560_v62 = vsel %vm9589_vm12, %v1517_v59, %v1056_v60  ;;  %1357 = vrot.lane.b32.xlu1 %v1318_v55, %s7382_s28  ;;  %v7264_v55 = vld [vmem:[%s7529_s23 + $0x20] sm:$0xff]   ;;  %v1208_v59 = vor.u32 %v1207_v54, %v1206_v5 }
  0xdf   : > { %1270 = vrot.lane.b32.xlu0 %v1201_v58, %s9596_s14  ;;  %v1603_v4 = vsel %vm1597_vm13, %v1560_v62, %v1113_v57  ;;  %v1204_v29 = vor.u32 %v1203_v18, %v1202_v17  ;;  %v920_v43 = vor.u32 %v919_v34, %v918_v33  ;;  %v1036_v58 = vsel %vm1009_vm1, %v1033_v9, %v1035_v51 }
  0xe0   : > { %v1344_v41 = vpop.permute.xlu1 %1343 }
  0xe1   : > { %v1257_v6 = vpop.permute.xlu0 %1256  ;;  %v1205_v38 = vsel %vm1153_vm4, %v1200_v49, %v1204_v29  ;;  %v921_v50 = vsel %vm9590_vm5, %v916_v63, %v920_v43  ;;  %v1322_v63 = vsel %vm9591_vm2, %v1319_v23, %v1321_v20 }
  0xe2   : > { %v1646_v7 = vsel %vm9600_vm14, %v1603_v4, %v1257_v6  ;;  %781 = vrot.lane.b32.xlu1 %v742_v37, %s9595_s16  ;;  %v1209_v6 = vsel %vm1153_vm4, %v1204_v29, %v1208_v59 }
  0xe3   : > { %v1689_v8 = vsel %vm1683_vm15, %v1646_v7, %v1344_v41  ;;  %694 = vrot.lane.b32.xlu0 %v598_v2, %s7383_s27  ;;  %v922_v41 = vrot.slane %v8041_v35, 1  ;;  %v923_v2 = vrot.slane %v8038_v52, 2  ;;  %v609_v7 = vor.u32 %v7940_v1, %v605_v21 }
  0xe4   : > { %6557 = vmatmul.mubr.msk.bf16.gmra.mrb[8].mxu0 %vm9599_vm6, %v1689_v8  ;;  %v768_v13 = vpop.permute.xlu1 %767  ;;  %v613_v8 = vrot.slane %v7990_v3, 1 }
  0xe5   : > { %v681_v19 = vpop.permute.xlu0 %680  ;;  %6560 = vmatprep.mubr.msk.bf16.mxu0 %vm7386_vm7, %v7377_v0  ;;  %v924_v17 = vor.u32 %v923_v2, %v922_v41 }
  0xe6   : > { %v1389_v25 = vsel %vm1381_vm8, %v7263_v24, %v681_v19  ;;  %984 = vrot.lane.b32.xlu1 %v917_v10, %s7385_s24  ;;  %v8075_v10 = vld [vmem:[%s7529_s23 + $0x78] sm:$0xff]   ;;  %v614_v19 = vsel %vm506_vm3, %v609_v7, %v613_v8  ;;  %v747_v24 = vrot.slane %v8029_v16, 1 }
  0xe7   : > { %840 = vrot.lane.b32.xlu0 %v744_v15, %s9598_s21  ;;  %v1433_v30 = vsel %vm9592_vm9, %v1389_v25, %v768_v13  ;;  %v8084_v1 = vshll.u32 %v8075_v10, 16  ;;  %v8087_v3 = vshrl.u32 %v8075_v10, 16  ;;  %v925_v29 = vsel %vm9590_vm5, %v920_v43, %v924_v17 }
  0xe8   : > { %v971_v28 = vpop.permute.xlu1 %970  ;;  %v1323_v21 = vrot.slane %v8075_v10, 3 }
  0xe9   : > { %v827_v31 = vpop.permute.xlu0 %826  ;;  %v1211_v33 = vrot.slane %v8084_v1, 3 }
  0xea   : > { %v1476_v32 = vsel %vm9593_vm10, %v1433_v30, %v827_v31  ;;  %1128 = vrot.lane.b32.xlu1 %v1034_v27, %s9594_s17  ;;  %v1037_v30 = vrot.slane %v8075_v10, 2 }
  0xeb   : > { %1071 = vrot.lane.b32.xlu0 %v1032_v11, %s9597_s22  ;;  %v1519_v40 = vsel %vm1511_vm11, %v1476_v32, %v971_v28  ;;  %v748_v32 = vsel %vm719_vm0, %v745_v46, %v747_v24  ;;  %v926_v46 = vrot.slane %v8087_v3, 1 }
  0xec   : > { %v1115_v36 = vpop.permute.xlu1 %1114  ;;  %v1038_v39 = vsel %vm1009_vm1, %v1035_v51, %v1037_v30  ;;  %v8119_v51 = vld [vmem:[%s7529_s23 + $0x80] sm:$0xff]  }
  0xed   : > { %v1058_v26 = vpop.permute.xlu0 %1057 }
  0xee   : > { %v1562_v37 = vsel %vm9589_vm12, %v1519_v40, %v1058_v26  ;;  %1359 = vrot.lane.b32.xlu1 %v1320_v12, %s7382_s28  ;;  %v1210_v12 = vrot.slane %v8087_v3, 2 }
  0xef   : > { %1272 = vrot.lane.b32.xlu0 %v1205_v38, %s9596_s14  ;;  %v1605_v47 = vsel %vm1597_vm13, %v1562_v37, %v1115_v36  ;;  %v7265_v36 = vld [vmem:[%s7529_s23 + $0x28] sm:$0xff]  }
  0xf0   : > { %v1346_v44 = vpop.permute.xlu1 %1345  ;;  %v1212_v26 = vor.u32 %v1211_v33, %v1210_v12 }
  0xf1   : > { %v1259_v11 = vpop.permute.xlu0 %1258 }
  0xf2   : > { %v1648_v48 = vsel %vm9600_vm14, %v1605_v47, %v1259_v11  ;;  %783 = vrot.lane.b32.xlu1 %v744_v15, %s9595_s16  ;;  %v927_v47 = vrot.slane %v8084_v1, 2 }
  0xf3   : > { %v1691_v49 = vsel %vm1683_vm15, %v1648_v48, %v1346_v44  ;;  %696 = vrot.lane.b32.xlu0 %v606_v42, %s7383_s27  ;;  %v1324_v42 = vsel %vm9591_vm2, %v1321_v20, %v1323_v21  ;;  %v1213_v48 = vsel %vm1153_vm4, %v1208_v59, %v1212_v26 }
  0xf4   : > { %6561 = vmatmul.mubr.msk.bf16.gmra.mrb[12].mxu0 %vm9599_vm6, %v1691_v49  ;;  %v770_v53 = vpop.permute.xlu1 %769  ;;  %v617_v49 = vor.u32 %v7993_v22, %v613_v8  ;;  %v928_v54 = vor.u32 %v927_v47, %v926_v46  ;;  %v8128_v22 = vshll.u32 %v8119_v51, 16 }
  0xf5   : > { %v683_v56 = vpop.permute.xlu0 %682  ;;  %6564 = vmatprep.mubr.msk.bf16.mxu0 %vm7386_vm7, %v7377_v0 }
  0xf6   : > { %v1391_v57 = vsel %vm1381_vm8, %v7264_v55, %v683_v56  ;;  %986 = vrot.lane.b32.xlu1 %v921_v50, %s7385_s24  ;;  %v621_v50 = vrot.slane %v8038_v52, 1  ;;  %v8131_v52 = vshrl.u32 %v8119_v51, 16  ;;  %v1215_v2 = vrot.slane %v8128_v22, 3 }
  0xf7   : > { %842 = vrot.lane.b32.xlu0 %v746_v14, %s9598_s21  ;;  %v1435_v60 = vsel %vm9592_vm9, %v1391_v57, %v770_v53  ;;  %v749_v57 = vrot.slane %v8075_v10, 1 }
  0xf8   : > { %v973_v45 = vpop.permute.xlu1 %972  ;;  %v622_v55 = vsel %vm506_vm3, %v617_v49, %v621_v50  ;;  %v1214_v41 = vrot.slane %v8131_v52, 2  ;;  %v7267_v49 = vld [vmem:[%s7529_s23 + $0x38] sm:$0xff]  }
  0xf9   : > { %v829_v61 = vpop.permute.xlu0 %828 }
  0xfa   : > { %v1478_v62 = vsel %vm9593_vm10, %v1435_v60, %v829_v61  ;;  %1130 = vrot.lane.b32.xlu1 %v1036_v58, %s9594_s17  ;;  %v929_v60 = vsel %vm9590_vm5, %v924_v17, %v928_v54  ;;  %v1039_v61 = vrot.slane %v8119_v51, 2 }
  0xfb   : > { %1073 = vrot.lane.b32.xlu0 %v1034_v27, %s9597_s22  ;;  %v1521_v9 = vsel %vm1511_vm11, %v1478_v62, %v973_v45 }
  0xfc   : > { %v1117_v4 = vpop.permute.xlu1 %1116  ;;  %v1040_v8 = vsel %vm1009_vm1, %v1037_v30, %v1039_v61  ;;  %v629_v30 = vrot.slane %v8084_v1, 1 }
  0xfd   : > { %v1060_v13 = vpop.permute.xlu0 %1059 }
  0xfe   : > { %v1564_v15 = vsel %vm9589_vm12, %v1521_v9, %v1060_v13  ;;  %1361 = vrot.lane.b32.xlu1 %v1322_v63, %s7382_s28  ;;  %v750_v63 = vsel %vm719_vm0, %v747_v24, %v749_v57  ;;  %v1325_v9 = vrot.slane %v8119_v51, 3 }
  0xff   : > { %1274 = vrot.lane.b32.xlu0 %v1209_v6, %s9596_s14  ;;  %v1607_v25 = vsel %vm1597_vm13, %v1564_v15, %v1117_v4  ;;  %v7266_v6 = vld [vmem:[%s7529_s23 + $0x30] sm:$0xff]   ;;  %v1216_v15 = vor.u32 %v1215_v2, %v1214_v41 }
 0x100   : > { %v1348_v18 = vpop.permute.xlu1 %1347  ;;  %v1326_v24 = vsel %vm9591_vm2, %v1323_v21, %v1325_v9 }
 0x101   : > { %v1261_v27 = vpop.permute.xlu0 %1260 }
 0x102   : > { %v1650_v23 = vsel %vm9600_vm14, %v1607_v25, %v1261_v27  ;;  %785 = vrot.lane.b32.xlu1 %v746_v14, %s9595_s16  ;;  %v930_v25 = vrot.slane %v8131_v52, 1  ;;  %v931_v27 = vrot.slane %v8128_v22, 2 }
 0x103   : > { %v1693_v28 = vsel %vm1683_vm15, %v1650_v23, %v1348_v18  ;;  %698 = vrot.lane.b32.xlu0 %v614_v19, %s7383_s27 }
 0x104   : > { %6565 = vmatmul.mubr.msk.bf16.gmra.mrb[16].mxu0 %vm9599_vm6, %v1693_v28  ;;  %v772_v31 = vpop.permute.xlu1 %771  ;;  %v1217_v28 = vsel %vm1153_vm4, %v1212_v26, %v1216_v15 }
 0x105   : > { %v685_v34 = vpop.permute.xlu0 %684  ;;  %6568 = vmatprep.mubr.msk.bf16.mxu0 %vm7386_vm7, %v7377_v0 }
 0x106   : > { %v1393_v38 = vsel %vm1381_vm8, %v7265_v36, %v685_v34  ;;  %988 = vrot.lane.b32.xlu1 %v925_v29, %s7385_s24  ;;  %v625_v29 = vor.u32 %v8041_v35, %v621_v50  ;;  %v932_v34 = vor.u32 %v931_v27, %v930_v25 }
 0x107   : > { %844 = vrot.lane.b32.xlu0 %v748_v32, %s9598_s21  ;;  %v1437_v37 = vsel %vm9592_vm9, %v1393_v38, %v772_v31  ;;  %v8163_v31 = vld [vmem:[%s7529_s23 + $0x88] sm:$0xff]  }
 0x108   : > { %v975_v40 = vpop.permute.xlu1 %974  ;;  %v630_v38 = vsel %vm506_vm3, %v625_v29, %v629_v30  ;;  %v8172_v35 = vshll.u32 %v8163_v31, 16  ;;  %v8175_v1 = vshrl.u32 %v8163_v31, 16 }
 0x109   : > { %v831_v43 = vpop.permute.xlu0 %830 }
 0x10a   : > { %v1480_v44 = vsel %vm9593_vm10, %v1437_v37, %v831_v43  ;;  %1132 = vrot.lane.b32.xlu1 %v1038_v39, %s9594_s17  ;;  %v933_v43 = vsel %vm9590_vm5, %v928_v54, %v932_v34  ;;  %v1218_v47 = vrot.slane %v8175_v1, 2 }
 0x10b   : > { %1075 = vrot.lane.b32.xlu0 %v1036_v58, %s9597_s22  ;;  %v1523_v53 = vsel %vm1511_vm11, %v1480_v44, %v975_v40  ;;  %v1041_v44 = vrot.slane %v8163_v31, 2 }
 0x10c   : > { %v1119_v11 = vpop.permute.xlu1 %1118 }
 0x10d   : > { %v1062_v14 = vpop.permute.xlu0 %1061 }
 0x10e   : > { %v1566_v5 = vsel %vm9589_vm12, %v1523_v53, %v1062_v14  ;;  %1363 = vrot.lane.b32.xlu1 %v1324_v42, %s7382_s28  ;;  %v1042_v53 = vsel %vm1009_vm1, %v1039_v61, %v1041_v44  ;;  %v1327_v14 = vrot.slane %v8163_v31, 3  ;;  %v633_v61 = vor.u32 %v8087_v3, %v629_v30  ;;  %v7268_v30 = vld [vmem:[%s7529_s23 + $0x40] sm:$0xff]  }
 0x10f   : > { %1276 = vrot.lane.b32.xlu0 %v1213_v48, %s9596_s14  ;;  %v1609_v58 = vsel %vm1597_vm13, %v1566_v5, %v1119_v11  ;;  %v1219_v11 = vrot.slane %v8172_v35, 3 }
 0x110   : > { %v1350_v56 = vpop.permute.xlu1 %1349 }
 0x111   : > { %v1263_v20 = vpop.permute.xlu0 %1262  ;;  %v1220_v54 = vor.u32 %v1219_v11, %v1218_v47  ;;  %v8251_v47 = vld [vmem:[%s7529_s23 + $0x98] sm:$0xff]  }
 0x112   : > { %v1652_v45 = vsel %vm9600_vm14, %v1609_v58, %v1263_v20  ;;  %787 = vrot.lane.b32.xlu1 %v748_v32, %s9595_s16  ;;  %v1328_v58 = vsel %vm9591_vm2, %v1325_v9, %v1327_v14  ;;  %v934_v20 = vrot.slane %v8175_v1, 1  ;;  %v753_v9 = vrot.slane %v8163_v31, 1 }
 0x113   : > { %v1695_v59 = vsel %vm1683_vm15, %v1652_v45, %v1350_v56  ;;  %700 = vrot.lane.b32.xlu0 %v622_v55, %s7383_s27  ;;  %v935_v45 = vrot.slane %v8172_v35, 2 }
 0x114   : > { %6569 = vmatmul.mubr.msk.bf16.gmra.mrb[20].mxu0 %vm9599_vm6, %v1695_v59  ;;  %v774_v62 = vpop.permute.xlu1 %773 }
 0x115   : > { %v687_v4 = vpop.permute.xlu0 %686  ;;  %6572 = vmatprep.mubr.msk.bf16.mxu0 %vm7386_vm7, %v7377_v0 }
 0x116   : > { %v1395_v7 = vsel %vm1381_vm8, %v7266_v6, %v687_v4  ;;  %990 = vrot.lane.b32.xlu1 %v929_v60, %s7385_s24  ;;  %v1221_v60 = vsel %vm1153_vm4, %v1216_v15, %v1220_v54  ;;  %v936_v6 = vor.u32 %v935_v45, %v934_v20  ;;  %v1045_v20 = vrot.slane %v8251_v47, 2 }
 0x117   : > { %846 = vrot.lane.b32.xlu0 %v750_v63, %s9598_s21  ;;  %v1439_v17 = vsel %vm9592_vm9, %v1395_v7, %v774_v62  ;;  %v637_v62 = vrot.slane %v8128_v22, 1 }
 0x118   : > { %v977_v13 = vpop.permute.xlu1 %976 }
 0x119   : > { %v833_v18 = vpop.permute.xlu0 %832 }
 0x11a   : > { %v1482_v19 = vsel %vm9593_vm10, %v1439_v17, %v833_v18  ;;  %1134 = vrot.lane.b32.xlu1 %v1040_v8, %s9594_s17 }
 0x11b   : > { %1077 = vrot.lane.b32.xlu0 %v1038_v39, %s9597_s22  ;;  %v1525_v32 = vsel %vm1511_vm11, %v1482_v19, %v977_v13  ;;  %v751_v39 = vrot.slane %v8119_v51, 1  ;;  %v937_v19 = vsel %vm9590_vm5, %v932_v34, %v936_v6 }
 0x11c   : > { %v1121_v23 = vpop.permute.xlu1 %1120 }
 0x11d   : > { %v1064_v12 = vpop.permute.xlu0 %1063  ;;  %v752_v46 = vsel %vm719_vm0, %v749_v57, %v751_v39  ;;  %v754_v27 = vsel %vm719_vm0, %v751_v39, %v753_v9 }
 0x11e   : > { %v1568_v33 = vsel %vm9589_vm12, %v1525_v32, %v1064_v12  ;;  %1365 = vrot.lane.b32.xlu1 %v1326_v24, %s7382_s28 }
 0x11f   : > { %1278 = vrot.lane.b32.xlu0 %v1217_v28, %s9596_s14  ;;  %v1611_v21 = vsel %vm1597_vm13, %v1568_v33, %v1121_v23 }
 0x120   : > { %v1352_v36 = vpop.permute.xlu1 %1351 }
 0x121   : > { %v1265_v40 = vpop.permute.xlu0 %1264 }
 0x122   : > { %v1654_v26 = vsel %vm9600_vm14, %v1611_v21, %v1265_v40  ;;  %789 = vrot.lane.b32.xlu1 %v750_v63, %s9595_s16  ;;  %v8207_v63 = vld [vmem:[%s7529_s23 + $0x90] sm:$0xff]  }
 0x123   : > { %v1697_v37 = vsel %vm1683_vm15, %v1654_v26, %v1352_v36  ;;  %702 = vrot.lane.b32.xlu0 %v630_v38, %s7383_s27  ;;  %v8216_v3 = vshll.u32 %v8207_v63, 16  ;;  %v8219_v22 = vshrl.u32 %v8207_v63, 16  ;;  %v1043_v24 = vrot.slane %v8207_v63, 2 }
 0x124   : > { %6573 = vmatmul.mubr.msk.bf16.gmra.mrb[24].mxu0 %vm9599_vm6, %v1697_v37  ;;  %v776_v42 = vpop.permute.xlu1 %775  ;;  %v1329_v33 = vrot.slane %v8207_v63, 3 }
 0x125   : > { %v689_v48 = vpop.permute.xlu0 %688  ;;  %6576 = vmatprep.mubr.msk.bf16.mxu0 %vm7386_vm7, %v7377_v0  ;;  %v1222_v23 = vrot.slane %v8219_v22, 2  ;;  %v1223_v28 = vrot.slane %v8216_v3, 3  ;;  %v1044_v12 = vsel %vm1009_vm1, %v1041_v44, %v1043_v24  ;;  %v938_v26 = vrot.slane %v8219_v22, 1 }
 0x126   : > { %v1397_v50 = vsel %vm1381_vm8, %v7267_v49, %v689_v48  ;;  %992 = vrot.lane.b32.xlu1 %v933_v43, %s7385_s24  ;;  %v1330_v40 = vsel %vm9591_vm2, %v1327_v14, %v1329_v33  ;;  %v939_v37 = vrot.slane %v8216_v3, 2 }
 0x127   : > { %848 = vrot.lane.b32.xlu0 %v752_v46, %s9598_s21  ;;  %v1441_v56 = vsel %vm9592_vm9, %v1397_v50, %v776_v42  ;;  %v1224_v36 = vor.u32 %v1223_v28, %v1222_v23  ;;  %v641_v42 = vor.u32 %v8131_v52, %v637_v62  ;;  %v8260_v52 = vshll.u32 %v8251_v47, 16  ;;  %v8295_v28 = vld [vmem:[%s7529_s23 + $0xa0] sm:$0xff]  }
 0x128   : > { %v979_v5 = vpop.permute.xlu1 %978  ;;  %v940_v50 = vor.u32 %v939_v37, %v938_v26  ;;  %v653_v23 = vrot.slane %v8216_v3, 1  ;;  %v947_v3 = vshrl.u32 %v8295_v28, 16  ;;  %v8317_v37 = vrot.slane %v8295_v28, 2 }
 0x129   : > { %v835_v55 = vpop.permute.xlu0 %834  ;;  %v1225_v44 = vsel %vm1153_vm4, %v1220_v54, %v1224_v36 }
 0x12a   : > { %v1484_v57 = vsel %vm9593_vm10, %v1441_v56, %v835_v55  ;;  %1136 = vrot.lane.b32.xlu1 %v1042_v53, %s9594_s17 }
 0x12b   : > { %1079 = vrot.lane.b32.xlu0 %v1040_v8, %s9597_s22  ;;  %v1527_v41 = vsel %vm1511_vm11, %v1484_v57, %v979_v5  ;;  %v638_v8 = vsel %vm506_vm3, %v633_v61, %v637_v62  ;;  %v755_v5 = vrot.slane %v8207_v63, 1  ;;  %v1227_v61 = vrot.slane %v8260_v52, 3 }
 0x12c   : > { %v1123_v59 = vpop.permute.xlu1 %1122 }
 0x12d   : > { %v1066_v2 = vpop.permute.xlu0 %1065 }
 0x12e   : > { %v1570_v4 = vsel %vm9589_vm12, %v1527_v41, %v1066_v2  ;;  %1367 = vrot.lane.b32.xlu1 %v1328_v58, %s7382_s28  ;;  %v941_v58 = vsel %vm9590_vm5, %v936_v6, %v940_v50  ;;  %v7269_v41 = vld [vmem:[%s7529_s23 + $0x48] sm:$0xff]   ;;  %v1331_v6 = vrot.slane %v8251_v47, 3 }
 0x12f   : > { %1280 = vrot.lane.b32.xlu0 %v1221_v60, %s9596_s14  ;;  %v1613_v13 = vsel %vm1597_vm13, %v1570_v4, %v1123_v59  ;;  %v756_v59 = vsel %vm719_vm0, %v753_v9, %v755_v5  ;;  %v1046_v4 = vsel %vm1009_vm1, %v1043_v24, %v1045_v20 }
 0x130   : > { %v1354_v7 = vpop.permute.xlu1 %1353 }
 0x131   : > { %v1267_v15 = vpop.permute.xlu0 %1266 }
 0x132   : > { %v1656_v17 = vsel %vm9600_vm14, %v1613_v13, %v1267_v15  ;;  %791 = vrot.lane.b32.xlu1 %v752_v46, %s9595_s16  ;;  %v645_v46 = vrot.slane %v8172_v35, 1  ;;  %v8263_v35 = vshrl.u32 %v8251_v47, 16 }
 0x133   : > { %v1699_v18 = vsel %vm1683_vm15, %v1656_v17, %v1354_v7  ;;  %704 = vrot.lane.b32.xlu0 %v638_v8, %s7383_s27  ;;  %v1332_v17 = vsel %vm9591_vm2, %v1329_v33, %v1331_v6 }
 0x134   : > { %6577 = vmatmul.mubr.msk.bf16.gmra.mrb[28].mxu0 %vm9599_vm6, %v1699_v18  ;;  %v778_v25 = vpop.permute.xlu1 %777  ;;  %v646_v14 = vsel %vm506_vm3, %v641_v42, %v645_v46  ;;  %v1226_v60 = vrot.slane %v8263_v35, 2  ;;  %v942_v18 = vrot.slane %v8263_v35, 1  ;;  %v1230_v42 = vrot.slane %v947_v3, 2 }
 0x135   : > { %v691_v29 = vpop.permute.xlu0 %690  ;;  %6580 = vmatprep.mubr.msk.bf16.mxu0 %vm7386_vm7, %v7377_v0 }
 0x136   : > { %v1399_v32 = vsel %vm1381_vm8, %v7268_v30, %v691_v29  ;;  %994 = vrot.lane.b32.xlu1 %v937_v19, %s7385_s24  ;;  %v1228_v8 = vor.u32 %v1227_v61, %v1226_v60  ;;  %v943_v19 = vrot.slane %v8260_v52, 2 }
 0x137   : > { %850 = vrot.lane.b32.xlu0 %v754_v27, %s9598_s21  ;;  %v1443_v38 = vsel %vm9592_vm9, %v1399_v32, %v778_v25 }
 0x138   : > { %v981_v34 = vpop.permute.xlu1 %980  ;;  %v1229_v25 = vsel %vm1153_vm4, %v1224_v36, %v1228_v8  ;;  %v950_v36 = vshll.u32 %v8295_v28, 16 }
 0x139   : > { %v837_v39 = vpop.permute.xlu0 %836 }
 0x13a   : > { %v1486_v21 = vsel %vm9593_vm10, %v1443_v38, %v837_v39  ;;  %1138 = vrot.lane.b32.xlu1 %v1044_v12, %s9594_s17 }
 0x13b   : > { %1081 = vrot.lane.b32.xlu0 %v1042_v53, %s9597_s22  ;;  %v1529_v11 = vsel %vm1511_vm11, %v1486_v21, %v981_v34 }
 0x13c   : > { %v1125_v43 = vpop.permute.xlu1 %1124 }
 0x13d   : > { %v1068_v48 = vpop.permute.xlu0 %1067 }
 0x13e   : > { %v1572_v49 = vsel %vm9589_vm12, %v1529_v11, %v1068_v48  ;;  %1369 = vrot.lane.b32.xlu1 %v1330_v40, %s7382_s28  ;;  %v7270_v48 = vld [vmem:[%s7529_s23 + $0x50] sm:$0xff]  }
 0x13f   : > { %1282 = vrot.lane.b32.xlu0 %v1225_v44, %s9596_s14  ;;  %v1615_v54 = vsel %vm1597_vm13, %v1572_v49, %v1125_v43 }
 0x140   : > { %v1356_v53 = vpop.permute.xlu1 %1355 }
 0x141   : > { %v1269_v56 = vpop.permute.xlu0 %1268 }
 0x142   : > { %v1658_v55 = vsel %vm9600_vm14, %v1615_v54, %v1269_v56  ;;  %793 = vrot.lane.b32.xlu1 %v754_v27, %s9595_s16  ;;  %v649_v27 = vor.u32 %v8175_v1, %v645_v46  ;;  %v8305_v1 = vrot.slane %v8251_v47, 1  ;;  %v1231_v46 = vrot.slane %v950_v36, 3 }
 0x143   : > { %v1701_v57 = vsel %vm1683_vm15, %v1658_v55, %v1356_v53  ;;  %706 = vrot.lane.b32.xlu0 %v646_v14, %s7383_s27  ;;  %v1333_v53 = vrot.slane %v8295_v28, 3  ;;  %v393_v55 = vld [vmem:[%s7529_s23 + $0xa8] sm:$0xf] }
 0x144   : > { %6581 = vmatmul.mubr.msk.bf16.gmra.mrb[32].mxu0 %vm9599_vm6, %v1701_v57  ;;  %v780_v45 = vpop.permute.xlu1 %779  ;;  %v654_v34 = vsel %vm506_vm3, %v649_v27, %v653_v23  ;;  %v758_v44 = vsel %vm719_vm0, %v755_v5, %v8305_v1  ;;  %v8333_v5 = vor.u32 %v1231_v46, %v1230_v42  ;;  %v396_v57 = vld [vmem:[%s7529_s23 + $0xac] sm:$0xf] }
 0x145   : > { %v693_v62 = vpop.permute.xlu0 %692  ;;  %6584 = vmatprep.mubr.msk.bf16.mxu0 %vm7386_vm7, %v7377_v0 }
 0x146   : > { %v1401_v2 = vsel %vm1381_vm8, %v7269_v41, %v693_v62  ;;  %996 = vrot.lane.b32.xlu1 %v941_v58, %s7385_s24  ;;  %v1233_v61 = vsel %vm1153_vm4, %v1228_v8, %v8333_v5  ;;  %v657_v62 = vor.u32 %v8219_v22, %v653_v23  ;;  %v661_v41 = vrot.slane %v8260_v52, 1 }
 0x147   : > { %852 = vrot.lane.b32.xlu0 %v756_v59, %s9598_s21  ;;  %v1445_v9 = vsel %vm9592_vm9, %v1401_v2, %v780_v45  ;;  %v949_v45 = vrot.slane %v947_v3, 1  ;;  %v8349_v2 = vcombine.low %v393_v55, %v396_v57  ;;  %v816_v22 = vrot.slane %v8295_v28, 1  ;;  %v8413_v57 = vld [vmem:[%s7529_s23 + $0xa8] ss:$0 sps:$4 sm:$0x77]  }
 0x148   : > { %v983_v7 = vpop.permute.xlu1 %982  ;;  %v662_v8 = vsel %vm506_vm3, %v657_v62, %v661_v41 }
 0x149   : > { %v839_v13 = vpop.permute.xlu0 %838  ;;  %v1235_v52 = vshrl.u32 %v8349_v2, 16  ;;  %v1104_v23 = vrot.slane %v8349_v2, 2 }
 0x14a   : > { %v1488_v15 = vsel %vm9593_vm10, %v1445_v9, %v839_v13  ;;  %1140 = vrot.lane.b32.xlu1 %v1046_v4, %s9594_s17 }
 0x14b   : > { %1083 = vrot.lane.b32.xlu0 %v1044_v12, %s9597_s22  ;;  %v1531_v29 = vsel %vm1511_vm11, %v1488_v15, %v983_v7  ;;  %v8301_v12 = vor.u32 %v943_v19, %v942_v18  ;;  %v1238_v15 = vshll.u32 %v8349_v2, 16 }
 0x14c   : > { %v1127_v24 = vpop.permute.xlu1 %1126 }
 0x14d   : > { %v1070_v30 = vpop.permute.xlu0 %1069  ;;  %v945_v26 = vsel %vm9590_vm5, %v940_v50, %v8301_v12  ;;  %v8330_v50 = vsel %vm1009_vm1, %v1045_v20, %v8317_v37  ;;  %v1334_v20 = vsel %vm9591_vm2, %v1331_v6, %v1333_v53 }
 0x14e   : > { %v1574_v32 = vsel %vm9589_vm12, %v1531_v29, %v1070_v30  ;;  %1371 = vrot.lane.b32.xlu1 %v1332_v17, %s7382_s28  ;;  %v8373_v29 = vcombine.low %v393_v55, %v393_v55 }
 0x14f   : > { %1284 = vrot.lane.b32.xlu0 %v1229_v25, %s9596_s14  ;;  %v1617_v38 = vsel %vm1597_vm13, %v1574_v32, %v1127_v24  ;;  %v8365_v24 = vld [vmem:[%s7529_s23 + $0xa0] ss:$0 sps:$4 sm:$0x77]   ;;  %v817_v32 = vsel %vm719_vm0, %v8305_v1, %v816_v22 }
 0x150   : > { %v1358_v33 = vpop.permute.xlu1 %1357  ;;  %v759_v55 = vrot.slane %v8365_v24, 1 }
 0x151   : > { %v1271_v39 = vpop.permute.xlu0 %1270 }
 0x152   : > { %v1660_v21 = vsel %vm9600_vm14, %v1617_v38, %v1271_v39  ;;  %795 = vrot.lane.b32.xlu1 %v756_v59, %s9595_s16  ;;  %v952_v59 = vrot.slane %v950_v36, 2  ;;  %v667_v38 = vshll.u32 %v8365_v24, 16  ;;  %v1105_v39 = vsel %vm1009_vm1, %v8317_v37, %v1104_v23 }
 0x153   : > { %v1703_v40 = vsel %vm1683_vm15, %v1660_v21, %v1358_v33  ;;  %708 = vrot.lane.b32.xlu0 %v654_v34, %s7383_s27  ;;  %v1237_v33 = vrot.slane %v1235_v52, 2  ;;  %v1240_v34 = vrot.slane %v1238_v15, 3  ;;  %v1335_v21 = vrot.slane %v8349_v2, 3 }
 0x154   : > { %6585 = vmatmul.mubr.msk.bf16.gmra.mrb[36].mxu0 %vm9599_vm6, %v1703_v40  ;;  %v782_v43 = vpop.permute.xlu1 %781  ;;  %v8355_v6 = vor.u32 %v952_v59, %v949_v45  ;;  %v956_v40 = vshrl.u32 %v8373_v29, 16  ;;  %v760_v62 = vsel %vm719_vm0, %v8305_v1, %v759_v55  ;;  %v7387_v15 = vmov 0  }
 0x155   : > { %v695_v11 = vpop.permute.xlu0 %694  ;;  %6588 = vmatprep.mubr.msk.bf16.mxu0 %vm7386_vm7, %v7377_v0 }
 0x156   : > { %v1403_v49 = vsel %vm1381_vm8, %v7270_v48, %v695_v11  ;;  %998 = vrot.lane.b32.xlu1 %v945_v26, %s7385_s24  ;;  %v954_v27 = vsel %vm9590_vm5, %v8301_v12, %v8355_v6  ;;  %v7271_v12 = vld [vmem:[%s7529_s23 + $0x58] sm:$0xff]   ;;  %v959_v26 = vshll.u32 %v8373_v29, 16  ;;  %v397_v11 = vld [vmem:[%s7529_s23 + $0xb0] sm:$0xf]  ;;  %v398_v48 = vld [vmem:[%s7529_s23 + $0xb4] sm:$0x1] }
 0x157   : > { %854 = vrot.lane.b32.xlu0 %v758_v44, %s9598_s21  ;;  %v1447_v54 = vsel %vm9592_vm9, %v1403_v49, %v782_v43  ;;  %v8418_v59 = vcombine.low %v397_v11, %v398_v48 }
 0x158   : > { %v985_v14 = vpop.permute.xlu1 %984 }
 0x159   : > { %v841_v56 = vpop.permute.xlu0 %840 }
 0x15a   : > { %v1490_v58 = vsel %vm9593_vm10, %v1447_v54, %v841_v56  ;;  %1142 = vrot.lane.b32.xlu1 %v8330_v50, %s9594_s17  ;;  %v8402_v54 = vrot.slane %v667_v38, 1  ;;  %v1336_v56 = vsel %vm9591_vm2, %v1333_v53, %v1335_v21 }
 0x15b   : > { %1085 = vrot.lane.b32.xlu0 %v1046_v4, %s9597_s22  ;;  %v1533_v7 = vsel %vm1511_vm11, %v1490_v58, %v985_v14  ;;  %v665_v14 = vor.u32 %v8263_v35, %v661_v41  ;;  %v958_v58 = vrot.slane %v956_v40, 1 }
 0x15c   : > { %v1129_v60 = vpop.permute.xlu1 %1128 }
 0x15d   : > { %v1072_v4 = vpop.permute.xlu0 %1071  ;;  %v670_v53 = vsel %vm506_vm3, %v665_v14, %v8402_v54 }
 0x15e   : > { %v1576_v9 = vsel %vm9589_vm12, %v1533_v7, %v1072_v4  ;;  %1373 = vrot.lane.b32.xlu1 %v1334_v20, %s7382_s28  ;;  %v961_v20 = vrot.slane %v959_v26, 2  ;;  %v6019_v7 = vcombine.low %v397_v11, %v397_v11 }
 0x15f   : > { %1286 = vrot.lane.b32.xlu0 %v1233_v61, %s9596_s14  ;;  %v1619_v17 = vsel %vm1597_vm13, %v1576_v9, %v1129_v60  ;;  %v1244_v9 = vshrl.u32 %v8418_v59, 16 }
 0x160   : > { %v1360_v13 = vpop.permute.xlu1 %1359  ;;  %v8431_v41 = vor.u32 %v961_v20, %v958_v58  ;;  %v7273_v58 = vld [vmem:[%s7529_s23 + $0x68] sm:$0xff]  }
 0x161   : > { %v1273_v18 = vpop.permute.xlu0 %1272 }
 0x162   : > { %v1662_v19 = vsel %vm9600_vm14, %v1619_v17, %v1273_v18  ;;  %797 = vrot.lane.b32.xlu1 %v758_v44, %s9595_s16  ;;  %v8394_v44 = vor.u32 %v1240_v34, %v1237_v33  ;;  %v963_v18 = vsel %vm9590_vm5, %v8355_v6, %v8431_v41  ;;  %v7272_v6 = vld [vmem:[%s7529_s23 + $0x60] sm:$0xff]   ;;  %vm9608_vm5 = vcmask 326656  }
 0x163   : > { %v1705_v25 = vsel %vm1683_vm15, %v1662_v19, %v1360_v13  ;;  %710 = vrot.lane.b32.xlu0 %v662_v8, %s7383_s27  ;;  %v1247_v13 = vshll.u32 %v8418_v59, 16  ;;  %v8473_v19 = vrot.slane %v6019_v7, 2 }
 0x164   : > { %6589 = vmatmul.mubr.msk.bf16.gmra.mrb[40].mxu0 %vm9599_vm6, %v1705_v25  ;;  %v784_v30 = vpop.permute.xlu1 %783  ;;  %v1242_v35 = vsel %vm1153_vm4, %v8333_v5, %v8394_v44  ;;  %v818_v5 = vrot.slane %v8413_v57, 1  ;;  %v6860_v57 = vld [vmem:[#allocation5 + $0x8c] ss:$16 sps:$4 sm:$0xff]  }
 0x165   : > { %v697_v3 = vpop.permute.xlu0 %696  ;;  %6592 = vmatprep.mubr.msk.bf16.mxu0 %vm7386_vm7, %v7377_v0  ;;  %v1249_v33 = vrot.slane %v1247_v13, 3  ;;  %v1107_v28 = vsel %vm1009_vm1, %v1104_v23, %v8473_v19 }
 0x166   : > { %v1405_v36 = vsel %vm1381_vm8, %v7271_v12, %v697_v3  ;;  %1000 = vrot.lane.b32.xlu1 %v954_v27, %s7385_s24  ;;  %v819_v27 = vsel %vm719_vm0, %v816_v22, %v818_v5  ;;  %v1337_v22 = vrot.slane %v8418_v59, 3 }
 0x167   : > { %856 = vrot.lane.b32.xlu0 %v817_v32, %s9598_s21  ;;  %v1449_v42 = vsel %vm9592_vm9, %v1405_v36, %v784_v30  ;;  %v1049_v30 = vrot.slane %v8373_v29, 2  ;;  %v1246_v32 = vrot.slane %v1244_v9, 2  ;;  %v6863_v29 = vld [vmem:[#allocation5 + $0xac] ss:$16 sps:$4 sm:$0xff]  }
 0x168   : > { %v987_v43 = vpop.permute.xlu1 %986  ;;  %v1338_v23 = vsel %vm9591_vm2, %v1335_v21, %v1337_v22  ;;  %vm9609_vm2 = vcmask 326656  }
 0x169   : > { %v843_v46 = vpop.permute.xlu0 %842  ;;  %v1050_v36 = vsel %vm1009_vm1, %v8317_v37, %v1049_v30  ;;  %v8497_v38 = vor.u32 %v1249_v33, %v1246_v32 }
 0x16a   : > { %v1492_v49 = vsel %vm9593_vm10, %v1449_v42, %v843_v46  ;;  %1144 = vrot.lane.b32.xlu1 %v1105_v39, %s9594_s17 }
 0x16b   : > { %1087 = vrot.lane.b32.xlu0 %v8330_v50, %s9597_s22  ;;  %v1535_v50 = vsel %vm1511_vm11, %v1492_v49, %v987_v43  ;;  %v1251_v37 = vsel %vm1153_vm4, %v8394_v44, %v8497_v38 }
 0x16c   : > { %v1131_v45 = vpop.permute.xlu1 %1130 }
 0x16d   : > { %v1074_v60 = vpop.permute.xlu0 %1073 }
 0x16e   : > { %v1578_v61 = vsel %vm9589_vm12, %v1535_v50, %v1074_v60  ;;  %1375 = vrot.lane.b32.xlu1 %v1336_v56, %s7382_s28  ;;  %vm2497_vm12 = vcmask 257024  }
 0x16f   : > { %1288 = vrot.lane.b32.xlu0 %v1242_v35, %s9596_s14  ;;  %v1621_v8 = vsel %vm1597_vm13, %v1578_v61, %v1131_v45  ;;  %2498 = vst.msk [vmem:[#allocation2] sm:$0xf] %vm2497_vm12, %v7387_v15  ;;  %2499 = vst.msk [vmem:[#allocation2 + $0x4] sm:$0xf] %vm2497_vm12, %v7387_v15 }
 0x170   : > { %v1362_v4 = vpop.permute.xlu1 %1361  ;;  %2500 = vst.msk [vmem:[#allocation2 + $0x8] sm:$0xf] %vm2497_vm12, %v7387_v15  ;;  %2501 = vst.msk [vmem:[#allocation2 + $0xc] sm:$0xf] %vm2497_vm12, %v7387_v15 }
 0x171   : > { %v1275_v52 = vpop.permute.xlu0 %1274  ;;  %2502 = vst.msk [vmem:[#allocation2 + $0x10] sm:$0xf] %vm2497_vm12, %v7387_v15  ;;  %2503 = vst.msk [vmem:[#allocation2 + $0x14] sm:$0xf] %vm2497_vm12, %v7387_v15 }
 0x172   : > { %2504 = vst.msk [vmem:[#allocation2 + $0x18] sm:$0xf] %vm2497_vm12, %v7387_v15  ;;  %2505 = vst.msk [vmem:[#allocation2 + $0x1c] sm:$0xf] %vm2497_vm12, %v7387_v15  ;;  %v1664_v1 = vsel %vm9600_vm14, %v1621_v8, %v1275_v52  ;;  %799 = vrot.lane.b32.xlu1 %v760_v62, %s9595_s16  ;;  %s9626_s16 = smov 48  }
 0x173   : > { %2506 = vst.msk [vmem:[#allocation2 + $0x20] sm:$0xf] %vm2497_vm12, %v7387_v15  ;;  %2507 = vst.msk [vmem:[#allocation2 + $0x24] sm:$0xf] %vm2497_vm12, %v7387_v15  ;;  %v1707_v17 = vsel %vm1683_vm15, %v1664_v1, %v1362_v4  ;;  %712 = vrot.lane.b32.xlu0 %v670_v53, %s7383_s27 }
 0x174   : > { %2508 = vst.msk [vmem:[#allocation2 + $0x28] sm:$0xf] %vm2497_vm12, %v7387_v15  ;;  %2509 = vst.msk [vmem:[#allocation2 + $0x2c] sm:$0xf] %vm2497_vm12, %v7387_v15  ;;  %6593 = vmatmul.mubr.msk.bf16.gmra.mrb[44].mxu0 %vm9599_vm6, %v1707_v17  ;;  %v786_v25 = vpop.permute.xlu1 %785 }
 0x175   : > { %2510 = vst.msk [vmem:[#allocation2 + $0x30] sm:$0xf] %vm2497_vm12, %v7387_v15  ;;  %2511 = vst.msk [vmem:[#allocation2 + $0x34] sm:$0xf] %vm2497_vm12, %v7387_v15  ;;  %v699_v34 = vpop.permute.xlu0 %698  ;;  %6596 = vmatprep.mubr.msk.bf16.mxu0 %vm7386_vm7, %v7377_v0 }
 0x176   : > { %2512 = vst.msk [vmem:[#allocation2 + $0x38] sm:$0xf] %vm2497_vm12, %v7387_v15  ;;  %v1407_v3 = vsel %vm1381_vm8, %v7272_v6, %v699_v34  ;;  %1002 = vrot.lane.b32.xlu1 %v963_v18, %s7385_s24  ;;  %v8540_v34 = vld [vmem:[%s9578_s2] ss:$0 sm:$0xff] }
 0x177   : > { %858 = vrot.lane.b32.xlu0 %v819_v27, %s9598_s21  ;;  %v1451_v39 = vsel %vm9592_vm9, %v1407_v3, %v786_v25 }
 0x178   : > { %v989_v12 = vpop.permute.xlu1 %988 }
 0x179   : > { %v845_v40 = vpop.permute.xlu0 %844 }
 0x17a   : > { %v1494_v26 = vsel %vm9593_vm10, %v1451_v39, %v845_v40  ;;  %1146 = vrot.lane.b32.xlu1 %v1107_v28, %s9594_s17  ;;  %s7389_s17 = smov [#allocation8]  }
 0x17b   : > { %1089 = vrot.lane.b32.xlu0 %v1050_v36, %s9597_s22  ;;  %v1537_v42 = vsel %vm1511_vm11, %v1494_v26, %v989_v12  ;;  %s9625_s22 = smov 16  }
 0x17c   : > { %v1133_v43 = vpop.permute.xlu1 %1132 }
 0x17d   : > { %v1076_v46 = vpop.permute.xlu0 %1075 }
 0x17e   : > { %v1580_v11 = vsel %vm9608_vm5, %v1537_v42, %v1076_v46  ;;  %1377 = vrot.lane.b32.xlu1 %v1338_v23, %s7382_s28 }
 0x17f   : > { %1290 = vrot.lane.b32.xlu0 %v1251_v37, %s9596_s14  ;;  %v1623_v2 = vsel %vm1597_vm13, %v1580_v11, %v1133_v43  ;;  %s6392_s14 = sshll.u32 %s7461_s13, 4 }
 0x180   : > { %v1364_v48 = vpop.permute.xlu1 %1363 }
 0x181   : > { %v1277_v49 = vpop.permute.xlu0 %1276 }
 0x182   : > { %v1666_v21 = vsel %vm9600_vm14, %v1623_v2, %v1277_v49 }
 0x183   : > { %v1709_v14 = vsel %vm1683_vm15, %v1666_v21, %v1364_v48 }
 0x184   : > { %6597 = vmatmul.mubr.msk.bf16.gmra.mrb[48].mxu0 %vm9599_vm6, %v1709_v14  ;;  %v788_v44 = vpop.permute.xlu1 %787 }
 0x185   : > { %v701_v56 = vpop.permute.xlu0 %700  ;;  %6600 = vmatprep.mubr.msk.bf16.mxu0 %vm7386_vm7, %v7377_v0 }
 0x186   : > { %v1409_v20 = vsel %vm1381_vm8, %v7273_v58, %v701_v56 }
 0x187   : > { %v1453_v35 = vsel %vm9592_vm9, %v1409_v20, %v788_v44 }
 0x188   : > { %v991_v45 = vpop.permute.xlu1 %990 }
 0x189   : > { %v847_v50 = vpop.permute.xlu0 %846 }
 0x18a   : > { %v1496_v60 = vsel %vm9593_vm10, %v1453_v35, %v847_v50 }
 0x18b   : > { %v1539_v53 = vsel %vm1511_vm11, %v1496_v60, %v991_v45 }
 0x18c   : > { %v1135_v61 = vpop.permute.xlu1 %1134 }
 0x18d   : > { %v1078_v62 = vpop.permute.xlu0 %1077 }
 0x18e   : > { %v1582_v7 = vsel %vm9608_vm5, %v1539_v53, %v1078_v62 }
 0x18f   : > { %v1625_v9 = vsel %vm1597_vm13, %v1582_v7, %v1135_v61 }
 0x190   : > { %v1366_v4 = vpop.permute.xlu1 %1365 }
 0x191   : > { %v1279_v13 = vpop.permute.xlu0 %1278 }
 0x192   : > { %v1668_v8 = vsel %vm9600_vm14, %v1625_v9, %v1279_v13 }
 0x193   : > { %v1711_v52 = vsel %vm1683_vm15, %v1668_v8, %v1366_v4 }
 0x194   : > { %6601 = vmatmul.mubr.msk.bf16.gmra.mrb[52].mxu0 %vm9599_vm6, %v1711_v52  ;;  %v790_v1 = vpop.permute.xlu1 %789 }
 0x195   : > { %v703_v17 = vpop.permute.xlu0 %702  ;;  %6604 = vmatprep.mubr.msk.bf16.mxu0 %vm7386_vm7, %v7377_v0 }
 0x196   : > { %v1411_v18 = vsel %vm1381_vm8, %v8029_v16, %v703_v17 }
 0x197   : > { %v1455_v27 = vsel %vm9592_vm9, %v1411_v18, %v790_v1 }
 0x198   : > { %v993_v25 = vpop.permute.xlu1 %992 }
 0x199   : > { %v849_v32 = vpop.permute.xlu0 %848 }
 0x19a   : > { %v1498_v33 = vsel %vm9593_vm10, %v1455_v27, %v849_v32 }
 0x19b   : > { %v1541_v3 = vsel %vm1511_vm11, %v1498_v33, %v993_v25 }
 0x19c   : > { %v1137_v6 = vpop.permute.xlu1 %1136 }
 0x19d   : > { %v1080_v28 = vpop.permute.xlu0 %1079  ;;  %v1850_v12 = vpop.f32.mrb[0].mxu0 }
 0x19e   : > { %v1584_v36 = vsel %vm9608_vm5, %v1541_v3, %v1080_v28  ;;  %v6550_v39 = vpop.f32.mrb[1].mxu0 }
 0x19f   : > { %v1853_v16 = vpop.f32.mrb[2].mxu0  ;;  %v1627_v23 = vsel %vm1597_vm13, %v1584_v36, %v1137_v6 }
 0x1a0   : > { %v6551_v40 = vpop.f32.mrb[3].mxu0  ;;  %v1368_v26 = vpop.permute.xlu1 %1367 }
 0x1a1   : > { %v1281_v43 = vpop.permute.xlu0 %1280 }
 0x1a2   : > { %v1670_v37 = vsel %vm9600_vm14, %v1627_v23, %v1281_v43 }
 0x1a3   : > { %v1713_v42 = vsel %vm1683_vm15, %v1670_v37, %v1368_v26 }
 0x1a4   : > { %6605 = vmatmul.mubr.msk.bf16.gmra.mrb[56].mxu0 %vm9599_vm6, %v1713_v42  ;;  %v792_v46 = vpop.permute.xlu1 %791 }
 0x1a5   : > { %v705_v11 = vpop.permute.xlu0 %704  ;;  %6608 = vmatprep.mubr.msk.bf16.mxu0 %vm7386_vm7, %v7377_v0 }
 0x1a6   : > { %v1413_v48 = vsel %vm1381_vm8, %v8075_v10, %v705_v11 }
 0x1a7   : > { %v1858_v2 = vpop.f32.mrb[4].mxu0  ;;  %v1457_v44 = vsel %vm9592_vm9, %v1413_v48, %v792_v46 }
 0x1a8   : > { %v1859_v49 = vadd.f32 %v8540_v34, %v1858_v2  ;;  %v6554_v21 = vpop.f32.mrb[5].mxu0  ;;  %v995_v14 = vpop.permute.xlu1 %994 }
 0x1a9   : > { %v1861_v56 = vpop.f32.mrb[6].mxu0  ;;  %v851_v58 = vpop.permute.xlu0 %850 }
 0x1aa   : > { %v2018_v20 = vmax.f32 %v1859_v49, 0.0  ;;  %v1862_v45 = vadd.f32 %v8540_v34, %v1861_v56  ;;  %v1500_v35 = vsel %vm9593_vm10, %v1457_v44, %v851_v58  ;;  %v6555_v50 = vpop.f32.mrb[7].mxu0 }
 0x1ab   : > { %v1543_v10 = vsel %vm1511_vm11, %v1500_v35, %v995_v14 }
 0x1ac   : > { %v2102_v60 = vrot.slane %v2018_v20, 1  ;;  %v2019_v61 = vmax.f32 %v1862_v45, 0.0  ;;  %v1139_v53 = vpop.permute.xlu1 %1138 }
 0x1ad   : > { %v1082_v62 = vpop.permute.xlu0 %1081 }
 0x1ae   : > { %v2104_v7 = vrot.slane %v2019_v61, 1  ;;  %v1586_v4 = vsel %vm9608_vm5, %v1543_v10, %v1082_v62  ;;  %vm2495_vm5 = vcmask 253952  }
 0x1af   : > { %v1629_v52 = vsel %vm1597_vm13, %v1586_v4, %v1139_v53  ;;  %2513 = vst.msk [vmem:[#allocation2 + $0x3c] sm:$0x1] %vm2495_vm5, %v7387_v15 }
 0x1b0   : > { %v2105_v9 = vsel %vm719_vm0, %v2102_v60, %v2104_v7  ;;  %v1370_v13 = vpop.permute.xlu1 %1369 }
 0x1b1   : > { %v8559_v8 = vmax.f32 %v2018_v20, %v2105_v9  ;;  %v1283_v1 = vpop.permute.xlu0 %1282 }
 0x1b2   : > { %v1672_v17 = vsel %vm9600_vm14, %v1629_v52, %v1283_v1 }
 0x1b3   : > { %v1715_v18 = vsel %vm1683_vm15, %v1672_v17, %v1370_v13 }
 0x1b4   : > { %6609 = vmatmul.mubr.msk.bf16.gmra.mrb[60].mxu0 %vm9599_vm6, %v1715_v18  ;;  %v794_v25 = vpop.permute.xlu1 %793 }
 0x1b5   : > { %v707_v27 = vpop.permute.xlu0 %706  ;;  %6612 = vmatprep.mubr.msk.bf16.mxu0 %vm7386_vm7, %v7377_v0 }
 0x1b6   : > { %v1415_v32 = vsel %vm1381_vm8, %v8119_v51, %v707_v27 }
 0x1b7   : > { %v1866_v33 = vpop.f32.mrb[8].mxu0  ;;  %v1459_v12 = vsel %vm9592_vm9, %v1415_v32, %v794_v25 }
 0x1b8   : > { %v1867_v6 = vadd.f32 %v8540_v34, %v1866_v33  ;;  %v6558_v3 = vpop.f32.mrb[9].mxu0  ;;  %v997_v28 = vpop.permute.xlu1 %996 }
 0x1b9   : > { %v1869_v36 = vpop.f32.mrb[10].mxu0  ;;  %v853_v39 = vpop.permute.xlu0 %852 }
 0x1ba   : > { %v2020_v16 = vmax.f32 %v1867_v6, 0.0  ;;  %v1870_v40 = vadd.f32 %v8540_v34, %v1869_v36  ;;  %v1502_v26 = vsel %vm9593_vm10, %v1459_v12, %v853_v39  ;;  %v6559_v23 = vpop.f32.mrb[11].mxu0 }
 0x1bb   : > { %v1545_v42 = vsel %vm1511_vm11, %v1502_v26, %v997_v28 }
 0x1bc   : > { %v2106_v51 = vrot.slane %v2020_v16, 1  ;;  %v2021_v43 = vmax.f32 %v1870_v40, 0.0  ;;  %v1141_v37 = vpop.permute.xlu1 %1140 }
 0x1bd   : > { %v1084_v46 = vpop.permute.xlu0 %1083 }
 0x1be   : > { %v2107_v11 = vsel %vm719_vm0, %v2104_v7, %v2106_v51  ;;  %v2108_v48 = vrot.slane %v2021_v43, 1  ;;  %v1588_v15 = vsel %vm9609_vm2, %v1545_v42, %v1084_v46 }
 0x1bf   : > { %v2224_v2 = vmax.f32 %v2019_v61, %v2107_v11  ;;  %v1631_v44 = vsel %vm1597_vm13, %v1588_v15, %v1141_v37 }
 0x1c0   : > { %v2109_v49 = vsel %vm719_vm0, %v2106_v51, %v2108_v48  ;;  %v1372_v21 = vpop.permute.xlu1 %1371 }
 0x1c1   : > { %v8579_v14 = vmax.f32 %v2020_v16, %v2109_v49  ;;  %v1285_v56 = vpop.permute.xlu0 %1284 }
 0x1c2   : > { %v1674_v58 = vsel %vm9600_vm14, %v1631_v44, %v1285_v56 }
 0x1c3   : > { %v2305_v20 = vrot.slane %v8579_v14, 2  ;;  %v1717_v45 = vsel %vm1683_vm15, %v1674_v58, %v1372_v21 }
 0x1c4   : > { %6613 = vmatmul.mubr.msk.bf16.gmra.mrb[64].mxu0 %vm9599_vm6, %v1717_v45  ;;  %v796_v35 = vpop.permute.xlu1 %795 }
 0x1c5   : > { %v709_v50 = vpop.permute.xlu0 %708  ;;  %6616 = vmatprep.mubr.msk.bf16.mxu0 %vm7386_vm7, %v7377_v0 }
 0x1c6   : > { %v1417_v60 = vsel %vm1381_vm8, %v8163_v31, %v709_v50 }
 0x1c7   : > { %v1874_v61 = vpop.f32.mrb[12].mxu0  ;;  %v1461_v7 = vsel %vm9592_vm9, %v1417_v60, %v796_v35 }
 0x1c8   : > { %v1875_v53 = vadd.f32 %v8540_v34, %v1874_v61  ;;  %v6562_v10 = vpop.f32.mrb[13].mxu0  ;;  %v999_v62 = vpop.permute.xlu1 %998 }
 0x1c9   : > { %v1877_v4 = vpop.f32.mrb[14].mxu0  ;;  %v855_v9 = vpop.permute.xlu0 %854 }
 0x1ca   : > { %v2022_v13 = vmax.f32 %v1875_v53, 0.0  ;;  %v1878_v52 = vadd.f32 %v8540_v34, %v1877_v4  ;;  %v1504_v1 = vsel %vm9593_vm10, %v1461_v7, %v855_v9  ;;  %v6563_v17 = vpop.f32.mrb[15].mxu0 }
 0x1cb   : > { %v1547_v31 = vsel %vm1511_vm11, %v1504_v1, %v999_v62 }
 0x1cc   : > { %v2110_v18 = vrot.slane %v2022_v13, 1  ;;  %v2023_v25 = vmax.f32 %v1878_v52, 0.0  ;;  %v1143_v27 = vpop.permute.xlu1 %1142 }
 0x1cd   : > { %v1086_v32 = vpop.permute.xlu0 %1085 }
 0x1ce   : > { %v2111_v33 = vsel %vm719_vm0, %v2108_v48, %v2110_v18  ;;  %v2112_v6 = vrot.slane %v2023_v25, 1  ;;  %v1590_v3 = vsel %vm9609_vm2, %v1547_v31, %v1086_v32 }
 0x1cf   : > { %v2226_v28 = vmax.f32 %v2021_v43, %v2111_v33  ;;  %v1633_v40 = vsel %vm1597_vm13, %v1590_v3, %v1143_v27 }
 0x1d0   : > { %v2113_v12 = vsel %vm719_vm0, %v2110_v18, %v2112_v6  ;;  %v1374_v36 = vpop.permute.xlu1 %1373 }
 0x1d1   : > { %v2307_v39 = vrot.slane %v2226_v28, 2  ;;  %v8598_v16 = vmax.f32 %v2022_v13, %v2113_v12  ;;  %v1287_v26 = vpop.permute.xlu0 %1286 }
 0x1d2   : > { %v1676_v23 = vsel %vm9600_vm14, %v1633_v40, %v1287_v26 }
 0x1d3   : > { %v2308_v51 = vsel %vm1009_vm1, %v2305_v20, %v2307_v39  ;;  %v2309_v37 = vrot.slane %v8598_v16, 2  ;;  %v1719_v42 = vsel %vm1683_vm15, %v1676_v23, %v1374_v36 }
 0x1d4   : > { %v2420_v46 = vmax.f32 %v8559_v8, %v2308_v51  ;;  %6617 = vmatmul.mubr.msk.bf16.gmra.mrb[68].mxu0 %vm9599_vm6, %v1719_v42  ;;  %v798_v43 = vpop.permute.xlu1 %797 }
 0x1d5   : > { %v2310_v11 = vsel %vm1009_vm1, %v2307_v39, %v2309_v37  ;;  %v711_v48 = vpop.permute.xlu0 %710  ;;  %6620 = vmatprep.mubr.msk.bf16.mxu0 %vm7386_vm7, %v7377_v0 }
 0x1d6   : > { %2459 = vst.msk [vmem:[#allocation3 + $0x10] sm:$0xff] %vm1511_vm11, %v2420_v46  ;;  %v2421_v15 = vmax.f32 %v2224_v2, %v2310_v11  ;;  %v1419_v49 = vsel %vm1381_vm8, %v8207_v63, %v711_v48 }
 0x1d7   : > { %v1882_v21 = vpop.f32.mrb[16].mxu0  ;;  %v1463_v58 = vsel %vm9592_vm9, %v1419_v49, %v798_v43 }
 0x1d8   : > { %2460 = vst.msk [vmem:[#allocation3 + $0x18] sm:$0xff] %vm1511_vm11, %v2421_v15  ;;  %v1883_v8 = vadd.f32 %v8540_v34, %v1882_v21  ;;  %v6566_v44 = vpop.f32.mrb[17].mxu0  ;;  %v1001_v56 = vpop.permute.xlu1 %1000 }
 0x1d9   : > { %v1885_v20 = vpop.f32.mrb[18].mxu0  ;;  %v857_v45 = vpop.permute.xlu0 %856 }
 0x1da   : > { %v2024_v35 = vmax.f32 %v1883_v8, 0.0  ;;  %v1886_v50 = vadd.f32 %v8540_v34, %v1885_v20  ;;  %v1506_v60 = vsel %vm9593_vm10, %v1463_v58, %v857_v45  ;;  %v6567_v2 = vpop.f32.mrb[19].mxu0 }
 0x1db   : > { %v1549_v10 = vsel %vm1511_vm11, %v1506_v60, %v1001_v56 }
 0x1dc   : > { %v2114_v61 = vrot.slane %v2024_v35, 1  ;;  %v2025_v53 = vmax.f32 %v1886_v50, 0.0  ;;  %v1145_v63 = vpop.permute.xlu1 %1144 }
 0x1dd   : > { %v1088_v62 = vpop.permute.xlu0 %1087 }
 0x1de   : > { %v2115_v7 = vsel %vm719_vm0, %v2112_v6, %v2114_v61  ;;  %v2116_v4 = vrot.slane %v2025_v53, 1  ;;  %v1592_v9 = vsel %vm9609_vm2, %v1549_v10, %v1088_v62  ;;  %v2599_v62 = vld [vmem:[#allocation2] sm:$0xf] }
 0x1df   : > { %v8621_v13 = vmax.f32 %v2023_v25, %v2115_v7  ;;  %v1635_v27 = vsel %vm1597_vm13, %v1592_v9, %v1145_v63  ;;  %v2600_v7 = vld [vmem:[#allocation2 + $0x4] sm:$0xf] }
 0x1e0   : > { %v2117_v52 = vsel %vm719_vm0, %v2114_v61, %v2116_v4  ;;  %v1376_v1 = vpop.permute.xlu1 %1375 }
 0x1e1   : > { %v2311_v17 = vrot.slane %v8621_v13, 2  ;;  %v8625_v18 = vmax.f32 %v2024_v35, %v2117_v52  ;;  %v1289_v31 = vpop.permute.xlu0 %1288 }
 0x1e2   : > { %v1678_v32 = vsel %vm9600_vm14, %v1635_v27, %v1289_v31  ;;  %v2613_v27 = vld [vmem:[#allocation2] sm:$0xe]  ;;  %v8658_v31 = vcombine.low %v2599_v62, %v2600_v7 }
 0x1e3   : > { %v2312_v33 = vsel %vm1009_vm1, %v2309_v37, %v2311_v17  ;;  %v2313_v6 = vrot.slane %v8625_v18, 2  ;;  %v1721_v3 = vsel %vm1683_vm15, %v1678_v32, %v1376_v1 }
 0x1e4   : > { %v2422_v25 = vmax.f32 %v8579_v14, %v2312_v33  ;;  %6621 = vmatmul.mubr.msk.bf16.gmra.mrb[72].mxu0 %vm9599_vm6, %v1721_v3  ;;  %v800_v28 = vpop.permute.xlu1 %799  ;;  %v6063_v3 = vcombine.low %v2613_v27, %v2600_v7 }
 0x1e5   : > { %v713_v12 = vpop.permute.xlu0 %712  ;;  %6624 = vmatprep.mubr.msk.bf16.mxu0 %vm7386_vm7, %v7377_v0 }
 0x1e6   : > { %2461 = vst.msk [vmem:[#allocation3 + $0x20] sm:$0xff] %vm1511_vm11, %v2422_v25  ;;  %v1421_v36 = vsel %vm1381_vm8, %v8251_v47, %v713_v12 }
 0x1e7   : > { %v1890_v39 = vpop.f32.mrb[20].mxu0  ;;  %v1465_v51 = vsel %vm9592_vm9, %v1421_v36, %v800_v28  ;;  %vm2524_vm9 = vcmask 257027   ;;  %v2662_v28 = vshll.u32 %v8658_v31, 16 }
 0x1e8   : > { %v1891_v40 = vadd.f32 %v8540_v34, %v1890_v39  ;;  %v6570_v26 = vpop.f32.mrb[21].mxu0  ;;  %v1003_v23 = vpop.permute.xlu1 %1002 }
 0x1e9   : > { %v1893_v14 = vpop.f32.mrb[22].mxu0  ;;  %v859_v37 = vpop.permute.xlu0 %858 }
 0x1ea   : > { %v2026_v42 = vmax.f32 %v1891_v40, 0.0  ;;  %v8642_v46 = vadd.f32 %v8540_v34, %v1893_v14  ;;  %v1508_v43 = vsel %vm9593_vm10, %v1465_v51, %v859_v37  ;;  %v6571_v11 = vpop.f32.mrb[23].mxu0  ;;  %vm2526_vm10 = vcmask 256000  }
 0x1eb   : > { %v1551_v21 = vsel %vm1511_vm11, %v1508_v43, %v1003_v23  ;;  %v2731_v51 = vrot.slane %v6063_v3, 1 }
 0x1ec   : > { %v2118_v48 = vrot.slane %v2026_v42, 1  ;;  %v2027_v15 = vmax.f32 %v8642_v46, 0.0  ;;  %v1147_v47 = vpop.permute.xlu1 %1146  ;;  %v2664_v46 = vrot.slane %v2662_v28, 1 }
 0x1ed   : > { %v2515_v49 = vld [vmem:[#allocation3 + $0x13] ss:$2 sm:$0xff]  ;;  %v1090_v8 = vpop.permute.xlu0 %1089 }
 0x1ee   : > { %v6395_v44 = vpack.c.bf16 %v2515_v49, %v2515_v49  ;;  %v2119_v56 = vsel %vm719_vm0, %v2116_v4, %v2118_v48  ;;  %v2120_v58 = vrot.slane %v2027_v15, 1  ;;  %v1594_v20 = vsel %vm9609_vm2, %v1551_v21, %v1090_v8 }
 0x1ef   : > { %v2230_v45 = vmax.f32 %v2025_v53, %v2119_v56  ;;  %v1637_v63 = vsel %vm1597_vm13, %v1594_v20, %v1147_v47  ;;  %vm2542_vm2 = vcmask 257025  }
 0x1f0   : > { %v2520_v35 = vrot.slane %v6395_v44, 5  ;;  %v2121_v50 = vsel %vm719_vm0, %v2118_v48, %v2120_v58  ;;  %v1378_v60 = vpop.permute.xlu1 %1377 }
 0x1f1   : > { %v2315_v2 = vrot.slane %v2230_v45, 2  ;;  %v2231_v61 = vmax.f32 %v2026_v42, %v2121_v50  ;;  %v1291_v10 = vpop.permute.xlu0 %1290 }
 0x1f2   : > { %v2521_v9 = vrot.slane %v2520_v35, 4  ;;  %v1680_v4 = vsel %vm9600_vm14, %v1637_v63, %v1291_v10  ;;  %2525 = vst.msk [vmem:[#allocation2 + $0x8] sm:$0x8] %vm2524_vm9, %v2520_v35  ;;  %vm2557_vm14 = vcmask 254976  }
 0x1f3   : > { %v2316_v53 = vsel %vm1009_vm1, %v2313_v6, %v2315_v2  ;;  %v2317_v52 = vrot.slane %v2231_v61, 2  ;;  %v1723_v1 = vsel %vm1683_vm15, %v1680_v4, %v1378_v60 }
 0x1f4   : > { %v2424_v17 = vmax.f32 %v8598_v16, %v2316_v53  ;;  %6625 = vmatmul.mubr.msk.bf16.gmra.mrb[76].mxu0 %vm9599_vm6, %v1723_v1  ;;  %2527 = vst.msk [vmem:[#allocation2 + $0xc] sm:$0x7] %vm2526_vm10, %v2521_v9  ;;  %vm2555_vm6 = vcmask 257026  }
 0x1f5   : > { %v2318_v32 = vsel %vm1009_vm1, %v2315_v2, %v2317_v52  ;;  %6628 = vmatprep.mubr.msk.bf16.mxu0 %vm7386_vm7, %v7377_v0 }
 0x1f6   : > { %2463 = vst.msk [vmem:[#allocation3 + $0x30] sm:$0xff] %vm1511_vm11, %v2424_v17  ;;  %v2425_v33 = vmax.f32 %v8621_v13, %v2318_v32  ;;  %v2660_v13 = vshrl.u32 %v8658_v31, 16 }
 0x1f7   : > { %v1898_v6 = vpop.f32.mrb[24].mxu0 }
 0x1f8   : > { %2464 = vst.msk [vmem:[#allocation3 + $0x38] sm:$0xff] %vm1511_vm11, %v2425_v33  ;;  %v1899_v16 = vadd.f32 %v8540_v34, %v1898_v6  ;;  %v6574_v25 = vpop.f32.mrb[25].mxu0  ;;  %v2665_v44 = vor.u32 %v2664_v46, %v2660_v13  ;;  %v2614_v33 = vld [vmem:[#allocation2 + $0x4] sm:$0xe] }
 0x1f9   : > { %v1901_v12 = vpop.f32.mrb[26].mxu0  ;;  %v2601_v26 = vld [vmem:[#allocation2 + $0x8] sm:$0xf]  ;;  %v2618_v6 = vld [vmem:[#allocation2 + $0x4] sm:$0xc] }
 0x1fa   : > { %v2028_v36 = vmax.f32 %v1899_v16, 0.0  ;;  %v1902_v39 = vadd.f32 %v8540_v34, %v1901_v12  ;;  %v6575_v40 = vpop.f32.mrb[27].mxu0  ;;  %v8699_v25 = vcombine.low %v2614_v33, %v2601_v26  ;;  %v6072_v28 = vcombine.low %v2618_v6, %v2601_v26  ;;  %v6825_v33 = vld [vmem:[%s9579_s3 + $0x58] sm:$0xff]  }
 0x1fb   : > { %v8669_v23 = vld [vmem:[#allocation2 + $0xc] sm:$0xf] }
 0x1fc   : > { %v2122_v14 = vrot.slane %v2028_v36, 1  ;;  %v2029_v37 = vmax.f32 %v1902_v39, 0.0  ;;  %v8673_v42 = vcombine.low %v2601_v26, %v8669_v23  ;;  %v2866_v46 = vrot.slane %v6072_v28, 2 }
 0x1fe   : > { %v2123_v43 = vsel %vm719_vm0, %v2120_v58, %v2122_v14  ;;  %v2124_v11 = vrot.slane %v2029_v37, 1  ;;  %v2732_v48 = vrot.slane %v8673_v42, 1  ;;  %v2667_v47 = vshll.u32 %v8673_v42, 16 }
 0x1ff   : > { %v2232_v49 = vmax.f32 %v2027_v15, %v2123_v43 }
 0x200   : > { %v2125_v21 = vsel %vm719_vm0, %v2122_v14, %v2124_v11  ;;  %v2733_v8 = vsel %vm719_vm0, %v2731_v51, %v2732_v48  ;;  %v8682_v56 = vrot.slane %v2667_v47, 1 }
 0x201   : > { %v2319_v20 = vrot.slane %v2232_v49, 2  ;;  %v8684_v45 = vmax.f32 %v2028_v36, %v2125_v21  ;;  %2744 = vrot.lane.b32.xlu1 %v2733_v8, %s7382_s28 }
 0x202   : > { %v2670_v15 = vsel %vm506_vm3, %v2665_v44, %v8682_v56 }
 0x203   : > { %v2320_v58 = vsel %vm1009_vm1, %v2317_v52, %v2319_v20 }
 0x204   : > { %v2426_v35 = vmax.f32 %v8625_v18, %v2320_v58  ;;  %v6819_v58 = vld [vmem:[%s9579_s3 + $0x40] sm:$0xff]  }
 0x205   : > { %2714 = vrot.lane.b32.xlu1 %v2670_v15, %s7385_s24  ;;  %6427 = vmatprep.subr.bf16.mxu1 %v6819_v58  ;;  %v6830_v58 = vld [vmem:[%s9579_s3 + $0x28] sm:$0xff]  }
 0x206   : > { %2465 = vst.msk [vmem:[#allocation3 + $0x40] sm:$0xff] %vm1511_vm11, %v2426_v35  ;;  %v6820_v35 = vld [vmem:[%s9579_s3] sm:$0xff]  }
 0x207   : > { %v1906_v50 = vpop.f32.mrb[28].mxu0  ;;  %6428 = vmatpush3.bf16.msra.mxu1 %v6820_v35 }
 0x208   : > { %v1907_v60 = vadd.f32 %v8540_v34, %v1906_v50  ;;  %v6578_v2 = vpop.f32.mrb[29].mxu0 }
 0x209   : > { %v1909_v61 = vpop.f32.mrb[30].mxu0 }
 0x20a   : > { %v2030_v63 = vmax.f32 %v1907_v60, 0.0  ;;  %v1910_v10 = vadd.f32 %v8540_v34, %v1909_v61  ;;  %v6579_v62 = vpop.f32.mrb[31].mxu0  ;;  %v6821_v61 = vld [vmem:[%s9579_s3 + $0x48] sm:$0xff]  }
 0x20b   : > { %v6822_v62 = vld [vmem:[%s9579_s3 + $0x8] sm:$0xff]   ;;  %6429 = vmatprep.subr.bf16.mxu1 %v6821_v61 }
 0x20c   : > { %v2126_v7 = vrot.slane %v2030_v63, 1  ;;  %v2031_v9 = vmax.f32 %v1910_v10, 0.0  ;;  %6430 = vmatpush3.bf16.msra.mxu1 %v6822_v62  ;;  %v6832_v62 = vld [vmem:[%s9579_s3 + $0x30] sm:$0xff]  }
 0x20d   : > { %v2529_v4 = vld [vmem:[#allocation3 + $0x37] ss:$2 sm:$0xff] }
 0x20e   : > { %v2530_v18 = vpack.c.bf16 %v2529_v4, %v2529_v4  ;;  %v2127_v53 = vsel %vm719_vm0, %v2124_v11, %v2126_v7  ;;  %v2128_v52 = vrot.slane %v2031_v9, 1 }
 0x20f   : > { %v2234_v1 = vmax.f32 %v2029_v37, %v2127_v53  ;;  %v2771_v37 = vrot.slane %v8699_v25, 1 }
 0x210   : > { %2531 = vst.msk [vmem:[#allocation2 + $0x10] sm:$0xf] %vm2497_vm12, %v2530_v18  ;;  %v2129_v17 = vsel %vm719_vm0, %v2126_v7, %v2128_v52  ;;  %v6823_v18 = vld [vmem:[%s9579_s3 + $0x50] sm:$0xff]  }
 0x211   : > { %v2323_v27 = vrot.slane %v2234_v1, 2  ;;  %v2235_v32 = vmax.f32 %v2030_v63, %v2129_v17  ;;  %6431 = vmatprep.subr.bf16.mxu1 %v6823_v18 }
 0x213   : > { %v2325_v3 = vrot.slane %v2235_v32, 2 }
 0x215   : > { %v2326_v16 = vsel %vm1009_vm1, %v2323_v27, %v2325_v3 }
 0x216   : > { %v2429_v12 = vmax.f32 %v2232_v49, %v2326_v16 }
 0x217   : > { %v1914_v36 = vpop.f32.mrb[32].mxu0  ;;  %v8701_v39 = vld [vmem:[#allocation2 + $0x10] sm:$0xf] }
 0x218   : > { %2468 = vst.msk [vmem:[#allocation3 + $0x58] sm:$0xff] %vm1511_vm11, %v2429_v12  ;;  %v1915_v40 = vadd.f32 %v8540_v34, %v1914_v36  ;;  %v6582_v51 = vpop.f32.mrb[33].mxu0  ;;  %v8707_v13 = vcombine.low %v8669_v23, %v8701_v39 }
 0x219   : > { %v1917_v14 = vpop.f32.mrb[34].mxu0  ;;  %v6828_v51 = vld [vmem:[%s9579_s3 + $0x20] sm:$0xff]  }
 0x21a   : > { %v2032_v43 = vmax.f32 %v1915_v40, 0.0  ;;  %v1918_v26 = vadd.f32 %v8540_v34, %v1917_v14  ;;  %v6583_v11 = vpop.f32.mrb[35].mxu0  ;;  %v2772_v47 = vrot.slane %v8707_v13, 1  ;;  %v2867_v49 = vrot.slane %v8707_v13, 2  ;;  %v6827_v40 = vld [vmem:[%s9579_s3 + $0x60] sm:$0xff]  }
 0x21c   : > { %v2130_v21 = vrot.slane %v2032_v43, 1  ;;  %v2033_v8 = vmax.f32 %v1918_v26, 0.0  ;;  %v2773_v44 = vsel %vm719_vm0, %v2771_v37, %v2772_v47  ;;  %v2868_v20 = vsel %vm1009_vm1, %v2866_v46, %v2867_v49 }
 0x21d   : > { %2784 = vrot.lane.b32.xlu1 %v2773_v44, %s7388_s26  ;;  %2879 = vrot.lane.b32.xlu0 %v2868_v20, %s7385_s24 }
 0x21e   : > { %v2131_v15 = vsel %vm719_vm0, %v2128_v52, %v2130_v21  ;;  %v2132_v50 = vrot.slane %v2033_v8, 1  ;;  %v6824_v52 = vld [vmem:[%s9579_s3 + $0x10] sm:$0xff]  }
 0x21f   : > { %v8728_v60 = vmax.f32 %v2031_v9, %v2131_v15  ;;  %6432 = vmatpush3.bf16.msra.mxu1 %v6824_v52 }
 0x220   : > { %v2133_v2 = vsel %vm719_vm0, %v2130_v21, %v2132_v50  ;;  %6433 = vmatprep.subr.bf16.mxu1 %v6825_v33  ;;  %v6829_v21 = vld [vmem:[%s9579_s3 + $0x68] sm:$0xff]  }
 0x221   : > { %v2327_v63 = vrot.slane %v8728_v60, 2  ;;  %v8735_v10 = vmax.f32 %v2032_v43, %v2133_v2  ;;  %v6831_v2 = vld [vmem:[%s9579_s3 + $0x70] sm:$0xff]  }
 0x223   : > { %v2328_v7 = vsel %vm1009_vm1, %v2325_v3, %v2327_v63  ;;  %v2329_v9 = vrot.slane %v8735_v10, 2  ;;  %v6826_v3 = vld [vmem:[%s9579_s3 + $0x18] sm:$0xff]  }
 0x224   : > { %v2430_v4 = vmax.f32 %v8684_v45, %v2328_v7  ;;  %6434 = vmatpush3.bf16.msra.mxu1 %v6826_v3 }
 0x225   : > { %v2330_v53 = vsel %vm1009_vm1, %v2327_v63, %v2329_v9  ;;  %6435 = vmatprep.subr.bf16.mxu1 %v6827_v40 }
 0x226   : > { %2469 = vst.msk [vmem:[#allocation3 + $0x60] sm:$0xff] %vm1511_vm11, %v2430_v4  ;;  %v2431_v17 = vmax.f32 %v2234_v1, %v2330_v53 }
 0x227   : > { %v1922_v27 = vpop.f32.mrb[36].mxu0 }
 0x228   : > { %2470 = vst.msk [vmem:[#allocation3 + $0x68] sm:$0xff] %vm1511_vm11, %v2431_v17  ;;  %v1923_v45 = vadd.f32 %v8540_v34, %v1922_v27  ;;  %v6586_v32 = vpop.f32.mrb[37].mxu0  ;;  %6436 = vmatpush3.bf16.msra.mxu1 %v6828_v51 }
 0x229   : > { %v1925_v6 = vpop.f32.mrb[38].mxu0  ;;  %6437 = vmatprep.subr.bf16.mxu1 %v6829_v21 }
 0x22a   : > { %v2034_v16 = vmax.f32 %v1923_v45, 0.0  ;;  %v1926_v1 = vadd.f32 %v8540_v34, %v1925_v6  ;;  %v6587_v28 = vpop.f32.mrb[39].mxu0 }
 0x22c   : > { %v2134_v12 = vrot.slane %v2034_v16, 1  ;;  %v2035_v36 = vmax.f32 %v1926_v1, 0.0  ;;  %6438 = vmatpush3.bf16.msra.mxu1 %v6830_v58 }
 0x22d   : > { %6439 = vmatprep.subr.bf16.mxu1 %v6831_v2 }
 0x22e   : > { %v2135_v14 = vsel %vm719_vm0, %v2132_v50, %v2134_v12  ;;  %v2136_v37 = vrot.slane %v2035_v36, 1  ;;  %v2619_v50 = vld [vmem:[#allocation2 + $0x8] sm:$0xc] }
 0x22f   : > { %v2533_v46 = vld [vmem:[#allocation3 + $0x5b] ss:$2 sm:$0xff]  ;;  %v8767_v43 = vmax.f32 %v2033_v8, %v2135_v14  ;;  %v6073_v63 = vcombine.low %v2619_v50, %v8669_v23 }
 0x230   : > { %v6396_v26 = vpack.c.bf16 %v2533_v46, %v2533_v46  ;;  %v2137_v11 = vsel %vm719_vm0, %v2134_v12, %v2136_v37  ;;  %6440 = vmatpush3.bf16.msra.mxu1 %v6832_v62  ;;  %v6833_v23 = vld [vmem:[%s9579_s3 + $0x78] sm:$0xff]  }
 0x231   : > { %v2331_v44 = vrot.slane %v8767_v43, 2  ;;  %v2239_v20 = vmax.f32 %v2034_v16, %v2137_v11  ;;  %v2931_v52 = vshrl.u32 %v6073_v63, 16  ;;  %6441 = vmatprep.subr.bf16.mxu1 %v6833_v23  ;;  %v2934_v33 = vshll.u32 %v6073_v63, 16 }
 0x232   : > { %v2538_v35 = vrot.slane %v6396_v26, 7  ;;  %v2900_v1 = vrot.slane %v6073_v63, 2 }
 0x233   : > { %v2333_v8 = vrot.slane %v2239_v20, 2  ;;  %v2933_v28 = vrot.slane %v2931_v52, 2  ;;  %v2671_v20 = vshrl.u32 %v8673_v42, 16 }
 0x234   : > { %v2539_v15 = vrot.slane %v2538_v35, 4  ;;  %2543 = vst.msk [vmem:[#allocation2 + $0x14] sm:$0xe] %vm2542_vm2, %v2538_v35 }
 0x235   : > { %v2334_v61 = vsel %vm1009_vm1, %v2331_v44, %v2333_v8  ;;  %v2673_v50 = vor.u32 %v2671_v20, %v8682_v56 }
 0x236   : > { %v2433_v7 = vmax.f32 %v8728_v60, %v2334_v61  ;;  %2544 = vst.msk [vmem:[#allocation2 + $0x18] sm:$0x1] %vm2495_vm5, %v2539_v15  ;;  %v6834_v60 = vld [vmem:[%s9579_s3 + $0x38] sm:$0xff]  }
 0x237   : > { %v1930_v9 = vpop.f32.mrb[40].mxu0  ;;  %6442 = vmatpush3.bf16.msra.mxu1 %v6834_v60 }
 0x238   : > { %2472 = vst.msk [vmem:[#allocation3 + $0x78] sm:$0xff] %vm1511_vm11, %v2433_v7  ;;  %v1931_v4 = vadd.f32 %v8540_v34, %v1930_v9  ;;  %v6590_v18 = vpop.f32.mrb[41].mxu0  ;;  %6632 = vmatprep.subr.bf16.mxu1 %v7377_v0 }
 0x239   : > { %v1933_v53 = vpop.f32.mrb[42].mxu0 }
 0x23a   : > { %v2036_v17 = vmax.f32 %v1931_v4, 0.0  ;;  %v1934_v27 = vadd.f32 %v8540_v34, %v1933_v53  ;;  %v6591_v45 = vpop.f32.mrb[43].mxu0 }
 0x23b   : > { %v8797_v32 = vld [vmem:[#allocation2 + $0x14] sm:$0xf] }
 0x23c   : > { %v8801_v6 = vcombine.low %v8701_v39, %v8797_v32  ;;  %v2138_v3 = vrot.slane %v2036_v17, 1  ;;  %v2037_v16 = vmax.f32 %v1934_v27, 0.0  ;;  %v2936_v39 = vrot.slane %v2934_v33, 3 }
 0x23e   : > { %v2139_v12 = vsel %vm719_vm0, %v2136_v37, %v2138_v3  ;;  %v2140_v40 = vrot.slane %v2037_v16, 1  ;;  %v2901_v51 = vrot.slane %v8801_v6, 2  ;;  %v2734_v14 = vrot.slane %v8801_v6, 1 }
 0x23f   : > { %v2240_v46 = vmax.f32 %v2035_v36, %v2139_v12  ;;  %v2675_v26 = vshll.u32 %v8801_v6, 16  ;;  %v2679_v11 = vshrl.u32 %v8801_v6, 16  ;;  %v2937_v62 = vor.u32 %v2936_v39, %v2933_v28 }
 0x240   : > { %v2141_v21 = vsel %vm719_vm0, %v2138_v3, %v2140_v40  ;;  %v2902_v44 = vsel %vm1009_vm1, %v2900_v1, %v2901_v51  ;;  %v2735_v37 = vsel %vm719_vm0, %v2732_v48, %v2734_v14 }
 0x241   : > { %v2335_v36 = vrot.slane %v2240_v46, 2  ;;  %v8819_v58 = vmax.f32 %v2036_v17, %v2141_v21  ;;  %2913 = vrot.lane.b32.xlu0 %v2902_v44, %s7382_s28  ;;  %2746 = vrot.lane.b32.xlu1 %v2735_v37, %s7382_s28  ;;  %v2938_v35 = vrot.slane %v2679_v11, 2  ;;  %v2939_v15 = vrot.slane %v2675_v26, 3 }
 0x242   : > { %v2677_v2 = vrot.slane %v2675_v26, 1 }
 0x243   : > { %v2336_v61 = vsel %vm1009_vm1, %v2333_v8, %v2335_v36  ;;  %v2337_v63 = vrot.slane %v8819_v58, 2  ;;  %v8826_v48 = vor.u32 %v2939_v15, %v2938_v35 }
 0x244   : > { %v2434_v7 = vmax.f32 %v8735_v10, %v2336_v61  ;;  %v2678_v9 = vsel %vm506_vm3, %v2673_v50, %v2677_v2  ;;  %v8830_v4 = vor.u32 %v2679_v11, %v2677_v2 }
 0x245   : > { %v2338_v18 = vsel %vm1009_vm1, %v2335_v36, %v2337_v63  ;;  %v2941_v23 = vsel %vm1153_vm4, %v2937_v62, %v8826_v48  ;;  %2716 = vrot.lane.b32.xlu1 %v2678_v9, %s7385_s24 }
 0x246   : > { %2473 = vst.msk [vmem:[#allocation3 + $0x80] sm:$0xff] %vm1511_vm11, %v2434_v7  ;;  %v2435_v56 = vmax.f32 %v8767_v43, %v2338_v18  ;;  %2972 = vrot.lane.b32.xlu0 %v2941_v23, %s7388_s26 }
 0x247   : > { %v1938_v8 = vpop.f32.mrb[44].mxu0 }
 0x248   : > { %2474 = vst.msk [vmem:[#allocation3 + $0x88] sm:$0xff] %vm1511_vm11, %v2435_v56  ;;  %v1939_v10 = vadd.f32 %v8540_v34, %v1938_v8  ;;  %v6594_v53 = vpop.f32.mrb[45].mxu0 }
 0x249   : > { %v1941_v52 = vpop.f32.mrb[46].mxu0 }
 0x24a   : > { %v2038_v60 = vmax.f32 %v1939_v10, 0.0  ;;  %v1942_v17 = vadd.f32 %v8540_v34, %v1941_v52  ;;  %v6595_v27 = vpop.f32.mrb[47].mxu0 }
 0x24c   : > { %v2142_v45 = vrot.slane %v2038_v60, 1  ;;  %v2039_v33 = vmax.f32 %v1942_v17, 0.0 }
 0x24e   : > { %v2143_v3 = vsel %vm719_vm0, %v2140_v40, %v2142_v45  ;;  %v2144_v1 = vrot.slane %v2039_v33, 1 }
 0x24f   : > { %v2546_v28 = vld [vmem:[#allocation3 + $0x7f] ss:$2 sm:$0xff]  ;;  %v2242_v43 = vmax.f32 %v2037_v16, %v2143_v3 }
 0x250   : > { %v6397_v12 = vpack.c.bf16 %v2546_v28, %v2546_v28  ;;  %v2145_v46 = vsel %vm719_vm0, %v2142_v45, %v2144_v1 }
 0x251   : > { %v2243_v26 = vmax.f32 %v2038_v60, %v2145_v46 }
 0x252   : > { %v2551_v11 = vrot.slane %v6397_v12, 6 }
 0x253   : > { %v2341_v39 = vrot.slane %v2243_v26, 2 }
 0x254   : > { %v2552_v21 = vrot.slane %v2551_v11, 4  ;;  %2556 = vst.msk [vmem:[#allocation2 + $0x18] sm:$0xc] %vm2555_vm6, %v2551_v11 }
 0x256   : > { %2558 = vst.msk [vmem:[#allocation2 + $0x1c] sm:$0x3] %vm2557_vm14, %v2552_v21 }
 0x257   : > { %v1946_v44 = vpop.f32.mrb[48].mxu0 }
 0x258   : > { %v1947_v37 = vadd.f32 %v8540_v34, %v1946_v44  ;;  %v6598_v40 = vpop.f32.mrb[49].mxu0 }
 0x259   : > { %v1949_v20 = vpop.f32.mrb[50].mxu0 }
 0x25a   : > { %v2040_v36 = vmax.f32 %v1947_v37, 0.0  ;;  %v1950_v16 = vadd.f32 %v8540_v34, %v1949_v20  ;;  %v6599_v35 = vpop.f32.mrb[51].mxu0 }
 0x25b   : > { %v8848_v15 = vld [vmem:[#allocation2 + $0x18] sm:$0xf] }
 0x25c   : > { %v2146_v50 = vrot.slane %v2040_v36, 1  ;;  %v2041_v2 = vmax.f32 %v1950_v16, 0.0  ;;  %v8852_v61 = vcombine.low %v8797_v32, %v8848_v15 }
 0x25e   : > { %v2147_v63 = vsel %vm719_vm0, %v2144_v1, %v2146_v50  ;;  %v2148_v62 = vrot.slane %v2041_v2, 1  ;;  %v2869_v7 = vrot.slane %v8852_v61, 2  ;;  %v2774_v9 = vrot.slane %v8852_v61, 1 }
 0x25f   : > { %v2244_v18 = vmax.f32 %v2039_v33, %v2147_v63 }
 0x260   : > { %v2149_v23 = vsel %vm719_vm0, %v2146_v50, %v2148_v62  ;;  %v2870_v56 = vsel %vm1009_vm1, %v2867_v49, %v2869_v7  ;;  %v2775_v32 = vsel %vm719_vm0, %v2772_v47, %v2774_v9 }
 0x261   : > { %v2343_v8 = vrot.slane %v2244_v18, 2  ;;  %v2245_v10 = vmax.f32 %v2040_v36, %v2149_v23  ;;  %2881 = vrot.lane.b32.xlu0 %v2870_v56, %s7385_s24  ;;  %2786 = vrot.lane.b32.xlu1 %v2775_v32, %s7388_s26  ;;  %v8887_v36 = vld [vmem:[%s9578_s2] ss:$0 sm:$0xff] }
 0x263   : > { %v2344_v53 = vsel %vm1009_vm1, %v2341_v39, %v2343_v8  ;;  %v2345_v52 = vrot.slane %v2245_v10, 2 }
 0x264   : > { %v2438_v60 = vmax.f32 %v8819_v58, %v2344_v53 }
 0x265   : > { %v2346_v17 = vsel %vm1009_vm1, %v2343_v8, %v2345_v52 }
 0x266   : > { %2477 = vst.msk [vmem:[#allocation3 + $0xa0] sm:$0xff] %vm1511_vm11, %v2438_v60  ;;  %v2439_v49 = vmax.f32 %v2242_v43, %v2346_v17 }
 0x267   : > { %v1954_v27 = vpop.f32.mrb[52].mxu0 }
 0x268   : > { %2478 = vst.msk [vmem:[#allocation3 + $0xa8] sm:$0xff] %vm1511_vm11, %v2439_v49  ;;  %v1955_v47 = vadd.f32 %v8540_v34, %v1954_v27  ;;  %v6602_v45 = vpop.f32.mrb[53].mxu0 }
 0x269   : > { %v1957_v33 = vpop.f32.mrb[54].mxu0 }
 0x26a   : > { %v2042_v3 = vmax.f32 %v1955_v47, 0.0  ;;  %v1958_v1 = vadd.f32 %v8540_v34, %v1957_v33  ;;  %v6603_v28 = vpop.f32.mrb[55].mxu0 }
 0x26c   : > { %v2150_v12 = vrot.slane %v2042_v3, 1  ;;  %v2043_v46 = vmax.f32 %v1958_v1, 0.0 }
 0x26e   : > { %v2151_v58 = vsel %vm719_vm0, %v2148_v62, %v2150_v12  ;;  %v2152_v11 = vrot.slane %v2043_v46, 1 }
 0x26f   : > { %v2246_v39 = vmax.f32 %v2041_v2, %v2151_v58 }
 0x270   : > { %v2153_v21 = vsel %vm719_vm0, %v2150_v12, %v2152_v11 }
 0x271   : > { %v2347_v43 = vrot.slane %v2246_v39, 2  ;;  %v8879_v44 = vmax.f32 %v2042_v3, %v2153_v21 }
 0x273   : > { %v2348_v37 = vsel %vm1009_vm1, %v2345_v52, %v2347_v43  ;;  %v2349_v40 = vrot.slane %v8879_v44, 2 }
 0x274   : > { %v2440_v20 = vmax.f32 %v2243_v26, %v2348_v37 }
 0x276   : > { %2479 = vst.msk [vmem:[#allocation3 + $0xb0] sm:$0xff] %vm1511_vm11, %v2440_v20 }
 0x277   : > { %v1962_v34 = vpop.f32.mrb[56].mxu0 }
 0x278   : > { %v1963_v16 = vadd.f32 %v8887_v36, %v1962_v34  ;;  %v6606_v35 = vpop.f32.mrb[57].mxu0 }
 0x279   : > { %v1965_v50 = vpop.f32.mrb[58].mxu0 }
 0x27a   : > { %v2044_v2 = vmax.f32 %v1963_v16, 0.0  ;;  %v1966_v63 = vadd.f32 %v8887_v36, %v1965_v50  ;;  %v6607_v62 = vpop.f32.mrb[59].mxu0 }
 0x27c   : > { %v2154_v18 = vrot.slane %v2044_v2, 1  ;;  %v2045_v23 = vmax.f32 %v1966_v63, 0.0 }
 0x27d   : > { %v2560_v56 = vld [vmem:[#allocation3 + $0xa3] ss:$2 sm:$0xff] }
 0x27e   : > { %v6398_v26 = vpack.c.bf16 %v2560_v56, %v2560_v56  ;;  %v2155_v32 = vsel %vm719_vm0, %v2152_v11, %v2154_v18  ;;  %v2156_v8 = vrot.slane %v2045_v23, 1 }
 0x27f   : > { %v2248_v53 = vmax.f32 %v2043_v46, %v2155_v32 }
 0x280   : > { %v2565_v52 = vrot.slane %v6398_v26, 5  ;;  %v2157_v60 = vsel %vm719_vm0, %v2154_v18, %v2156_v8 }
 0x281   : > { %v2351_v17 = vrot.slane %v2248_v53, 2  ;;  %v2249_v49 = vmax.f32 %v2044_v2, %v2157_v60 }
 0x282   : > { %v2566_v27 = vrot.slane %v2565_v52, 4  ;;  %2569 = vst.msk [vmem:[#allocation2 + $0x1c] sm:$0x8] %vm2524_vm9, %v2565_v52  ;;  %vm9610_vm9 = vsmask.f32 6400 }
 0x283   : > { %v2352_v47 = vsel %vm1009_vm1, %v2349_v40, %v2351_v17  ;;  %v2353_v45 = vrot.slane %v2249_v49, 2 }
 0x284   : > { %2570 = vst.msk [vmem:[#allocation2 + $0x20] sm:$0x7] %vm2526_vm10, %v2566_v27  ;;  %v2442_v33 = vmax.f32 %v2245_v10, %v2352_v47  ;;  %vm9611_vm10 = vmmov %vm9610_vm9 }
 0x285   : > { %v2354_v3 = vsel %vm1009_vm1, %v2351_v17, %v2353_v45 }
 0x286   : > { %2481 = vst.msk [vmem:[#allocation3 + $0xc0] sm:$0xff] %vm1511_vm11, %v2442_v33  ;;  %v2443_v1 = vmax.f32 %v2246_v39, %v2354_v3  ;;  %v2819_v39 = vshrl.u32 %v8852_v61, 16 }
 0x287   : > { %v1970_v28 = vpop.f32.mrb[60].mxu0 }
 0x288   : > { %2482 = vst.msk [vmem:[#allocation3 + $0xc8] sm:$0xff] %vm1511_vm11, %v2443_v1  ;;  %v1971_v12 = vadd.f32 %v8887_v36, %v1970_v28  ;;  %v6610_v46 = vpop.f32.mrb[61].mxu0  ;;  %v2821_v27 = vrot.slane %v2819_v39, 1 }
 0x289   : > { %v1973_v58 = vpop.f32.mrb[62].mxu0  ;;  %v2606_v11 = vld [vmem:[#allocation2 + $0x1c] sm:$0xf] }
 0x28a   : > { %v2046_v21 = vmax.f32 %v1971_v12, 0.0  ;;  %v8901_v43 = vadd.f32 %v8887_v36, %v1973_v58  ;;  %v6611_v37 = vpop.f32.mrb[63].mxu0  ;;  %v8904_v10 = vcombine.low %v8848_v15, %v2606_v11  ;;  %v2822_v15 = vshll.u32 %v8852_v61, 16 }
 0x28b   : > { %v8906_v40 = vld [vmem:[#allocation2 + $0x20] sm:$0xf] }
 0x28c   : > { %v2158_v20 = vrot.slane %v2046_v21, 1  ;;  %v2047_v34 = vmax.f32 %v8901_v43, 0.0  ;;  %v2903_v16 = vrot.slane %v8904_v10, 2  ;;  %v2736_v35 = vrot.slane %v8904_v10, 1 }
 0x28d   : > { %v2683_v50 = vshll.u32 %v8904_v10, 16  ;;  %v8914_v2 = vcombine.low %v2606_v11, %v8906_v40  ;;  %v2687_v63 = vshrl.u32 %v8904_v10, 16 }
 0x28e   : > { %v2159_v62 = vsel %vm719_vm0, %v2156_v8, %v2158_v20  ;;  %v2160_v18 = vrot.slane %v2047_v34, 1  ;;  %v2904_v56 = vsel %vm1009_vm1, %v2901_v51, %v2903_v16  ;;  %v2737_v26 = vsel %vm719_vm0, %v2734_v14, %v2736_v35 }
 0x28f   : > { %v2250_v32 = vmax.f32 %v2045_v23, %v2159_v62  ;;  %2915 = vrot.lane.b32.xlu0 %v2904_v56, %s7382_s28  ;;  %2748 = vrot.lane.b32.xlu1 %v2737_v26, %s7382_s28  ;;  %v8931_v53 = vrot.slane %v2683_v50, 1  ;;  %v2871_v8 = vrot.slane %v8914_v2, 2  ;;  %v2942_v52 = vrot.slane %v2687_v63, 2 }
 0x290   : > { %v2161_v51 = vsel %vm719_vm0, %v2158_v20, %v2160_v18  ;;  %v2943_v60 = vrot.slane %v2683_v50, 3  ;;  %v2824_v14 = vrot.slane %v2822_v15, 2  ;;  %v2776_v3 = vrot.slane %v8914_v2, 1 }
 0x291   : > { %v2355_v17 = vrot.slane %v2250_v32, 2  ;;  %v8937_v49 = vmax.f32 %v2046_v21, %v2161_v51  ;;  %v2686_v23 = vsel %vm506_vm3, %v8830_v4, %v8931_v53  ;;  %v2872_v47 = vsel %vm1009_vm1, %v2869_v7, %v2871_v8 }
 0x292   : > { %v8947_v33 = vor.u32 %v2943_v60, %v2942_v52  ;;  %v2828_v28 = vshrl.u32 %v8914_v2, 16  ;;  %v2831_v4 = vshll.u32 %v8914_v2, 16 }
 0x293   : > { %v2356_v1 = vsel %vm1009_vm1, %v2353_v45, %v2355_v17  ;;  %2718 = vrot.lane.b32.xlu1 %v2686_v23, %s7385_s24  ;;  %2883 = vrot.lane.b32.xlu0 %v2872_v47, %s7385_s24  ;;  %v2777_v45 = vsel %vm719_vm0, %v2774_v9, %v2776_v3 }
 0x294   : > { %v2444_v12 = vmax.f32 %v8879_v44, %v2356_v1  ;;  %v2830_v46 = vrot.slane %v2828_v28, 1  ;;  %v2833_v58 = vrot.slane %v2831_v4, 2  ;;  %v2945_v7 = vsel %vm1153_vm4, %v8826_v48, %v8947_v33 }
 0x295   : > { %v8967_v44 = vor.u32 %v2824_v14, %v2821_v27 }
 0x296   : > { %2483 = vst.msk [vmem:[#allocation3 + $0xd0] sm:$0xff] %vm1511_vm11, %v2444_v12  ;;  %v8969_v21 = vor.u32 %v2833_v58, %v2830_v46  ;;  %v2810_v12 = vshrl.u32 %v8707_v13, 16  ;;  %v2813_v46 = vshll.u32 %v8707_v13, 16 }
 0x297   : > { %2974 = vrot.lane.b32.xlu0 %v2945_v7, %s7388_s26  ;;  %2788 = vrot.lane.b32.xlu1 %v2777_v45, %s7388_s26  ;;  %v1978_v11 = vpop.f32.mrb[64].mxu0 }
 0x298   : > { %v1979_v43 = vadd.f32 %v8887_v36, %v1978_v11  ;;  %v6614_v37 = vpop.f32.mrb[65].mxu0  ;;  %v8975_v48 = vsel %vm9610_vm9, %v8967_v44, %v8969_v21 }
 0x299   : > { %v1981_v39 = vpop.f32.mrb[66].mxu0  ;;  %v2805_v37 = vshll.u32 %v8699_v25, 16 }
 0x29a   : > { %v2048_v61 = vmax.f32 %v1979_v43, 0.0  ;;  %v1982_v9 = vadd.f32 %v8887_v36, %v1981_v39  ;;  %v6615_v20 = vpop.f32.mrb[67].mxu0  ;;  %v2802_v43 = vshrl.u32 %v8699_v25, 16  ;;  %v2745_v25 = vpop.permute.xlu1 %2744 }
 0x29c   : > { %v2162_v50 = vrot.slane %v2048_v61, 1  ;;  %v2049_v15 = vmax.f32 %v1982_v9, 0.0 }
 0x29d   : > { %v2572_v62 = vld [vmem:[#allocation3 + $0xc7] ss:$2 sm:$0xff] }
 0x29e   : > { %v2573_v56 = vpack.c.bf16 %v2572_v62, %v2572_v62  ;;  %v2163_v26 = vsel %vm719_vm0, %v2160_v18, %v2162_v50  ;;  %v2164_v52 = vrot.slane %v2049_v15, 1  ;;  %v2812_v62 = vrot.slane %v2810_v12, 1 }
 0x29f   : > { %v8979_v51 = vmax.f32 %v2047_v34, %v2163_v26  ;;  %v2807_v12 = vrot.slane %v2805_v37, 2 }
 0x2a0   : > { %2574 = vst.msk [vmem:[#allocation2 + $0x24] sm:$0xf] %vm2497_vm12, %v2573_v56  ;;  %v2165_v60 = vsel %vm719_vm0, %v2162_v50, %v2164_v52  ;;  %vm3031_vm12 = vcmask 785408  }
 0x2a1   : > { %v2359_v17 = vrot.slane %v8979_v51, 2  ;;  %v2253_v27 = vmax.f32 %v2048_v61, %v2165_v60 }
 0x2a3   : > { %v2361_v14 = vrot.slane %v2253_v27, 2 }
 0x2a5   : > { %v2362_v23 = vsel %vm1009_vm1, %v2359_v17, %v2361_v14  ;;  %v2815_v17 = vrot.slane %v2813_v46, 2 }
 0x2a6   : > { %v2447_v47 = vmax.f32 %v2250_v32, %v2362_v23 }
 0x2a7   : > { %v8985_v1 = vld [vmem:[#allocation2 + $0x24] sm:$0xf]  ;;  %v1986_v28 = vpop.f32.mrb[68].mxu0 }
 0x2a8   : > { %v8989_v18 = vcombine.low %v8906_v40, %v8985_v1  ;;  %2486 = vst.msk [vmem:[#allocation3 + $0xe8] sm:$0xff] %vm1511_vm11, %v2447_v47  ;;  %v1987_v34 = vadd.f32 %v8887_v36, %v1986_v28  ;;  %v6618_v4 = vpop.f32.mrb[69].mxu0  ;;  %v2880_v47 = vpop.permute.xlu0 %2879 }
 0x2a9   : > { %v1989_v58 = vpop.f32.mrb[70].mxu0  ;;  %v2804_v4 = vrot.slane %v2802_v43, 1 }
 0x2aa   : > { %v2050_v7 = vmax.f32 %v1987_v34, 0.0  ;;  %v8996_v32 = vadd.f32 %v8887_v36, %v1989_v58  ;;  %v6619_v45 = vpop.f32.mrb[71].mxu0  ;;  %v2905_v11 = vrot.slane %v8989_v18, 2  ;;  %v2738_v40 = vrot.slane %v8989_v18, 1 }
 0x2ab   : > { %v2691_v39 = vshll.u32 %v8989_v18, 16  ;;  %v2695_v61 = vshrl.u32 %v8989_v18, 16 }
 0x2ac   : > { %v2166_v9 = vrot.slane %v2050_v7, 1  ;;  %v2051_v13 = vmax.f32 %v8996_v32, 0.0  ;;  %v2906_v20 = vsel %vm1009_vm1, %v2903_v16, %v2905_v11  ;;  %v2739_v50 = vsel %vm719_vm0, %v2736_v35, %v2738_v40 }
 0x2ad   : > { %2917 = vrot.lane.b32.xlu0 %v2906_v20, %s7382_s28  ;;  %2750 = vrot.lane.b32.xlu1 %v2739_v50, %s7382_s28  ;;  %v2946_v56 = vrot.slane %v2695_v61, 2  ;;  %v2947_v26 = vrot.slane %v2691_v39, 3  ;;  %v2693_v60 = vrot.slane %v2691_v39, 1  ;;  %v2689_v16 = vor.u32 %v2687_v63, %v8931_v53 }
 0x2ae   : > { %v2167_v27 = vsel %vm719_vm0, %v2164_v52, %v2166_v9  ;;  %v2168_v23 = vrot.slane %v2051_v13, 1  ;;  %v9036_v53 = vor.u32 %v2815_v17, %v2812_v62  ;;  %v2808_v39 = vor.u32 %v2807_v12, %v2804_v4 }
 0x2af   : > { %v9021_v28 = vmax.f32 %v2049_v15, %v2167_v27  ;;  %v9023_v35 = vor.u32 %v2947_v26, %v2946_v56  ;;  %v9025_v34 = vor.u32 %v2695_v61, %v2693_v60  ;;  %v2694_v46 = vsel %vm506_vm3, %v2689_v16, %v2693_v60  ;;  %v2715_v15 = vpop.permute.xlu1 %2714 }
 0x2b0   : > { %v2169_v58 = vsel %vm719_vm0, %v2166_v9, %v2168_v23  ;;  %v2817_v9 = vsel %vm9611_vm10, %v2808_v39, %v9036_v53 }
 0x2b1   : > { %v2363_v52 = vrot.slane %v9021_v28, 2  ;;  %v9030_v32 = vmax.f32 %v2050_v7, %v2169_v58  ;;  %v2949_v63 = vsel %vm1153_vm4, %v8947_v33, %v9023_v35  ;;  %2720 = vrot.lane.b32.xlu1 %v2694_v46, %s7385_s24  ;;  %v3003_v33 = vsel %vm1511_vm11, %v8658_v31, %v2715_v15 }
 0x2b2   : > { %2976 = vrot.lane.b32.xlu0 %v2949_v63, %s7388_s26  ;;  %v3018_v27 = vsel %vm1683_vm15, %v3003_v33, %v2745_v25  ;;  %v6843_v33 = vld [vmem:[%s9579_s3 + $0x80] sm:$0xff]  }
 0x2b3   : > { %v2364_v45 = vsel %vm1009_vm1, %v2361_v14, %v2363_v52  ;;  %v2365_v43 = vrot.slane %v9030_v32, 2  ;;  %v2914_v37 = vpop.permute.xlu0 %2913  ;;  %v2785_v50 = vpop.permute.xlu1 %2784  ;;  %v3055_v14 = vsel %vm1511_vm11, %v2817_v9, %v2880_v47 }
 0x2b4   : > { %v2448_v7 = vmax.f32 %v8937_v49, %v2364_v45  ;;  %v3075_v49 = vsel %vm1683_vm15, %v3055_v14, %v2914_v37  ;;  %v3033_v4 = vsel %vm3031_vm12, %v3018_v27, %v2785_v50 }
 0x2b5   : > { %v2366_v61 = vsel %vm1009_vm1, %v2363_v52, %v2365_v43 }
 0x2b6   : > { %2487 = vst.msk [vmem:[#allocation3 + $0xf0] sm:$0xff] %vm1511_vm11, %v2448_v7  ;;  %v2449_v20 = vmax.f32 %v8979_v51, %v2366_v61 }
 0x2b7   : > { %v1994_v62 = vpop.f32.mrb[72].mxu0 }
 0x2b8   : > { %2488 = vst.msk [vmem:[#allocation3 + $0xf8] sm:$0xff] %vm1511_vm11, %v2449_v20  ;;  %v1995_v56 = vadd.f32 %v8887_v36, %v1994_v62  ;;  %v2973_v26 = vpop.permute.xlu0 %2972  ;;  %v6622_v31 = vpop.f32.mrb[73].mxu0 }
 0x2b9   : > { %v1997_v60 = vpop.f32.mrb[74].mxu0  ;;  %v3089_v17 = vsel %vm3031_vm12, %v3075_v49, %v2973_v26 }
 0x2ba   : > { %v2052_v16 = vmax.f32 %v1995_v56, 0.0  ;;  %v1998_v51 = vadd.f32 %v8887_v36, %v1997_v60  ;;  %3313 = vmatprep.mubr.bf16.mxu1 %v3089_v17  ;;  %v6623_v47 = vpop.f32.mrb[75].mxu0 }
 0x2bb   : > { %3314 = vmatmul.mubr.bf16.vlgmr.msra.gmra.mrb[0].mxu1 %v3033_v4 }
 0x2bc   : > { %v2170_v12 = vrot.slane %v2052_v16, 1  ;;  %v2053_v58 = vmax.f32 %v1998_v51, 0.0  ;;  %6633 = vmatpush3.bf16.msra.mxu1 %v6843_v33 }
 0x2bd   : > { %6634 = vmatprep.subr.bf16.mxu1 %v7377_v0 }
 0x2be   : > { %v2171_v46 = vsel %vm719_vm0, %v2168_v23, %v2170_v12  ;;  %v2172_v52 = vrot.slane %v2053_v58, 1 }
 0x2bf   : > { %v2576_v63 = vld [vmem:[#allocation3 + $0xeb] ss:$2 sm:$0xff]  ;;  %v2256_v15 = vmax.f32 %v2051_v13, %v2171_v46 }
 0x2c0   : > { %v6399_v45 = vpack.c.bf16 %v2576_v63, %v2576_v63  ;;  %v2173_v43 = vsel %vm719_vm0, %v2170_v12, %v2172_v52 }
 0x2c1   : > { %v2367_v37 = vrot.slane %v2256_v15, 2  ;;  %v2257_v25 = vmax.f32 %v2052_v16, %v2173_v43 }
 0x2c2   : > { %v2581_v39 = vrot.slane %v6399_v45, 7 }
 0x2c3   : > { %v2369_v7 = vrot.slane %v2257_v25, 2 }
 0x2c4   : > { %v2582_v61 = vrot.slane %v2581_v39, 4  ;;  %2585 = vst.msk [vmem:[#allocation2 + $0x28] sm:$0xe] %vm2542_vm2, %v2581_v39 }
 0x2c5   : > { %v2370_v9 = vsel %vm1009_vm1, %v2367_v37, %v2369_v7 }
 0x2c6   : > { %2586 = vst.msk [vmem:[#allocation2 + $0x2c] sm:$0x1] %vm2495_vm5, %v2582_v61  ;;  %v2451_v13 = vmax.f32 %v9021_v28, %v2370_v9  ;;  %vm9612_vm5 = vmmov %vm9610_vm9 }
 0x2c7   : > { %v2002_v23 = vpop.f32.mrb[76].mxu0  ;;  %vm9615_vm2 = vmmov %vm9612_vm5 }
 0x2c8   : > { %2490 = vst.msk [vmem:[#allocation3 + $0x108] sm:$0xff] %vm1511_vm11, %v2451_v13  ;;  %v2003_v20 = vadd.f32 %v8887_v36, %v2002_v23  ;;  %v6626_v50 = vpop.f32.mrb[77].mxu0  ;;  %vm9616_vm9 = vmmov %vm9615_vm2 }
 0x2c9   : > { %v2005_v14 = vpop.f32.mrb[78].mxu0 }
 0x2ca   : > { %v2054_v62 = vmax.f32 %v2003_v20, 0.0  ;;  %v2006_v49 = vadd.f32 %v8887_v36, %v2005_v14  ;;  %v6627_v56 = vpop.f32.mrb[79].mxu0 }
 0x2cb   : > { %v2609_v26 = vld [vmem:[#allocation2 + $0x28] sm:$0xf]  ;;  %v2621_v56 = vld [vmem:[#allocation2 + $0x3c] sm:$0x1] }
 0x2cc   : > { %v2174_v31 = vrot.slane %v2054_v62, 1  ;;  %v2055_v60 = vmax.f32 %v2006_v49, 0.0  ;;  %v9071_v17 = vcombine.low %v8985_v1, %v2609_v26 }
 0x2ce   : > { %v2175_v28 = vsel %vm719_vm0, %v2172_v52, %v2174_v31  ;;  %v2176_v27 = vrot.slane %v2055_v60, 1  ;;  %v2873_v16 = vrot.slane %v9071_v17, 2  ;;  %v2778_v51 = vrot.slane %v9071_v17, 1 }
 0x2cf   : > { %v2258_v47 = vmax.f32 %v2053_v58, %v2175_v28  ;;  %v2837_v4 = vshrl.u32 %v9071_v17, 16  ;;  %v2840_v12 = vshll.u32 %v9071_v17, 16 }
 0x2d0   : > { %v2177_v36 = vsel %vm719_vm0, %v2174_v31, %v2176_v27  ;;  %v2874_v46 = vsel %vm1009_vm1, %v2871_v8, %v2873_v16  ;;  %v2779_v1 = vsel %vm719_vm0, %v2776_v3, %v2778_v51 }
 0x2d1   : > { %v2371_v52 = vrot.slane %v2258_v47, 2  ;;  %v2259_v63 = vmax.f32 %v2054_v62, %v2177_v36  ;;  %2885 = vrot.lane.b32.xlu0 %v2874_v46, %s7385_s24  ;;  %2790 = vrot.lane.b32.xlu1 %v2779_v1, %s7388_s26  ;;  %v2839_v58 = vrot.slane %v2837_v4, 1  ;;  %v2842_v45 = vrot.slane %v2840_v12, 2 }
 0x2d3   : > { %v2372_v43 = vsel %vm1009_vm1, %v2369_v7, %v2371_v52  ;;  %v2373_v37 = vrot.slane %v2259_v63, 2  ;;  %v9090_v25 = vor.u32 %v2842_v45, %v2839_v58 }
 0x2d4   : > { %v2452_v8 = vmax.f32 %v9030_v32, %v2372_v43  ;;  %v2617_v32 = vld [vmem:[#allocation2 + $0x34] sm:$0xf] }
 0x2d5   : > { %v2374_v39 = vsel %vm1009_vm1, %v2371_v52, %v2373_v37  ;;  %v9097_v2 = vsel %vm9612_vm5, %v8969_v21, %v9090_v25  ;;  %v9103_v23 = vcombine.low %v2617_v32, %v2617_v32  ;;  %v9107_v21 = vld [vmem:[#allocation2 + $0x38] sm:$0xf] }
 0x2d6   : > { %2491 = vst.msk [vmem:[#allocation3 + $0x110] sm:$0xff] %vm1511_vm11, %v2452_v8  ;;  %v2453_v3 = vmax.f32 %v2256_v15, %v2374_v39  ;;  %v9125_v12 = vcombine.low %v9107_v21, %v2621_v56  ;;  %v9139_v39 = vld [vmem:[#allocation2 + $0x34] ss:$0 sps:$4 sm:$0x77]  }
 0x2d7   : > { %v2855_v60 = vshrl.u32 %v9103_v23, 16  ;;  %v2858_v28 = vshll.u32 %v9103_v23, 16  ;;  %v2877_v37 = vrot.slane %v9103_v23, 2  ;;  %v2782_v17 = vrot.slane %v9139_v39, 1 }
 0x2d8   : > { %2492 = vst.msk [vmem:[#allocation3 + $0x118] sm:$0xff] %vm1511_vm11, %v2453_v3  ;;  %v3000_v43 = vrot.slane %v9125_v12, 3 }
 0x2d9   : > { %v2857_v1 = vrot.slane %v2855_v60, 1  ;;  %v2860_v52 = vrot.slane %v2858_v28, 2 }
 0x2df   : > { %v2588_v61 = vld [vmem:[#allocation3 + $0x10f] ss:$2 sm:$0xff] }
 0x2e0   : > { %v6400_v33 = vpack.c.bf16 %v2588_v61, %v2588_v61 }
 0x2e2   : > { %v2593_v7 = vrot.slane %v6400_v33, 6 }
 0x2e4   : > { %v2594_v9 = vrot.slane %v2593_v7, 4  ;;  %2597 = vst.msk [vmem:[#allocation2 + $0x2c] sm:$0xc] %vm2555_vm6, %v2593_v7  ;;  %vm9614_vm6 = vmmov %vm9612_vm5 }
 0x2e6   : > { %2598 = vst.msk [vmem:[#allocation2 + $0x30] sm:$0x3] %vm2557_vm14, %v2594_v9  ;;  %vm9613_vm14 = vcmask 1044480  }
 0x2eb   : > { %v2610_v13 = vld [vmem:[#allocation2 + $0x2c] sm:$0xf] }
 0x2ec   : > { %v9105_v20 = vcombine.low %v2609_v26, %v2610_v13 }
 0x2ed   : > { %v2615_v50 = vld [vmem:[#allocation2 + $0x30] sm:$0xf] }
 0x2ee   : > { %v2907_v15 = vrot.slane %v9105_v20, 2  ;;  %v2740_v14 = vrot.slane %v9105_v20, 1  ;;  %v2699_v62 = vshll.u32 %v9105_v20, 16  ;;  %v6069_v49 = vcombine.low %v2610_v13, %v2615_v50  ;;  %v9127_v36 = vld [vmem:[#allocation2 + $0x30] ss:$0 sps:$4 sm:$0x77]  }
 0x2ef   : > { %v9112_v31 = vcombine.low %v2615_v50, %v2617_v32  ;;  %v2703_v46 = vshrl.u32 %v9105_v20, 16  ;;  %v2742_v8 = vrot.slane %v9127_v36, 1  ;;  %v9146_v13 = vor.u32 %v2860_v52, %v2857_v1  ;;  %v6844_v50 = vld [vmem:[%s9579_s3 + $0x88] sm:$0xff]  }
 0x2f0   : > { %v2908_v26 = vsel %vm1009_vm1, %v2905_v11, %v2907_v15  ;;  %v2741_v27 = vsel %vm719_vm0, %v2738_v40, %v2740_v14  ;;  %v2701_v47 = vrot.slane %v2699_v62, 1  ;;  %v2875_v4 = vrot.slane %v6069_v49, 2  ;;  %6635 = vmatpush3.bf16.msra.mxu1 %v6844_v50 }
 0x2f1   : > { %2919 = vrot.lane.b32.xlu0 %v2908_v26, %s7382_s28  ;;  %2752 = vrot.lane.b32.xlu1 %v2741_v27, %s7382_s28  ;;  %v2909_v63 = vrot.slane %v9112_v31, 2  ;;  %v2780_v58 = vrot.slane %v6069_v49, 1  ;;  %v2846_v45 = vshrl.u32 %v6069_v49, 16  ;;  %v2849_v3 = vshll.u32 %v6069_v49, 16 }
 0x2f2   : > { %v2702_v11 = vsel %vm506_vm3, %v9025_v34, %v2701_v47  ;;  %v2876_v40 = vsel %vm1009_vm1, %v2873_v16, %v2875_v4  ;;  %v2950_v34 = vrot.slane %v2703_v46, 2  ;;  %v2951_v61 = vrot.slane %v2699_v62, 3 }
 0x2f3   : > { %v2848_v16 = vrot.slane %v2846_v45, 1  ;;  %v2998_v33 = vrot.slane %v9112_v31, 3  ;;  %v2910_v7 = vsel %vm1009_vm1, %v2907_v15, %v2909_v63  ;;  %v2781_v9 = vsel %vm719_vm0, %v2778_v51, %v2780_v58 }
 0x2f4   : > { %v2851_v32 = vrot.slane %v2849_v3, 2  ;;  %v6075_v51 = vcombine.low %v9107_v21, %v9107_v21  ;;  %v2878_v49 = vsel %vm1009_vm1, %v2875_v4, %v2877_v37  ;;  %v2743_v56 = vsel %vm719_vm0, %v2740_v14, %v2742_v8  ;;  %v2882_v4 = vpop.permute.xlu0 %2881  ;;  %v2747_v14 = vpop.permute.xlu1 %2746 }
 0x2f5   : > { %2722 = vrot.lane.b32.xlu1 %v2702_v11, %s7385_s24  ;;  %2887 = vrot.lane.b32.xlu0 %v2876_v40, %s7385_s24  ;;  %v9158_v15 = vsel %vm9613_vm14, %v2998_v33, %v3000_v43  ;;  %v2952_v60 = vor.u32 %v2951_v61, %v2950_v34  ;;  %v2707_v28 = vshll.u32 %v9127_v36, 16  ;;  %v2955_v26 = vshrl.u32 %v9112_v31, 16 }
 0x2f6   : > { %v2852_v62 = vor.u32 %v2851_v32, %v2848_v16  ;;  %v2958_v27 = vshll.u32 %v9112_v31, 16  ;;  %v2783_v52 = vsel %vm719_vm0, %v2780_v58, %v2782_v17  ;;  %v2911_v11 = vrot.slane %v6075_v51, 2 }
 0x2f7   : > { %v2705_v40 = vor.u32 %v2703_v46, %v2701_v47  ;;  %v2953_v45 = vsel %vm1153_vm4, %v9023_v35, %v2952_v60  ;;  %v2709_v39 = vrot.slane %v2707_v28, 1  ;;  %v2964_v61 = vshrl.u32 %v9125_v12, 16 }
 0x2f8   : > { %v9174_v21 = vsel %vm9614_vm6, %v9090_v25, %v2852_v62  ;;  %v9178_v1 = vsel %vm9615_vm2, %v2852_v62, %v9146_v13  ;;  %v2957_v25 = vrot.slane %v2955_v26, 2  ;;  %v2960_v3 = vrot.slane %v2958_v27, 3  ;;  %v2717_v16 = vpop.permute.xlu1 %2716 }
 0x2f9   : > { %2921 = vrot.lane.b32.xlu0 %v2910_v7, %s7382_s28  ;;  %2792 = vrot.lane.b32.xlu1 %v2781_v9, %s7388_s26  ;;  %v2912_v7 = vsel %vm1009_vm1, %v2909_v63, %v2911_v11  ;;  %v2710_v58 = vsel %vm506_vm3, %v2705_v40, %v2709_v39  ;;  %v2967_v47 = vshll.u32 %v9125_v12, 16  ;;  %v2711_v46 = vshrl.u32 %v9127_v36, 16  ;;  %vm9617_vm3 = vmmov %vm9613_vm14 }
 0x2fa   : > { %v2961_v9 = vor.u32 %v2960_v3, %v2957_v25  ;;  %v3005_v32 = vsel %vm1511_vm11, %v8673_v42, %v2717_v16  ;;  %v2826_v50 = vsel %vm9616_vm9, %v9036_v53, %v8967_v44  ;;  %vm9619_vm10 = vmmov %vm9617_vm3 }
 0x2fb   : > { %v2713_v63 = vor.u32 %v2711_v46, %v2709_v39  ;;  %v3058_v62 = vsel %vm1511_vm11, %v2826_v50, %v2882_v4  ;;  %v2969_v28 = vrot.slane %v2967_v47, 3  ;;  %vm9621_vm5 = vmmov %vm9617_vm3 }
 0x2fc   : > { %v2787_v51 = vpop.permute.xlu1 %2786 }
 0x2fd   : > { %2889 = vrot.lane.b32.xlu0 %v2878_v49, %s7385_s24  ;;  %2754 = vrot.lane.b32.xlu1 %v2743_v56, %s7382_s28  ;;  %v2962_v49 = vsel %vm1153_vm4, %v2952_v60, %v2961_v9  ;;  %v2966_v56 = vrot.slane %v2964_v61, 2 }
 0x2ff   : > { %v2970_v53 = vor.u32 %v2969_v28, %v2966_v56 }
 0x301   : > { %2978 = vrot.lane.b32.xlu0 %v2953_v45, %s7388_s26  ;;  %2794 = vrot.lane.b32.xlu1 %v2783_v52, %s7388_s26  ;;  %v2916_v34 = vpop.permute.xlu0 %2915  ;;  %v3020_v52 = vsel %vm1683_vm15, %v3005_v32, %v2747_v14  ;;  %v2971_v60 = vsel %vm1153_vm4, %v2961_v9, %v2970_v53  ;;  %v2749_v4 = vpop.permute.xlu1 %2748  ;;  %vm9618_vm4 = vmmov %vm9617_vm3 }
 0x302   : > { %v3077_v26 = vsel %vm1683_vm15, %v3058_v62, %v2916_v34  ;;  %v3036_v44 = vsel %vm3031_vm12, %v3020_v52, %v2787_v51 }
 0x305   : > { %2923 = vrot.lane.b32.xlu0 %v2912_v7, %s7382_s28  ;;  %2724 = vrot.lane.b32.xlu1 %v2710_v58, %s7385_s24  ;;  %v2884_v35 = vpop.permute.xlu0 %2883  ;;  %v2719_v14 = vpop.permute.xlu1 %2718 }
 0x306   : > { %v3007_v23 = vsel %vm1511_vm11, %v8801_v6, %v2719_v14  ;;  %v3061_v36 = vsel %vm1511_vm11, %v8975_v48, %v2884_v35 }
 0x309   : > { %2980 = vrot.lane.b32.xlu0 %v2962_v49, %s7388_s26  ;;  %2726 = vrot.lane.b32.xlu1 %v2713_v63, %s7385_s24  ;;  %v2975_v27 = vpop.permute.xlu0 %2974 }
 0x30a   : > { %v3092_v42 = vsel %vm3031_vm12, %v3077_v26, %v2975_v27 }
 0x30b   : > { %3321 = vmatprep.mubr.bf16.mxu1 %v3092_v42 }
 0x30c   : > { %3322 = vmatmul.mubr.bf16.gmra.mrb[4].mxu1 %v3036_v44 }
 0x30d   : > { %2891 = vrot.lane.b32.xlu0 %v2877_v37, %s7385_s24  ;;  %2756 = vrot.lane.b32.xlu1 %v2742_v8, %s7382_s28  ;;  %v2789_v37 = vpop.permute.xlu1 %2788 }
 0x311   : > { %2982 = vrot.lane.b32.xlu0 %v2971_v60, %s7388_s26  ;;  %2796 = vrot.lane.b32.xlu1 %v2782_v17, %s7388_s26  ;;  %v3022_v17 = vsel %vm1683_vm15, %v3007_v23, %v2749_v4 }
 0x315   : > { %2925 = vrot.lane.b32.xlu0 %v2911_v11, %s7382_s28  ;;  %v3039_v11 = vsel %vm3031_vm12, %v3022_v17, %v2789_v37 }
 0x319   : > { %2984 = vrot.lane.b32.xlu0 %v2970_v53, %s7388_s26  ;;  %s9622_s26 = smov 24  }
 0x31f   : > { %v2918_v40 = vpop.permute.xlu0 %2917  ;;  %v2751_v25 = vpop.permute.xlu1 %2750 }
 0x320   : > { %v3079_v8 = vsel %vm1683_vm15, %v3061_v36, %v2918_v40 }
 0x323   : > { %v2721_v3 = vpop.permute.xlu1 %2720 }
 0x324   : > { %v2977_v45 = vpop.permute.xlu0 %2976  ;;  %v3009_v32 = vsel %vm1511_vm11, %v8904_v10, %v2721_v3 }
 0x325   : > { %v3095_v39 = vsel %vm3031_vm12, %v3079_v8, %v2977_v45  ;;  %v3024_v56 = vsel %vm1683_vm15, %v3009_v32, %v2751_v25  ;;  %v6845_v25 = vld [vmem:[#allocation2 + $0x30] ss:$0 sps:$4 sm:$0x33]  }
 0x326   : > { %3329 = vmatprep.mubr.bf16.mxu1 %v3095_v39 }
 0x327   : > { %3330 = vmatmul.mubr.bf16.gmra.mrb[8].mxu1 %v3039_v11 }
 0x343   : > { %v2791_v34 = vpop.permute.xlu1 %2790  ;;  %v2886_v61 = vpop.permute.xlu0 %2885 }
 0x344   : > { %v3064_v50 = vsel %vm1511_vm11, %v9097_v2, %v2886_v61  ;;  %v3042_v28 = vsel %vm3031_vm12, %v3024_v56, %v2791_v34  ;;  %v2992_v56 = vrot.slane %v8904_v10, 3 }
 0x363   : > { %v2753_v16 = vpop.permute.xlu1 %2752  ;;  %v2920_v7 = vpop.permute.xlu0 %2919 }
 0x364   : > { %v3081_v63 = vsel %vm1683_vm15, %v3064_v50, %v2920_v7 }
 0x367   : > { %v2723_v58 = vpop.permute.xlu1 %2722  ;;  %v2888_v48 = vpop.permute.xlu0 %2887 }
 0x368   : > { %v3011_v42 = vsel %vm1511_vm11, %v8989_v18, %v2723_v58  ;;  %v3067_v2 = vsel %vm1511_vm11, %v9174_v21, %v2888_v48 }
 0x369   : > { %v3026_v60 = vsel %vm1683_vm15, %v3011_v42, %v2753_v16 }
 0x36b   : > { %v2793_v9 = vpop.permute.xlu1 %2792  ;;  %v2922_v47 = vpop.permute.xlu0 %2921 }
 0x36c   : > { %v3083_v52 = vsel %vm1683_vm15, %v3067_v2, %v2922_v47  ;;  %v3045_v4 = vsel %vm3031_vm12, %v3026_v60, %v2793_v9  ;;  %v2622_v47 = vld [vmem:[#allocation2 + $0x8] sm:$0x8] }
 0x36f   : > { %v2755_v35 = vpop.permute.xlu1 %2754  ;;  %v2890_v46 = vpop.permute.xlu0 %2889 }
 0x370   : > { %v3070_v36 = vsel %vm1511_vm11, %v9178_v1, %v2890_v46 }
 0x373   : > { %v2795_v51 = vpop.permute.xlu1 %2794  ;;  %v2979_v62 = vpop.permute.xlu0 %2978 }
 0x374   : > { %v3098_v49 = vsel %vm3031_vm12, %v3081_v63, %v2979_v62  ;;  %v2990_v63 = vrot.slane %v8801_v6, 3  ;;  %v2994_v6 = vrot.slane %v8989_v18, 3 }
 0x375   : > { %3337 = vmatprep.mubr.bf16.mxu1 %v3098_v49 }
 0x376   : > { %3338 = vmatmul.mubr.bf16.gmra.mrb[12].mxu1 %v3042_v28  ;;  %v2993_v28 = vsel %vm9618_vm4, %v2990_v63, %v2992_v56 }
 0x377   : > { %v2924_v26 = vpop.permute.xlu0 %2923  ;;  %v2725_v27 = vpop.permute.xlu1 %2724 }
 0x378   : > { %v3013_v40 = vsel %vm1511_vm11, %v9105_v20, %v2725_v27  ;;  %v3085_v37 = vsel %vm1683_vm15, %v3070_v36, %v2924_v26  ;;  %v2995_v26 = vsel %vm9619_vm10, %v2992_v56, %v2994_v6  ;;  %v2996_v27 = vrot.slane %v9105_v20, 3  ;;  %v6849_v36 = vld [vmem:[#allocation5 + $0x28] ss:$16 sps:$4 sm:$0xff]   ;;  %v6896_v56 = vld [vmem:[#allocation5 + $0xc4] ss:$16 sps:$4 sm:$0xff]  }
 0x379   : > { %v3028_v21 = vsel %vm1683_vm15, %v3013_v40, %v2755_v35  ;;  %v6846_v40 = vld [vmem:[#allocation5 + $0x8] ss:$16 sps:$4 sm:$0xff]  }
 0x37a   : > { %v3048_v17 = vsel %vm3031_vm12, %v3028_v21, %v2795_v51  ;;  %v2999_v18 = vsel %vm9621_vm5, %v2996_v27, %v2998_v33  ;;  %v6851_v21 = vld [vmem:[#allocation5 + $0x2c] ss:$16 sps:$4 sm:$0xff]  }
 0x37b   : > { %v2981_v44 = vpop.permute.xlu0 %2980  ;;  %v2727_v14 = vpop.permute.xlu1 %2726 }
 0x37c   : > { %v3101_v53 = vsel %vm3031_vm12, %v3083_v52, %v2981_v44  ;;  %v3016_v1 = vsel %vm1511_vm11, %v6845_v25, %v2727_v14  ;;  %v6875_v25 = vld [vmem:[#allocation5 + $0x24] ss:$16 sps:$4 sm:$0xff]  }
 0x37d   : > { %3345 = vmatprep.mubr.bf16.mxu1 %v3101_v53 }
 0x37e   : > { %3346 = vmatmul.mubr.bf16.gmra.mrb[16].mxu1 %v3045_v4 }
 0x37f   : > { %v2892_v23 = vpop.permute.xlu0 %2891  ;;  %v2757_v45 = vpop.permute.xlu1 %2756 }
 0x380   : > { %v3073_v3 = vsel %vm1511_vm11, %v9146_v13, %v2892_v23  ;;  %v3030_v7 = vsel %vm1683_vm15, %v3016_v1, %v2757_v45  ;;  %v7275_v13 = vld [vmem:[#allocation2 + $0xc] sm:$0xf]  ;;  %v6848_v23 = vld [vmem:[#allocation5 + $0xc] ss:$16 sps:$4 sm:$0xff]  }
 0x381   : > { %v6077_v46 = vcombine.low %v2622_v47, %v7275_v13  ;;  %5392 = vmatprep.subr.bf16.mxu0 %v6848_v23  ;;  %v6857_v45 = vld [vmem:[#allocation5 + $0x6c] ss:$16 sps:$4 sm:$0xff]   ;;  %v6878_v1 = vld [vmem:[#allocation5 + $0x44] ss:$16 sps:$4 sm:$0xff]   ;;  %v6891_v13 = vld [vmem:[#allocation5 + $0x128] ss:$16 sps:$4 sm:$0xff]  }
 0x382   : > { %5393 = vmatpush1.bf16.msra.mxu0 %v6846_v40  ;;  %v6893_v47 = vld [vmem:[#allocation5 + $0x12c] ss:$16 sps:$4 sm:$0xff]   ;;  %v6908_v23 = vld [vmem:[#allocation5 + $0x124] ss:$16 sps:$4 sm:$0xff]  }
 0x383   : > { %v2983_v8 = vpop.permute.xlu0 %2982  ;;  %v2797_v34 = vpop.permute.xlu1 %2796  ;;  %v2989_v62 = vrot.slane %v6077_v46, 3  ;;  %5394 = vmatprep.subr.bf16.mxu0 %v6851_v21  ;;  %v6885_v46 = vld [vmem:[#allocation5 + $0x80] ss:$16 sps:$4 sm:$0xff]  }
 0x384   : > { %v3104_v39 = vsel %vm3031_vm12, %v3085_v37, %v2983_v8  ;;  %v3051_v48 = vsel %vm3031_vm12, %v3030_v7, %v2797_v34  ;;  %v6854_v37 = vld [vmem:[#allocation5 + $0x4c] ss:$16 sps:$4 sm:$0xff]   ;;  %v6855_v8 = vld [vmem:[#allocation5 + $0x68] ss:$16 sps:$4 sm:$0xff]   ;;  %v6873_v34 = vld [vmem:[#allocation5 + $0x20] ss:$16 sps:$4 sm:$0xff]  }
 0x385   : > { %3353 = vmatprep.mubr.bf16.mxu1 %v3104_v39  ;;  %v2991_v49 = vsel %vm9617_vm3, %v2989_v62, %v2990_v63  ;;  %v6861_v39 = vld [vmem:[#allocation5 + $0xa8] ss:$16 sps:$4 sm:$0xff]   ;;  %v6881_v7 = vld [vmem:[#allocation5 + $0x10c] ss:$16 sps:$4 sm:$0xff]   ;;  %v6888_v62 = vld [vmem:[#allocation5 + $0xa0] ss:$16 sps:$4 sm:$0xff]  }
 0x386   : > { %3354 = vmatmul.mubr.bf16.gmra.mrb[20].mxu1 %v3048_v17  ;;  %5395 = vmatpush1.bf16.msra.mxu0 %v6849_v36  ;;  %v6867_v17 = vld [vmem:[#allocation5] ss:$16 sps:$4 sm:$0xff]   ;;  %v6903_v63 = vld [vmem:[#allocation5 + $0x148] ss:$16 sps:$4 sm:$0xff]  }
 0x387   : > { %v2926_v11 = vpop.permute.xlu0 %2925  ;;  %5396 = vmatprep.subr.bf16.mxu0 %v6854_v37  ;;  %v6911_v37 = vld [vmem:[#allocation5 + $0x144] ss:$16 sps:$4 sm:$0xff]  }
 0x388   : > { %v3087_v61 = vsel %vm1683_vm15, %v3073_v3, %v2926_v11  ;;  %v6869_v11 = vld [vmem:[#allocation5 + $0x4] ss:$16 sps:$4 sm:$0xff]   ;;  %v6872_v3 = vld [vmem:[#allocation5 + $0xec] ss:$16 sps:$4 sm:$0xff]  }
 0x389   : > { %5228 = vmatprep.subr.bf16.mxu1 %v6869_v11  ;;  %v6915_v11 = vld [vmem:[#allocation5 + $0x160] ss:$16 sps:$4 sm:$0xff]  }
 0x38b   : > { %v2985_v16 = vpop.permute.xlu0 %2984 }
 0x38c   : > { %v3107_v58 = vsel %vm3031_vm12, %v3087_v61, %v2985_v16  ;;  %vm9620_vm12 = vmmov %vm9617_vm3  ;;  %v6870_v61 = vld [vmem:[#allocation5 + $0xe8] ss:$16 sps:$4 sm:$0xff]   ;;  %v6876_v16 = vld [vmem:[#allocation5 + $0x40] ss:$16 sps:$4 sm:$0xff]  }
 0x38d   : > { %3361 = vmatprep.mubr.bf16.mxu1 %v3107_v58  ;;  %v2997_v10 = vsel %vm9620_vm12, %v2994_v6, %v2996_v27  ;;  %v6884_v58 = vld [vmem:[#allocation5 + $0x64] ss:$16 sps:$4 sm:$0xff]   ;;  %v6912_v6 = vld [vmem:[#allocation5 + $0x168] ss:$16 sps:$4 sm:$0xff]   ;;  %v6894_v27 = vld [vmem:[#allocation5 + $0xc0] ss:$16 sps:$4 sm:$0xff]  }
 0x38e   : > { %v6443_v9 = vpop.f32.mrb[0].mxu1  ;;  %3362 = vmatmul.mubr.bf16.gmra.mrb[24].mxu1 %v3051_v48  ;;  %v6879_v48 = vld [vmem:[#allocation5 + $0x108] ss:$16 sps:$4 sm:$0xff]  }
 0x38f   : > { %v6444_v35 = vpop.f32.mrb[1].mxu1  ;;  %6636 = vmatprep.mubr.msk.bf16.mxu1 %vm7386_vm7, %v7377_v0  ;;  %v6882_v9 = vld [vmem:[#allocation5 + $0x60] ss:$16 sps:$4 sm:$0xff]  }
 0x390   : > { %v6446_v32 = vpop.f32.mrb[2].mxu1  ;;  %v6887_v35 = vld [vmem:[#allocation5 + $0x84] ss:$16 sps:$4 sm:$0xff]  }
 0x391   : > { %v6447_v50 = vpop.f32.mrb[3].mxu1 }
 0x392   : > { %v9260_v51 = vadd.f32 %v6447_v50, %v6446_v32  ;;  %v6905_v32 = vld [vmem:[#allocation5 + $0x14c] ss:$16 sps:$4 sm:$0xff]   ;;  %v6890_v50 = vld [vmem:[#allocation5 + $0xa4] ss:$16 sps:$4 sm:$0xff]  }
 0x396   : > { %6637 = vmatmul.mubr.msk.bf16.vlgmr.msra.gmra.mrb[28].mxu1 %vm1511_vm11, %v2991_v49  ;;  %v6914_v49 = vld [vmem:[#allocation5 + $0x16c] ss:$16 sps:$4 sm:$0xff]  }
 0x397   : > { %6640 = vmatprep.mubr.msk.bf16.mxu1 %vm7386_vm7, %v7377_v0  ;;  %5229 = vmatpush1.bf16.msra.mxu1 %v6867_v17 }
 0x398   : > { %5230 = vmatprep.subr.bf16.mxu1 %v6875_v25 }
 0x39b   : > { %5231 = vmatpush1.bf16.msra.mxu1 %v6873_v34  ;;  %v6918_v34 = vld [vmem:[#allocation5 + $0x180] ss:$16 sps:$4 sm:$0xff]  }
 0x39c   : > { %5232 = vmatprep.subr.bf16.mxu1 %v6878_v1 }
 0x39e   : > { %6641 = vmatmul.mubr.msk.bf16.gmra.mrb[32].mxu1 %vm1511_vm11, %v2993_v28 }
 0x39f   : > { %6644 = vmatprep.mubr.msk.bf16.mxu1 %vm7386_vm7, %v7377_v0  ;;  %5233 = vmatpush1.bf16.msra.mxu1 %v6876_v16  ;;  %v6924_v16 = vld [vmem:[#allocation5 + $0x1a4] ss:$16 sps:$4 sm:$0xff]  }
 0x3a0   : > { %5234 = vmatprep.subr.bf16.mxu1 %v6884_v58  ;;  %v9330_v58 = vld [vmem:[%s9580_s4] ss:$0 sm:$0xff] }
 0x3a3   : > { %5235 = vmatpush1.bf16.msra.mxu1 %v6882_v9  ;;  %v6930_v9 = vld [vmem:[#allocation5 + $0x1c4] ss:$16 sps:$4 sm:$0xff]  }
 0x3a4   : > { %5236 = vmatprep.subr.bf16.mxu1 %v6887_v35 }
 0x3a6   : > { %6645 = vmatmul.mubr.msk.bf16.gmra.mrb[36].mxu1 %vm1511_vm11, %v2995_v26 }
 0x3a7   : > { %6648 = vmatprep.mubr.msk.bf16.mxu1 %vm7386_vm7, %v7377_v0  ;;  %5237 = vmatpush1.bf16.msra.mxu1 %v6885_v46  ;;  %v6928_v46 = vld [vmem:[#allocation5 + $0x1c0] ss:$16 sps:$4 sm:$0xff]  }
 0x3a8   : > { %5238 = vmatprep.subr.bf16.mxu1 %v6890_v50 }
 0x3ab   : > { %5239 = vmatpush1.bf16.msra.mxu1 %v6888_v62 }
 0x3ac   : > { %5240 = vmatprep.subr.bf16.mxu1 %v6896_v56 }
 0x3ae   : > { %6649 = vmatmul.mubr.msk.bf16.gmra.mrb[40].mxu1 %vm1511_vm11, %v2997_v10  ;;  %v6927_v10 = vld [vmem:[#allocation5 + $0x18c] ss:$16 sps:$4 sm:$0xff]  }
 0x3af   : > { %6652 = vmatprep.mubr.msk.bf16.mxu1 %vm7386_vm7, %v7377_v0  ;;  %5241 = vmatpush1.bf16.msra.mxu1 %v6894_v27 }
 0x3b6   : > { %6653 = vmatmul.mubr.msk.bf16.gmra.mrb[44].mxu1 %vm1511_vm11, %v2999_v18 }
 0x3b7   : > { %6656 = vmatprep.mubr.msk.bf16.mxu1 %vm7386_vm7, %v7377_v0 }
 0x3be   : > { %6657 = vmatmul.mubr.msk.bf16.gmra.mrb[48].mxu1 %vm1511_vm11, %v9158_v15 }
 0x3bf   : > { %6660 = vmatprep.mubr.msk.bf16.mxu1 %vm7386_vm7, %v7377_v0  ;;  %v7276_v0 = vld [vmem:[%s7529_s23 + $0xa0] ss:$0 sps:$4 sm:$0x77]   ;;  %vm9629_vm7 = vcmask 326656  }
 0x3c0   : > { %v671_v12 = vshrl.u32 %v7276_v0, 16 }
 0x3c6   : > { %6661 = vmatmul.mubr.msk.bf16.gmra.mrb[52].mxu1 %vm1511_vm11, %v3000_v43  ;;  %v673_v43 = vor.u32 %v671_v12, %v8402_v54  ;;  %v6852_v54 = vld [vmem:[#allocation5 + $0x48] ss:$16 sps:$4 sm:$0xff]   ;;  %v6900_v12 = vld [vmem:[#allocation5 + $0x100] ss:$16 sps:$4 sm:$0xff]  }
 0x3c7   : > { %5397 = vmatpush1.bf16.msra.mxu0 %v6852_v54  ;;  %v6906_v54 = vld [vmem:[#allocation5 + $0x120] ss:$16 sps:$4 sm:$0xff]  }
 0x3c8   : > { %714 = vrot.lane.b32.xlu1 %v673_v43, %s7383_s27  ;;  %5398 = vmatprep.subr.bf16.mxu0 %v6857_v45 }
 0x3cb   : > { %5399 = vmatpush1.bf16.msra.mxu0 %v6855_v8 }
 0x3cc   : > { %860 = vrot.lane.b32.xlu1 %v818_v5, %s9622_s26  ;;  %v6858_v5 = vld [vmem:[#allocation5 + $0x88] ss:$16 sps:$4 sm:$0xff]   ;;  %5400 = vmatprep.subr.bf16.mxu0 %v6860_v57  ;;  %v6909_v57 = vld [vmem:[#allocation5 + $0x140] ss:$16 sps:$4 sm:$0xff]   ;;  %s7310_s26 = sshll.u32 %s7389_s17, 4  ;;  %s7311_s26 = int_to_ptr.vmem [resolvable:$false] %s7310_s26 }
 0x3cf   : > { %5401 = vmatpush1.bf16.msra.mxu0 %v6858_v5 }
 0x3d0   : > { %1091 = vrot.lane.b32.xlu1 %v1049_v30, %s9623_s29  ;;  %v6866_v30 = vld [vmem:[#allocation5 + $0xcc] ss:$16 sps:$4 sm:$0xff]   ;;  %5402 = vmatprep.subr.bf16.mxu0 %v6863_v29  ;;  %v6917_v29 = vld [vmem:[#allocation5 + $0x164] ss:$16 sps:$4 sm:$0xff]   ;;  %s338_s29 = sand.u32 1, %s7364_s10  }
 0x3d1   : > { %s5903_s21 = scalar_lea.sflag [#allocation7], %s338_s29 }
 0x3d3   : > { %5403 = vmatpush1.bf16.msra.mxu0 %v6861_v39 }
 0x3d4   : > { %1292 = vrot.lane.b32.xlu1 %v8497_v38, %s9624_s25  ;;  %v6864_v38 = vld [vmem:[#allocation5 + $0xc8] ss:$16 sps:$4 sm:$0xff]   ;;  %5404 = vmatprep.subr.bf16.mxu0 %v6866_v30  ;;  %s7312_s25 = scalar_lea.vmem %s7311_s26, 32 }
 0x3d7   : > { %5405 = vmatpush1.bf16.msra.mxu0 %v6864_v38  ;;  %v6920_v38 = vld [vmem:[#allocation5 + $0x184] ss:$16 sps:$4 sm:$0xff]  }
 0x3d8   : > { %5406 = vmatprep.subr.bf16.mxu0 %v6872_v3 }
 0x3db   : > { %5407 = vmatpush1.bf16.msra.mxu0 %v6870_v61 }
 0x3dc   : > { %5408 = vmatprep.subr.bf16.mxu0 %v6881_v7 }
 0x3df   : > { %v6449_v20 = vpop.f32.mrb[4].mxu1  ;;  %5409 = vmatpush1.bf16.msra.mxu0 %v6879_v48  ;;  %v6922_v48 = vld [vmem:[#allocation5 + $0x1a0] ss:$16 sps:$4 sm:$0xff]  }
 0x3e0   : > { %v6450_v31 = vpop.f32.mrb[5].mxu1  ;;  %5410 = vmatprep.subr.bf16.mxu0 %v6893_v47 }
 0x3e1   : > { %v9294_v42 = vadd.f32 %v6450_v31, %v6449_v20  ;;  %v6452_v33 = vpop.f32.mrb[6].mxu1  ;;  %v6899_v31 = vld [vmem:[#allocation5 + $0xe4] ss:$16 sps:$4 sm:$0xff]  }
 0x3e2   : > { %v6453_v2 = vpop.f32.mrb[7].mxu1  ;;  %5242 = vmatprep.subr.bf16.mxu1 %v6899_v31 }
 0x3e3   : > { %v9296_v52 = vadd.f32 %v6453_v2, %v6452_v33  ;;  %5411 = vmatpush1.bf16.msra.mxu0 %v6891_v13  ;;  %v3319_v13 = vadd.f32 %v9260_v51, %v9330_v58  ;;  %v3324_v56 = vadd.f32 %v9294_v42, %v9330_v58 }
 0x3e4   : > { %5412 = vmatprep.subr.bf16.mxu0 %v6905_v32 }
 0x3e5   : > { %v3327_v27 = vadd.f32 %v9296_v52, %v9330_v58 }
 0x3e7   : > { %5413 = vmatpush1.bf16.msra.mxu0 %v6903_v63 }
 0x3e8   : > { %5414 = vmatprep.subr.bf16.mxu0 %v6914_v49 }
 0x3eb   : > { %5415 = vmatpush1.bf16.msra.mxu0 %v6912_v6 }
 0x3ec   : > { %5416 = vmatprep.subr.bf16.mxu0 %v6927_v10 }
 0x3fa   : > { %v6455_v44 = vpop.f32.mrb[8].mxu1 }
 0x3fb   : > { %v6456_v53 = vpop.f32.mrb[9].mxu1 }
 0x3fc   : > { %v9298_v60 = vadd.f32 %v6456_v53, %v6455_v44  ;;  %v6458_v15 = vpop.f32.mrb[10].mxu1  ;;  %v6925_v44 = vld [vmem:[#allocation5 + $0x188] ss:$16 sps:$4 sm:$0xff]   ;;  %v6897_v53 = vld [vmem:[#allocation5 + $0xe0] ss:$16 sps:$4 sm:$0xff]  }
 0x3fd   : > { %v6459_v4 = vpop.f32.mrb[11].mxu1  ;;  %5417 = vmatpush1.bf16.msra.mxu0 %v6925_v44  ;;  %5243 = vmatpush1.bf16.msra.mxu1 %v6897_v53 }
 0x3fe   : > { %v9300_v14 = vadd.f32 %v6459_v4, %v6458_v15  ;;  %v6902_v15 = vld [vmem:[#allocation5 + $0x104] ss:$16 sps:$4 sm:$0xff]  }
 0x3ff   : > { %5244 = vmatprep.subr.bf16.mxu1 %v6902_v15 }
 0x400   : > { %v3335_v52 = vadd.f32 %v9300_v14, %v9330_v58 }
 0x401   : > { %5245 = vmatpush1.bf16.msra.mxu1 %v6900_v12 }
 0x402   : > { %5246 = vmatprep.subr.bf16.mxu1 %v6908_v23 }
 0x405   : > { %5247 = vmatpush1.bf16.msra.mxu1 %v6906_v54 }
 0x406   : > { %5248 = vmatprep.subr.bf16.mxu1 %v6911_v37 }
 0x409   : > { %5249 = vmatpush1.bf16.msra.mxu1 %v6909_v57 }
 0x40a   : > { %5250 = vmatprep.subr.bf16.mxu1 %v6917_v29 }
 0x40d   : > { %5251 = vmatpush1.bf16.msra.mxu1 %v6915_v11 }
 0x40e   : > { %5252 = vmatprep.subr.bf16.mxu1 %v6920_v38 }
 0x411   : > { %5253 = vmatpush1.bf16.msra.mxu1 %v6918_v34 }
 0x412   : > { %5254 = vmatprep.subr.bf16.mxu1 %v6924_v16 }
 0x415   : > { %5255 = vmatpush1.bf16.msra.mxu1 %v6922_v48 }
 0x416   : > { %5256 = vmatprep.subr.bf16.mxu1 %v6930_v9 }
 0x419   : > { %5257 = vmatpush1.bf16.msra.mxu1 %v6928_v46 }
 0x449   : > { %v6461_v28 = vpop.f32.mrb[12].mxu1 }
 0x44a   : > { %v6462_v26 = vpop.f32.mrb[13].mxu1 }
 0x44b   : > { %v9313_v18 = vadd.f32 %v6462_v26, %v6461_v28  ;;  %v6464_v20 = vpop.f32.mrb[14].mxu1 }
 0x44c   : > { %v6465_v33 = vpop.f32.mrb[15].mxu1 }
 0x44d   : > { %v9315_v2 = vadd.f32 %v6465_v33, %v6464_v20  ;;  %v3340_v11 = vadd.f32 %v9313_v18, %v9330_v58 }
 0x451   : > { %v6467_v4 = vpop.f32.mrb[16].mxu1 }
 0x452   : > { %v6468_v0 = vpop.f32.mrb[17].mxu1 }
 0x453   : > { %v9317_v43 = vadd.f32 %v6468_v0, %v6467_v4  ;;  %v6470_v40 = vpop.f32.mrb[18].mxu1  ;;  %v3332_v4 = vadd.f32 %v9298_v60, %v9330_v58 }
 0x454   : > { %v6471_v36 = vpop.f32.mrb[19].mxu1 }
 0x455   : > { %v9319_v21 = vadd.f32 %v6471_v36, %v6470_v40 }
 0x459   : > { %v6473_v8 = vpop.f32.mrb[20].mxu1 }
 0x45a   : > { %v6474_v45 = vpop.f32.mrb[21].mxu1 }
 0x45b   : > { %v9321_v5 = vadd.f32 %v6474_v45, %v6473_v8  ;;  %v6476_v39 = vpop.f32.mrb[22].mxu1 }
 0x45c   : > { %v6477_v30 = vpop.f32.mrb[23].mxu1 }
 0x45d   : > { %v9323_v17 = vadd.f32 %v6477_v30, %v6476_v39 }
 0x461   : > { %v6479_v25 = vpop.f32.mrb[24].mxu1 }
 0x462   : > { %v6480_v3 = vpop.f32.mrb[25].mxu1 }
 0x463   : > { %v9325_v1 = vadd.f32 %v6480_v3, %v6479_v25  ;;  %v6482_v61 = vpop.f32.mrb[26].mxu1 }
 0x464   : > { %v6483_v7 = vpop.f32.mrb[27].mxu1  ;;  %v3343_v61 = vadd.f32 %v9315_v2, %v9330_v58 }
 0x469   : > { %v3403_v47 = vpop.f32.mrb[28].mxu1 }
 0x46a   : > { %v6638_v35 = vpop.f32.mrb[29].mxu1 }
 0x46b   : > { %v3406_v32 = vpop.f32.mrb[30].mxu1 }
 0x46c   : > { %v3407_v50 = vadd.f32 %v3406_v32, %v3319_v13  ;;  %v6639_v63 = vpop.f32.mrb[31].mxu1 }
 0x46e   : > { %v3458_v62 = vmax.f32 %v3407_v50, 0.0 }
 0x470   : > { %v3484_v49 = vrot.slane %v3458_v62, 1 }
 0x471   : > { %v3411_v28 = vpop.f32.mrb[32].mxu1 }
 0x472   : > { %v3412_v6 = vadd.f32 %v3411_v28, %v3324_v56  ;;  %v6642_v26 = vpop.f32.mrb[33].mxu1  ;;  %v3348_v56 = vadd.f32 %v9317_v43, %v9330_v58  ;;  %v6936_v43 = vld [vmem:[#allocation5 + $0x204] ss:$16 sps:$4 sm:$0xff]  }
 0x473   : > { %v3414_v10 = vpop.f32.mrb[34].mxu1 }
 0x474   : > { %v3459_v51 = vmax.f32 %v3412_v6, 0.0  ;;  %v3415_v20 = vadd.f32 %v3414_v10, %v3327_v27  ;;  %v6643_v31 = vpop.f32.mrb[35].mxu1 }
 0x475   : > { %v6933_v31 = vld [vmem:[#allocation5 + $0x1e4] ss:$16 sps:$4 sm:$0xff]  }
 0x476   : > { %v3486_v33 = vrot.slane %v3459_v51, 1  ;;  %v3460_v44 = vmax.f32 %v3415_v20, 0.0  ;;  %v6931_v20 = vld [vmem:[#allocation5 + $0x1e0] ss:$16 sps:$4 sm:$0xff]   ;;  %5258 = vmatprep.subr.bf16.mxu1 %v6933_v31 }
 0x477   : > { %5259 = vmatpush1.bf16.msra.mxu1 %v6931_v20 }
 0x478   : > { %v3487_v53 = vsel %vm719_vm0, %v3484_v49, %v3486_v33  ;;  %v3488_v15 = vrot.slane %v3460_v44, 1  ;;  %5269 = vmatprep.subr.bf16.mxu1 %v6936_v43 }
 0x479   : > { %v3522_v0 = vmax.f32 %v3458_v62, %v3487_v53  ;;  %v3419_v42 = vpop.f32.mrb[36].mxu1 }
 0x47a   : > { %v3489_v12 = vsel %vm719_vm0, %v3486_v33, %v3488_v15  ;;  %v3420_v40 = vadd.f32 %v3419_v42, %v3332_v4  ;;  %v6646_v23 = vpop.f32.mrb[37].mxu1 }
 0x47b   : > { %v3523_v36 = vmax.f32 %v3459_v51, %v3489_v12  ;;  %v3422_v54 = vpop.f32.mrb[38].mxu1  ;;  %v3351_v51 = vadd.f32 %v9319_v21, %v9330_v58  ;;  %v6939_v23 = vld [vmem:[#allocation5 + $0x1ac] ss:$16 sps:$4 sm:$0xff]  }
 0x47c   : > { %v3461_v37 = vmax.f32 %v3420_v40, 0.0  ;;  %v3423_v8 = vadd.f32 %v3422_v54, %v3335_v52  ;;  %v6647_v45 = vpop.f32.mrb[39].mxu1  ;;  %v6937_v40 = vld [vmem:[#allocation5 + $0x1a8] ss:$16 sps:$4 sm:$0xff]   ;;  %5418 = vmatprep.subr.bf16.mxu0 %v6939_v23 }
 0x47d   : > { %v3547_v57 = vrot.slane %v3523_v36, 2  ;;  %5419 = vmatpush1.bf16.msra.mxu0 %v6937_v40 }
 0x47e   : > { %v3490_v39 = vrot.slane %v3461_v37, 1  ;;  %v3462_v29 = vmax.f32 %v3423_v8, 0.0 }
 0x480   : > { %v3491_v30 = vsel %vm719_vm0, %v3488_v15, %v3490_v39  ;;  %v3492_v60 = vrot.slane %v3462_v29, 1 }
 0x481   : > { %v3524_v38 = vmax.f32 %v3460_v44, %v3491_v30  ;;  %v3427_v25 = vpop.f32.mrb[40].mxu1 }
 0x482   : > { %v3493_v3 = vsel %vm719_vm0, %v3490_v39, %v3492_v60  ;;  %v3428_v34 = vadd.f32 %v3427_v25, %v3340_v11  ;;  %v6650_v14 = vpop.f32.mrb[41].mxu1 }
 0x483   : > { %v3549_v16 = vrot.slane %v3524_v38, 2  ;;  %v3525_v7 = vmax.f32 %v3461_v37, %v3493_v3  ;;  %v3430_v48 = vpop.f32.mrb[42].mxu1  ;;  %v3359_v3 = vadd.f32 %v9323_v17, %v9330_v58 }
 0x484   : > { %v3463_v9 = vmax.f32 %v3428_v34, 0.0  ;;  %v3431_v47 = vadd.f32 %v3430_v48, %v3343_v61  ;;  %v6651_v35 = vpop.f32.mrb[43].mxu1 }
 0x485   : > { %v3550_v13 = vsel %vm1009_vm1, %v3547_v57, %v3549_v16  ;;  %v3551_v46 = vrot.slane %v3525_v7, 2  ;;  %v3356_v57 = vadd.f32 %v9321_v5, %v9330_v58 }
 0x486   : > { %v3582_v32 = vmax.f32 %v3522_v0, %v3550_v13  ;;  %v3494_v18 = vrot.slane %v3463_v9, 1  ;;  %v3464_v50 = vmax.f32 %v3431_v47, 0.0  ;;  %v6946_v13 = vld [vmem:[#allocation5 + $0x1c8] ss:$16 sps:$4 sm:$0xff]  }
 0x487   : > { %v3552_v63 = vsel %vm1009_vm1, %v3549_v16, %v3551_v46 }
 0x488   : > { %3594 = vst.msk [vmem:[#allocation4 + $0x8] sm:$0xff] %vm1683_vm15, %v3582_v32  ;;  %v3583_v62 = vmax.f32 %v3523_v36, %v3552_v63  ;;  %v3495_v49 = vsel %vm719_vm0, %v3492_v60, %v3494_v18  ;;  %v3496_v2 = vrot.slane %v3464_v50, 1  ;;  %v3364_v63 = vadd.f32 %v9325_v1, %v9330_v58 }
 0x489   : > { %v3526_v28 = vmax.f32 %v3462_v29, %v3495_v49  ;;  %v3435_v6 = vpop.f32.mrb[44].mxu1 }
 0x48a   : > { %3595 = vst.msk [vmem:[#allocation4 + $0x10] sm:$0xff] %vm1683_vm15, %v3583_v62  ;;  %v3497_v26 = vsel %vm719_vm0, %v3494_v18, %v3496_v2  ;;  %v3436_v27 = vadd.f32 %v3435_v6, %v3348_v56  ;;  %v6654_v10 = vpop.f32.mrb[45].mxu1 }
 0x48b   : > { %v3553_v33 = vrot.slane %v3526_v28, 2  ;;  %v3527_v44 = vmax.f32 %v3463_v9, %v3497_v26  ;;  %v3438_v53 = vpop.f32.mrb[46].mxu1  ;;  %v6954_v10 = vld [vmem:[#allocation5 + $0x1ec] ss:$16 sps:$4 sm:$0xff]  }
 0x48c   : > { %v3465_v15 = vmax.f32 %v3436_v27, 0.0  ;;  %v3439_v4 = vadd.f32 %v3438_v53, %v3351_v51  ;;  %v6655_v0 = vpop.f32.mrb[47].mxu1  ;;  %v6952_v27 = vld [vmem:[#allocation5 + $0x1e8] ss:$16 sps:$4 sm:$0xff]  }
 0x48d   : > { %v3554_v42 = vsel %vm1009_vm1, %v3551_v46, %v3553_v33  ;;  %v3555_v12 = vrot.slane %v3527_v44, 2  ;;  %v6948_v46 = vld [vmem:[#allocation5 + $0x1cc] ss:$16 sps:$4 sm:$0xff]  }
 0x48e   : > { %v3584_v52 = vmax.f32 %v3524_v38, %v3554_v42  ;;  %v3498_v36 = vrot.slane %v3465_v15, 1  ;;  %v3466_v54 = vmax.f32 %v3439_v4, 0.0  ;;  %5420 = vmatprep.subr.bf16.mxu0 %v6948_v46  ;;  %v6945_v46 = vld [vmem:[#allocation5 + $0x244] ss:$16 sps:$4 sm:$0xff]  }
 0x48f   : > { %v3556_v21 = vsel %vm1009_vm1, %v3553_v33, %v3555_v12  ;;  %v3607_v30 = vld [vmem:[#allocation4 + $0xd] sm:$0x1]  ;;  %5421 = vmatpush1.bf16.msra.mxu0 %v6946_v13 }
 0x490   : > { %3596 = vst.msk [vmem:[#allocation4 + $0x18] sm:$0xff] %vm1683_vm15, %v3584_v52  ;;  %v3585_v37 = vmax.f32 %v3525_v7, %v3556_v21  ;;  %v3499_v8 = vsel %vm719_vm0, %v3496_v2, %v3498_v36  ;;  %v3500_v45 = vrot.slane %v3466_v54, 1  ;;  %5422 = vmatprep.subr.bf16.mxu0 %v6954_v10  ;;  %v6955_v10 = vld [vmem:[#allocation5 + $0x280] ss:$16 sps:$4 sm:$0xff]  }
 0x491   : > { %v3528_v39 = vmax.f32 %v3464_v50, %v3499_v8  ;;  %v3443_v29 = vpop.f32.mrb[48].mxu1  ;;  %v3609_v60 = vld [vmem:[#allocation4 + $0x11] sm:$0x1] }
 0x492   : > { %3597 = vst.msk [vmem:[#allocation4 + $0x20] sm:$0xff] %vm1683_vm15, %v3585_v37  ;;  %v3501_v11 = vsel %vm719_vm0, %v3498_v36, %v3500_v45  ;;  %v3444_v38 = vadd.f32 %v3443_v29, %v3356_v57  ;;  %v6658_v25 = vpop.f32.mrb[49].mxu1  ;;  %v6757_v34 = vpack.i.bf16 %v3607_v30, %v3609_v60  ;;  %v715_v37 = vpop.permute.xlu1 %714  ;;  %v3606_v30 = vld [vmem:[#allocation4 + $0xb] sm:$0x1] }
 0x493   : > { %v3557_v14 = vrot.slane %v3528_v39, 2  ;;  %v3529_v61 = vmax.f32 %v3465_v15, %v3501_v11  ;;  %v3446_v16 = vpop.f32.mrb[50].mxu1  ;;  %5423 = vmatpush1.bf16.msra.mxu0 %v6952_v27  ;;  %v3608_v11 = vld [vmem:[#allocation4 + $0xf] sm:$0x1]  ;;  %v6957_v27 = vld [vmem:[#allocation5 + $0x284] ss:$16 sps:$4 sm:$0xff]  }
 0x494   : > { %v3467_v7 = vmax.f32 %v3444_v38, 0.0  ;;  %v3447_v5 = vadd.f32 %v3446_v16, %v3359_v3  ;;  %6758 = vrot.lane.b32.xlu0 %v6757_v34, %s7382_s28  ;;  %v6659_v48 = vpop.f32.mrb[51].mxu1 }
 0x495   : > { %v3559_v9 = vrot.slane %v3529_v61, 2 }
 0x496   : > { %v3502_v47 = vrot.slane %v3467_v7, 1  ;;  %v3468_v35 = vmax.f32 %v3447_v5, 0.0  ;;  %v861_v8 = vpop.permute.xlu1 %860 }
 0x497   : > { %v3560_v32 = vsel %vm1009_vm1, %v3557_v14, %v3559_v9 }
 0x498   : > { %v3587_v18 = vmax.f32 %v3527_v44, %v3560_v32  ;;  %v3503_v50 = vsel %vm719_vm0, %v3500_v45, %v3502_v47  ;;  %v3504_v17 = vrot.slane %v3468_v35, 1  ;;  %801 = vrot.lane.b32.xlu0 %v759_v55, %s9625_s22  ;;  %v6921_v45 = vld [vmem:[%s7529_s23 + $0xa0] ss:$0 sps:$4 sm:$0x33]   ;;  %s339_s22 = scalar_lea.vmem [#allocation8], %s338_s29 }
 0x499   : > { %v3530_v62 = vmax.f32 %v3466_v54, %v3503_v50  ;;  %v3451_v49 = vpop.f32.mrb[52].mxu1  ;;  %v3611_v2 = vld [vmem:[#allocation4 + $0x21] sm:$0x1]  ;;  %v3613_v56 = vld [vmem:[#allocation4 + $0x25] sm:$0x1]  ;;  %v1424_v29 = vsel %vm1381_vm8, %v6921_v45, %v715_v37  ;;  %vm9630_vm8 = vcmask 457728  }
 0x49a   : > { %3599 = vst.msk [vmem:[#allocation4 + $0x30] sm:$0xff] %vm1683_vm15, %v3587_v18  ;;  %v3505_v28 = vsel %vm719_vm0, %v3502_v47, %v3504_v17  ;;  %v3452_v6 = vadd.f32 %v3451_v49, %v3364_v63  ;;  %v6762_v26 = vpack.i.bf16 %v3611_v2, %v3613_v56  ;;  %v6662_v55 = vpop.f32.mrb[53].mxu1  ;;  %v1092_v59 = vpop.permute.xlu1 %1091  ;;  %v6940_v47 = vld [vmem:[#allocation5 + $0x220] ss:$16 sps:$4 sm:$0xff]   ;;  %v6951_v2 = vld [vmem:[#allocation5 + $0x264] ss:$16 sps:$4 sm:$0xff]  }
 0x49b   : > { %v3561_v51 = vrot.slane %v3530_v62, 2  ;;  %v3531_v24 = vmax.f32 %v3467_v7, %v3505_v28  ;;  %v3454_v1 = vpop.f32.mrb[54].mxu1  ;;  %v6942_v7 = vld [vmem:[#allocation5 + $0x224] ss:$16 sps:$4 sm:$0xff]   ;;  %v3612_v18 = vld [vmem:[#allocation4 + $0x23] sm:$0x1] }
 0x49c   : > { %v3469_v20 = vmax.f32 %v3452_v6, 0.0  ;;  %1004 = vrot.lane.b32.xlu0 %v8431_v41, %s7385_s24  ;;  %6763 = vrot.lane.b32.xlu1 %v6762_v26, %s7382_s28  ;;  %v6663_v33 = vpop.f32.mrb[55].mxu1  ;;  %v6960_v41 = vld [vmem:[#allocation5 + $0x20c] ss:$16 sps:$4 sm:$0xff]   ;;  %v6943_v63 = vld [vmem:[#allocation5 + $0x240] ss:$16 sps:$4 sm:$0xff]   ;;  %s9534_s24 = scalar_lea.hbm %s9585_s9, %s6392_s14 }
 0x49d   : > { %v3562_v58 = vsel %vm1009_vm1, %v3559_v9, %v3561_v51  ;;  %v3563_v31 = vrot.slane %v3531_v24, 2  ;;  %5433 = vmatprep.subr.bf16.mxu0 %v6960_v41  ;;  %v6949_v6 = vld [vmem:[#allocation5 + $0x260] ss:$16 sps:$4 sm:$0xff]   ;;  %v6958_v24 = vld [vmem:[#allocation5 + $0x208] ss:$16 sps:$4 sm:$0xff]  }
 0x49e   : > { %v3588_v44 = vmax.f32 %v3528_v39, %v3562_v58  ;;  %v3506_v53 = vrot.slane %v3469_v20, 1  ;;  %v1293_v60 = vpop.permute.xlu1 %1292  ;;  %v6961_v55 = vld [vmem:[#allocation5 + $0x2a0] ss:$16 sps:$4 sm:$0xff]   ;;  %v6966_v20 = vld [vmem:[#allocation5 + $0x22c] ss:$16 sps:$4 sm:$0xff]  }
 0x49f   : > { %v3564_v15 = vsel %vm1009_vm1, %v3561_v51, %v3563_v31  ;;  %v6963_v51 = vld [vmem:[#allocation5 + $0x2a4] ss:$16 sps:$4 sm:$0xff]   ;;  %v6964_v58 = vld [vmem:[#allocation5 + $0x228] ss:$16 sps:$4 sm:$0xff]   ;;  %v6972_v33 = vld [vmem:[#allocation5 + $0x24c] ss:$16 sps:$4 sm:$0xff]  }
 0x4a0   : > { %3600 = vst.msk [vmem:[#allocation4 + $0x38] sm:$0xff] %vm1683_vm15, %v3588_v44  ;;  %v3589_v4 = vmax.f32 %v3529_v61, %v3564_v15  ;;  %v3507_v0 = vsel %vm719_vm0, %v3504_v17, %v3506_v53  ;;  %1148 = vrot.lane.b32.xlu0 %v8473_v19, %s9626_s16  ;;  %v6934_v61 = vld [vmem:[#allocation5 + $0x200] ss:$16 sps:$4 sm:$0xff]   ;;  %vm9627_vm0 = vcmask 130048   ;;  %v6969_v1 = vld [vmem:[#allocation5 + $0x2c4] ss:$16 sps:$4 sm:$0xff]  }
 0x4a1   : > { %v3532_v43 = vmax.f32 %v3468_v35, %v3507_v0  ;;  %v3615_v23 = vld [vmem:[#allocation4 + $0x35] sm:$0x1]  ;;  %v6970_v53 = vld [vmem:[#allocation5 + $0x248] ss:$16 sps:$4 sm:$0xff]   ;;  %v6973_v15 = vld [vmem:[#allocation5 + $0x2e0] ss:$16 sps:$4 sm:$0xff]  }
 0x4a2   : > { %3601 = vst.msk [vmem:[#allocation4 + $0x40] sm:$0xff] %vm1683_vm15, %v3589_v4  ;;  %v6975_v44 = vld [vmem:[#allocation5 + $0x2e4] ss:$16 sps:$4 sm:$0xff]   ;;  %v6978_v4 = vld [vmem:[#allocation5 + $0x26c] ss:$16 sps:$4 sm:$0xff]   ;;  %s5915_s16 = sshll.u32 %s339_s22, 4  ;;  %s9536_s16 = int_to_ptr.vmem [resolvable:$true] %s5915_s16 }
 0x4a3   : > { %v3565_v42 = vrot.slane %v3532_v43, 2  ;;  %v6981_v0 = vld [vmem:[#allocation5 + $0x304] ss:$16 sps:$4 sm:$0xff]   ;;  %v6976_v41 = vld [vmem:[#allocation5 + $0x268] ss:$16 sps:$4 sm:$0xff]   ;;  %s7306_s13 = scalar_lea.vmem %s9536_s16, 16  ;;  %p7313_p2 = scmp.lt.s32.totalorder %s9536_s16, %s7311_s26 }
 0x4a4   : > { %1379 = vrot.lane.b32.xlu0 %v1337_v22, %s7382_s28  ;;  %v6979_v43 = vld [vmem:[#allocation5 + $0x300] ss:$16 sps:$4 sm:$0xff]   ;;  %v6999_v37 = vld [vmem:[#allocation5 + $0x364] ss:$16 sps:$4 sm:$0xff]   ;;  %v7002_v45 = vld [vmem:[#allocation5 + $0x2ec] ss:$16 sps:$4 sm:$0xff]   ;;  %p7307_p6 = scmp.ne.s32.totalorder %s9536_s16, %s7306_s13  ;;  %p7314_p3 = scmp.lt.s32.totalorder %s7312_s25, %s7306_s13 }
 0x4a5   : > { %v3566_v12 = vsel %vm1009_vm1, %v3563_v31, %v3565_v42  ;;  %vm9628_vm1 = vcmask 195584   ;;  %v6967_v31 = vld [vmem:[#allocation5 + $0x2c0] ss:$16 sps:$4 sm:$0xff]   ;;  %v6984_v42 = vld [vmem:[#allocation5 + $0x28c] ss:$16 sps:$4 sm:$0xff]  }
 0x4a6   : > { %v3590_v40 = vmax.f32 %v3530_v62, %v3566_v12  ;;  %v6987_v12 = vld [vmem:[#allocation5 + $0x324] ss:$16 sps:$4 sm:$0xff]   ;;  %p7308_p10 = pnand %p7307_p6, %p9632_p9  ;;  %p7315_p4 = por %p7314_p3, %p7313_p2 }
 0x4a7   : > { %v3617_v52 = vld [vmem:[#allocation4 + $0x39] sm:$0x1] }
 0x4a8   : > { %3602 = vst.msk [vmem:[#allocation4 + $0x48] sm:$0xff] %vm1683_vm15, %v3590_v40  ;;  %v6767_v36 = vpack.i.bf16 %v3615_v23, %v3617_v52  ;;  %v6982_v40 = vld [vmem:[#allocation5 + $0x288] ss:$16 sps:$4 sm:$0xff]   ;;  %v6985_v23 = vld [vmem:[#allocation5 + $0x320] ss:$16 sps:$4 sm:$0xff]   ;;  %p7309_p12 = pneg %p7308_p10 }
 0x4a9   : > { %v6990_v52 = vld [vmem:[#allocation5 + $0x2ac] ss:$16 sps:$4 sm:$0xff]  }
 0x4aa   : > { %6768 = vrot.lane.b32.xlu0 %v6767_v36, %s7382_s28  ;;  %v6993_v36 = vld [vmem:[#allocation5 + $0x344] ss:$16 sps:$4 sm:$0xff]   ;;  %p7316_p7 = pnand %p7315_p4, %p7309_p12 }
 0x4af   : > { %v3619_v19 = vld [vmem:[#allocation4 + $0x49] sm:$0x1]  ;;  %v3621_v54 = vld [vmem:[#allocation4 + $0x4d] sm:$0x1] }
 0x4b0   : > { %v6772_v21 = vpack.i.bf16 %v3619_v19, %v3621_v54  ;;  %v6988_v19 = vld [vmem:[#allocation5 + $0x2a8] ss:$16 sps:$4 sm:$0xff]   ;;  %v6991_v54 = vld [vmem:[#allocation5 + $0x340] ss:$16 sps:$4 sm:$0xff]  }
 0x4b2   : > { %6773 = vrot.lane.b32.xlu1 %v6772_v21, %s7382_s28  ;;  %v6996_v21 = vld [vmem:[#allocation5 + $0x2cc] ss:$16 sps:$4 sm:$0xff]  }
 0x506   : > { %v6759_v22 = vpop.permute.xlu0 %6758 }
 0x507   : > { %v6761_v57 = vunpack.i.h.bf16 %v6759_v22  ;;  %v6760_v39 = vunpack.i.l.bf16 %v6759_v22  ;;  %v7005_v22 = vld [vmem:[#allocation5 + $0x384] ss:$16 sps:$4 sm:$0xff]  }
 0x509   : > { %v3654_v38 = vsel %vm1683_vm15, %v3606_v30, %v6761_v57  ;;  %v3655_v25 = vsel %vm1683_vm15, %v3608_v11, %v6760_v39  ;;  %v7000_v57 = vld [vmem:[#allocation5 + $0x2e8] ss:$16 sps:$4 sm:$0xff]   ;;  %v7003_v39 = vld [vmem:[#allocation5 + $0x380] ss:$16 sps:$4 sm:$0xff]   ;;  %v7011_v30 = vld [vmem:[#allocation5 + $0x3a4] ss:$16 sps:$4 sm:$0xff]  }
 0x50a   : > { %v3662_v3 = vpack.c.bf16 %v3654_v38, %v3654_v38  ;;  %v802_v34 = vpop.permute.xlu0 %801  ;;  %v3663_v14 = vpack.c.bf16 %v3655_v25, %v3655_v25  ;;  %v7009_v11 = vld [vmem:[#allocation5 + $0x3a0] ss:$16 sps:$4 sm:$0xff]   ;;  %v7014_v38 = vld [vmem:[#allocation5 + $0x32c] ss:$16 sps:$4 sm:$0xff]   ;;  %v7017_v25 = vld [vmem:[#allocation5 + $0x3c4] ss:$16 sps:$4 sm:$0xff]  }
 0x50b   : > { %v1467_v16 = vsel %vm9627_vm0, %v1424_v29, %v802_v34  ;;  %v7008_v29 = vld [vmem:[#allocation5 + $0x30c] ss:$16 sps:$4 sm:$0xff]  }
 0x50c   : > { %5260 = vmatprep.mubr.bf16.mxu1 %v3663_v14  ;;  %v1510_v5 = vsel %vm9628_vm1, %v1467_v16, %v861_v8  ;;  %v6994_v8 = vld [vmem:[#allocation5 + $0x2c8] ss:$16 sps:$4 sm:$0xff]   ;;  %v7023_v16 = vld [vmem:[#allocation5 + $0x3e4] ss:$16 sps:$4 sm:$0xff]  }
 0x50d   : > { %5261 = vmatmul.mubr.bf16.vlgmr.msra.gmra.mrb[56].mxu1 %v3662_v3 }
 0x50e   : > { %5270 = vmatpush1.bf16.msra.mxu1 %v6934_v61  ;;  %v1005_v48 = vpop.permute.xlu0 %1004  ;;  %v9403_v9 = vpop.permute.xlu1 %6763  ;;  %v7020_v61 = vld [vmem:[#allocation5 + $0x34c] ss:$16 sps:$4 sm:$0xff]  }
 0x50f   : > { %v1553_v35 = vsel %vm1511_vm11, %v1510_v5, %v1005_v48  ;;  %v6765_v13 = vunpack.i.l.bf16 %v9403_v9  ;;  %5271 = vmatprep.subr.bf16.mxu1 %v6942_v7  ;;  %vm9631_vm11 = vcmask 588800   ;;  %v6766_v7 = vunpack.i.h.bf16 %v9403_v9  ;;  %v7018_v48 = vld [vmem:[#allocation5 + $0x348] ss:$16 sps:$4 sm:$0xff]   ;;  %v7027_v9 = vld [vmem:[#allocation5 + $0x400] ss:$16 sps:$4 sm:$0xff]  }
 0x510   : > { %v1596_v32 = vsel %vm9629_vm7, %v1553_v35, %v1092_v59  ;;  %v6997_v59 = vld [vmem:[#allocation5 + $0x360] ss:$16 sps:$4 sm:$0xff]   ;;  %v7026_v35 = vld [vmem:[#allocation5 + $0x36c] ss:$16 sps:$4 sm:$0xff]  }
 0x511   : > { %v3657_v50 = vsel %vm1683_vm15, %v3612_v18, %v6765_v13  ;;  %v3610_v13 = vld [vmem:[#allocation4 + $0x1f] sm:$0x1]  ;;  %v3616_v18 = vld [vmem:[#allocation4 + $0x37] sm:$0x1] }
 0x512   : > { %5272 = vmatpush1.bf16.msra.mxu1 %v6940_v47  ;;  %v1149_v17 = vpop.permute.xlu0 %1148  ;;  %v3665_v62 = vpack.c.bf16 %v3657_v50, %v3657_v50  ;;  %v7021_v47 = vld [vmem:[#allocation5 + $0x3e0] ss:$16 sps:$4 sm:$0xff]   ;;  %v7024_v50 = vld [vmem:[#allocation5 + $0x368] ss:$16 sps:$4 sm:$0xff]  }
 0x513   : > { %v1639_v49 = vsel %vm1597_vm13, %v1596_v32, %v1149_v17  ;;  %5273 = vmatprep.subr.bf16.mxu1 %v6945_v46  ;;  %v7029_v46 = vld [vmem:[#allocation5 + $0x404] ss:$16 sps:$4 sm:$0xff]   ;;  %v3656_v32 = vsel %vm1683_vm15, %v3610_v13, %v6766_v7  ;;  %v7108_v13 = vld [vmem:[#allocation5 + $0x528] ss:$16 sps:$4 sm:$0xff]  }
 0x514   : > { %5301 = vmatprep.mubr.bf16.mxu1 %v3665_v62  ;;  %v1682_v56 = vsel %vm9630_vm8, %v1639_v49, %v1293_v60  ;;  %v7006_v60 = vld [vmem:[#allocation5 + $0x308] ss:$16 sps:$4 sm:$0xff]   ;;  %v7035_v49 = vld [vmem:[#allocation5 + $0x424] ss:$16 sps:$4 sm:$0xff]  }
 0x515   : > { %v7107_v7 = vld [vmem:[#allocation5 + $0x5a4] ss:$16 sps:$4 sm:$0xff]  }
 0x516   : > { %5274 = vmatpush1.bf16.msra.mxu1 %v6943_v63  ;;  %v1380_v28 = vpop.permute.xlu0 %1379  ;;  %v3664_v63 = vpack.c.bf16 %v3656_v32, %v3656_v32  ;;  %v7111_v32 = vld [vmem:[#allocation5 + $0x5c0] ss:$16 sps:$4 sm:$0xff]  }
 0x517   : > { %v1725_v26 = vsel %vm1683_vm15, %v1682_v56, %v1380_v28  ;;  %5275 = vmatprep.subr.bf16.mxu1 %v6951_v2  ;;  %v7030_v56 = vld [vmem:[#allocation5 + $0x388] ss:$16 sps:$4 sm:$0xff]   ;;  %v7033_v28 = vld [vmem:[#allocation5 + $0x420] ss:$16 sps:$4 sm:$0xff]  }
 0x518   : > { %6629 = vmatmul.mubr.msk.bf16.gmra.mrb[80].mxu0 %vm9631_vm11, %v1725_v26  ;;  %v7041_v26 = vld [vmem:[#allocation5 + $0x444] ss:$16 sps:$4 sm:$0xff]  }
 0x519   : > { %5424 = vmatprep.mubr.bf16.mxu0 %v3663_v14  ;;  %v7015_v14 = vld [vmem:[#allocation5 + $0x3c0] ss:$16 sps:$4 sm:$0xff]  }
 0x51a   : > { %5276 = vmatpush1.bf16.msra.mxu1 %v6949_v6  ;;  %v7038_v6 = vld [vmem:[#allocation5 + $0x3ac] ss:$16 sps:$4 sm:$0xff]  }
 0x51b   : > { %5277 = vmatprep.subr.bf16.mxu1 %v6957_v27  ;;  %v7036_v27 = vld [vmem:[#allocation5 + $0x3a8] ss:$16 sps:$4 sm:$0xff]  }
 0x51c   : > { %v9413_v34 = vpop.permute.xlu0 %6768 }
 0x51d   : > { %v6770_v5 = vunpack.i.l.bf16 %v9413_v34 }
 0x51e   : > { %5278 = vmatpush1.bf16.msra.mxu1 %v6955_v10  ;;  %v7039_v10 = vld [vmem:[#allocation5 + $0x440] ss:$16 sps:$4 sm:$0xff]  }
 0x51f   : > { %5279 = vmatprep.subr.bf16.mxu1 %v6963_v51  ;;  %v3659_v17 = vsel %vm1683_vm15, %v3616_v18, %v6770_v5  ;;  %v7044_v51 = vld [vmem:[#allocation5 + $0x3cc] ss:$16 sps:$4 sm:$0xff]   ;;  %v7102_v5 = vld [vmem:[#allocation5 + $0x508] ss:$16 sps:$4 sm:$0xff]  }
 0x520   : > { %5425 = vmatmul.mubr.bf16.vlgmr.msra.gmra.mrb[84].mxu0 %v3662_v3  ;;  %v7012_v3 = vld [vmem:[#allocation5 + $0x328] ss:$16 sps:$4 sm:$0xff]   ;;  %v3667_v2 = vpack.c.bf16 %v3659_v17, %v3659_v17  ;;  %v7116_v18 = vld [vmem:[#allocation5 + $0x54c] ss:$16 sps:$4 sm:$0xff]   ;;  %v6771_v17 = vunpack.i.h.bf16 %v9413_v34  ;;  %v7123_v34 = vld [vmem:[#allocation5 + $0x600] ss:$16 sps:$4 sm:$0xff]  }
 0x521   : > { %5434 = vmatpush1.bf16.msra.mxu0 %v6958_v24  ;;  %5465 = vmatprep.mubr.bf16.mxu0 %v3665_v62  ;;  %v7032_v62 = vld [vmem:[#allocation5 + $0x38c] ss:$16 sps:$4 sm:$0xff]   ;;  %v7047_v24 = vld [vmem:[#allocation5 + $0x464] ss:$16 sps:$4 sm:$0xff]  }
 0x522   : > { %5280 = vmatpush1.bf16.msra.mxu1 %v6961_v55  ;;  %5435 = vmatprep.subr.bf16.mxu0 %v6966_v20  ;;  %v7042_v55 = vld [vmem:[#allocation5 + $0x3c8] ss:$16 sps:$4 sm:$0xff]   ;;  %v7045_v20 = vld [vmem:[#allocation5 + $0x460] ss:$16 sps:$4 sm:$0xff]  }
 0x523   : > { %5281 = vmatprep.subr.bf16.mxu1 %v6969_v1  ;;  %v7050_v1 = vld [vmem:[#allocation5 + $0x3ec] ss:$16 sps:$4 sm:$0xff]  }
 0x525   : > { %5436 = vmatpush1.bf16.msra.mxu0 %v6964_v58  ;;  %v7053_v58 = vld [vmem:[#allocation5 + $0x484] ss:$16 sps:$4 sm:$0xff]  }
 0x526   : > { %5282 = vmatpush1.bf16.msra.mxu1 %v6967_v31  ;;  %5437 = vmatprep.subr.bf16.mxu0 %v6972_v33  ;;  %v7048_v31 = vld [vmem:[#allocation5 + $0x3e8] ss:$16 sps:$4 sm:$0xff]   ;;  %v7051_v33 = vld [vmem:[#allocation5 + $0x480] ss:$16 sps:$4 sm:$0xff]  }
 0x527   : > { %5283 = vmatprep.subr.bf16.mxu1 %v6975_v44  ;;  %v7056_v44 = vld [vmem:[#allocation5 + $0x40c] ss:$16 sps:$4 sm:$0xff]  }
 0x529   : > { %5438 = vmatpush1.bf16.msra.mxu0 %v6970_v53  ;;  %v7059_v53 = vld [vmem:[#allocation5 + $0x4a4] ss:$16 sps:$4 sm:$0xff]  }
 0x52a   : > { %5284 = vmatpush1.bf16.msra.mxu1 %v6973_v15  ;;  %5439 = vmatprep.subr.bf16.mxu0 %v6978_v4  ;;  %v7054_v15 = vld [vmem:[#allocation5 + $0x408] ss:$16 sps:$4 sm:$0xff]   ;;  %v7057_v4 = vld [vmem:[#allocation5 + $0x4a0] ss:$16 sps:$4 sm:$0xff]  }
 0x52b   : > { %5285 = vmatprep.subr.bf16.mxu1 %v6981_v0  ;;  %v7062_v0 = vld [vmem:[#allocation5 + $0x42c] ss:$16 sps:$4 sm:$0xff]  }
 0x52d   : > { %5440 = vmatpush1.bf16.msra.mxu0 %v6976_v41  ;;  %v7065_v41 = vld [vmem:[#allocation5 + $0x4c4] ss:$16 sps:$4 sm:$0xff]  }
 0x52e   : > { %5286 = vmatpush1.bf16.msra.mxu1 %v6979_v43  ;;  %5441 = vmatprep.subr.bf16.mxu0 %v6984_v42  ;;  %v7060_v43 = vld [vmem:[#allocation5 + $0x428] ss:$16 sps:$4 sm:$0xff]   ;;  %v7063_v42 = vld [vmem:[#allocation5 + $0x4c0] ss:$16 sps:$4 sm:$0xff]  }
 0x52f   : > { %5287 = vmatprep.subr.bf16.mxu1 %v6987_v12  ;;  %v7068_v12 = vld [vmem:[#allocation5 + $0x44c] ss:$16 sps:$4 sm:$0xff]  }
 0x531   : > { %5442 = vmatpush1.bf16.msra.mxu0 %v6982_v40  ;;  %v7071_v40 = vld [vmem:[#allocation5 + $0x4e4] ss:$16 sps:$4 sm:$0xff]  }
 0x532   : > { %5288 = vmatpush1.bf16.msra.mxu1 %v6985_v23  ;;  %5443 = vmatprep.subr.bf16.mxu0 %v6990_v52  ;;  %v7066_v23 = vld [vmem:[#allocation5 + $0x448] ss:$16 sps:$4 sm:$0xff]   ;;  %v7069_v52 = vld [vmem:[#allocation5 + $0x4e0] ss:$16 sps:$4 sm:$0xff]  }
 0x533   : > { %5289 = vmatprep.subr.bf16.mxu1 %v6993_v36  ;;  %v7074_v36 = vld [vmem:[#allocation5 + $0x46c] ss:$16 sps:$4 sm:$0xff]  }
 0x535   : > { %5444 = vmatpush1.bf16.msra.mxu0 %v6988_v19  ;;  %v7077_v19 = vld [vmem:[#allocation5 + $0x504] ss:$16 sps:$4 sm:$0xff]  }
 0x536   : > { %5290 = vmatpush1.bf16.msra.mxu1 %v6991_v54  ;;  %5445 = vmatprep.subr.bf16.mxu0 %v6996_v21  ;;  %v7072_v54 = vld [vmem:[#allocation5 + $0x468] ss:$16 sps:$4 sm:$0xff]   ;;  %v7075_v21 = vld [vmem:[#allocation5 + $0x500] ss:$16 sps:$4 sm:$0xff]  }
 0x537   : > { %5291 = vmatprep.subr.bf16.mxu1 %v6999_v37  ;;  %v7080_v37 = vld [vmem:[#allocation5 + $0x48c] ss:$16 sps:$4 sm:$0xff]  }
 0x539   : > { %5446 = vmatpush1.bf16.msra.mxu0 %v6994_v8  ;;  %v7083_v8 = vld [vmem:[#allocation5 + $0x524] ss:$16 sps:$4 sm:$0xff]  }
 0x53a   : > { %5292 = vmatpush1.bf16.msra.mxu1 %v6997_v59  ;;  %5447 = vmatprep.subr.bf16.mxu0 %v7002_v45  ;;  %v7078_v59 = vld [vmem:[#allocation5 + $0x488] ss:$16 sps:$4 sm:$0xff]   ;;  %v7081_v45 = vld [vmem:[#allocation5 + $0x520] ss:$16 sps:$4 sm:$0xff]  }
 0x53b   : > { %5293 = vmatprep.subr.bf16.mxu1 %v7005_v22  ;;  %v7086_v22 = vld [vmem:[#allocation5 + $0x4ac] ss:$16 sps:$4 sm:$0xff]  }
 0x53d   : > { %5448 = vmatpush1.bf16.msra.mxu0 %v7000_v57  ;;  %v7089_v57 = vld [vmem:[#allocation5 + $0x544] ss:$16 sps:$4 sm:$0xff]  }
 0x53e   : > { %5294 = vmatpush1.bf16.msra.mxu1 %v7003_v39  ;;  %5449 = vmatprep.subr.bf16.mxu0 %v7008_v29  ;;  %v7084_v39 = vld [vmem:[#allocation5 + $0x4a8] ss:$16 sps:$4 sm:$0xff]   ;;  %v7087_v29 = vld [vmem:[#allocation5 + $0x540] ss:$16 sps:$4 sm:$0xff]  }
 0x53f   : > { %5295 = vmatprep.subr.bf16.mxu1 %v7011_v30  ;;  %v7092_v30 = vld [vmem:[#allocation5 + $0x4cc] ss:$16 sps:$4 sm:$0xff]  }
 0x541   : > { %5450 = vmatpush1.bf16.msra.mxu0 %v7006_v60  ;;  %v7095_v60 = vld [vmem:[#allocation5 + $0x564] ss:$16 sps:$4 sm:$0xff]  }
 0x542   : > { %5296 = vmatpush1.bf16.msra.mxu1 %v7009_v11  ;;  %5451 = vmatprep.subr.bf16.mxu0 %v7014_v38  ;;  %v7090_v11 = vld [vmem:[#allocation5 + $0x4c8] ss:$16 sps:$4 sm:$0xff]   ;;  %v7093_v38 = vld [vmem:[#allocation5 + $0x560] ss:$16 sps:$4 sm:$0xff]  }
 0x543   : > { %5297 = vmatprep.subr.bf16.mxu1 %v7017_v25  ;;  %v7098_v25 = vld [vmem:[#allocation5 + $0x4ec] ss:$16 sps:$4 sm:$0xff]  }
 0x545   : > { %5452 = vmatpush1.bf16.msra.mxu0 %v7012_v3  ;;  %v7101_v3 = vld [vmem:[#allocation5 + $0x584] ss:$16 sps:$4 sm:$0xff]  }
 0x546   : > { %5298 = vmatpush1.bf16.msra.mxu1 %v7015_v14  ;;  %5453 = vmatprep.subr.bf16.mxu0 %v7020_v61  ;;  %v7096_v14 = vld [vmem:[#allocation5 + $0x4e8] ss:$16 sps:$4 sm:$0xff]   ;;  %v7099_v61 = vld [vmem:[#allocation5 + $0x580] ss:$16 sps:$4 sm:$0xff]  }
 0x547   : > { %5299 = vmatprep.subr.bf16.mxu1 %v7023_v16  ;;  %v7104_v16 = vld [vmem:[#allocation5 + $0x50c] ss:$16 sps:$4 sm:$0xff]  }
 0x549   : > { %5454 = vmatpush1.bf16.msra.mxu0 %v7018_v48  ;;  %v7105_v48 = vld [vmem:[#allocation5 + $0x5a0] ss:$16 sps:$4 sm:$0xff]  }
 0x54a   : > { %5300 = vmatpush1.bf16.msra.mxu1 %v7021_v47  ;;  %5455 = vmatprep.subr.bf16.mxu0 %v7026_v35  ;;  %v7110_v47 = vld [vmem:[#allocation5 + $0x52c] ss:$16 sps:$4 sm:$0xff]   ;;  %v7113_v35 = vld [vmem:[#allocation5 + $0x5c4] ss:$16 sps:$4 sm:$0xff]  }
 0x54b   : > { %5310 = vmatprep.subr.bf16.mxu1 %v7029_v46  ;;  %v9419_v46 = vpop.permute.xlu1 %6773 }
 0x54d   : > { %5302 = vmatmul.mubr.bf16.vlgmr.msra.gmra.mrb[56].mxu1 %v3664_v63  ;;  %5456 = vmatpush1.bf16.msra.mxu0 %v7024_v50  ;;  %v7119_v50 = vld [vmem:[#allocation5 + $0x5e4] ss:$16 sps:$4 sm:$0xff]  }
 0x54e   : > { %5311 = vmatpush1.bf16.msra.mxu1 %v7027_v9  ;;  %5342 = vmatprep.mubr.bf16.mxu1 %v3667_v2  ;;  %v6775_v9 = vunpack.i.l.bf16 %v9419_v46 }
 0x54f   : > { %5457 = vmatprep.subr.bf16.mxu0 %v7032_v62  ;;  %5312 = vmatprep.subr.bf16.mxu1 %v7035_v49  ;;  %v7117_v62 = vld [vmem:[#allocation5 + $0x5e0] ss:$16 sps:$4 sm:$0xff]   ;;  %v7122_v49 = vld [vmem:[#allocation5 + $0x56c] ss:$16 sps:$4 sm:$0xff]  }
 0x551   : > { %5458 = vmatpush1.bf16.msra.mxu0 %v7030_v56  ;;  %v7125_v56 = vld [vmem:[#allocation5 + $0x604] ss:$16 sps:$4 sm:$0xff]  }
 0x552   : > { %5313 = vmatpush1.bf16.msra.mxu1 %v7033_v28  ;;  %5459 = vmatprep.subr.bf16.mxu0 %v7038_v6  ;;  %v3620_v6 = vld [vmem:[#allocation4 + $0x4b] sm:$0x1] }
 0x553   : > { %5314 = vmatprep.subr.bf16.mxu1 %v7041_v26  ;;  %v7120_v26 = vld [vmem:[#allocation5 + $0x568] ss:$16 sps:$4 sm:$0xff]  }
 0x555   : > { %5460 = vmatpush1.bf16.msra.mxu0 %v7036_v27  ;;  %v3661_v27 = vsel %vm1683_vm15, %v3620_v6, %v6775_v9  ;;  %v7198_v9 = vld [vmem:[#allocation5 + $0x708] ss:$16 sps:$4 sm:$0xff]   ;;  %v7215_v6 = vld [vmem:[#allocation5 + $0x7e4] ss:$16 sps:$4 sm:$0xff]  }
 0x556   : > { %5315 = vmatpush1.bf16.msra.mxu1 %v7039_v10  ;;  %5461 = vmatprep.subr.bf16.mxu0 %v7044_v51  ;;  %v7128_v51 = vld [vmem:[#allocation5 + $0x58c] ss:$16 sps:$4 sm:$0xff]  }
 0x557   : > { %5316 = vmatprep.subr.bf16.mxu1 %v7047_v24  ;;  %v7131_v24 = vld [vmem:[#allocation5 + $0x624] ss:$16 sps:$4 sm:$0xff]  }
 0x559   : > { %5462 = vmatpush1.bf16.msra.mxu0 %v7042_v55  ;;  %v3669_v55 = vpack.c.bf16 %v3661_v27, %v3661_v27  ;;  %v7210_v27 = vld [vmem:[#allocation5 + $0x748] ss:$16 sps:$4 sm:$0xff]  }
 0x55a   : > { %5317 = vmatpush1.bf16.msra.mxu1 %v7045_v20  ;;  %5463 = vmatprep.subr.bf16.mxu0 %v7050_v1  ;;  %v7126_v20 = vld [vmem:[#allocation5 + $0x588] ss:$16 sps:$4 sm:$0xff]   ;;  %v7129_v1 = vld [vmem:[#allocation5 + $0x620] ss:$16 sps:$4 sm:$0xff]  }
 0x55b   : > { %5318 = vmatprep.subr.bf16.mxu1 %v7053_v58  ;;  %v7134_v58 = vld [vmem:[#allocation5 + $0x5ac] ss:$16 sps:$4 sm:$0xff]  }
 0x55d   : > { %5464 = vmatpush1.bf16.msra.mxu0 %v7048_v31  ;;  %v7137_v31 = vld [vmem:[#allocation5 + $0x644] ss:$16 sps:$4 sm:$0xff]  }
 0x55e   : > { %5319 = vmatpush1.bf16.msra.mxu1 %v7051_v33  ;;  %5474 = vmatprep.subr.bf16.mxu0 %v7056_v44  ;;  %v7132_v33 = vld [vmem:[#allocation5 + $0x5a8] ss:$16 sps:$4 sm:$0xff]   ;;  %v7135_v44 = vld [vmem:[#allocation5 + $0x640] ss:$16 sps:$4 sm:$0xff]  }
 0x55f   : > { %5320 = vmatprep.subr.bf16.mxu1 %v7059_v53  ;;  %v7140_v53 = vld [vmem:[#allocation5 + $0x5cc] ss:$16 sps:$4 sm:$0xff]  }
 0x560   : > { %5466 = vmatmul.mubr.bf16.vlgmr.msra.gmra.mrb[84].mxu0 %v3664_v63  ;;  %v7114_v63 = vld [vmem:[#allocation5 + $0x548] ss:$16 sps:$4 sm:$0xff]  }
 0x561   : > { %5475 = vmatpush1.bf16.msra.mxu0 %v7054_v15  ;;  %5506 = vmatprep.mubr.bf16.mxu0 %v3667_v2  ;;  %v3614_v2 = vld [vmem:[#allocation4 + $0x33] sm:$0x1]  ;;  %v7143_v15 = vld [vmem:[#allocation5 + $0x664] ss:$16 sps:$4 sm:$0xff]  }
 0x562   : > { %5321 = vmatpush1.bf16.msra.mxu1 %v7057_v4  ;;  %5476 = vmatprep.subr.bf16.mxu0 %v7062_v0  ;;  %v3658_v28 = vsel %vm1683_vm15, %v3614_v2, %v6771_v17  ;;  %v7138_v4 = vld [vmem:[#allocation5 + $0x5c8] ss:$16 sps:$4 sm:$0xff]   ;;  %v7141_v0 = vld [vmem:[#allocation5 + $0x660] ss:$16 sps:$4 sm:$0xff]   ;;  %v7203_v17 = vld [vmem:[#allocation5 + $0x7a4] ss:$16 sps:$4 sm:$0xff]  }
 0x563   : > { %5322 = vmatprep.subr.bf16.mxu1 %v7065_v41  ;;  %v3666_v10 = vpack.c.bf16 %v3658_v28, %v3658_v28  ;;  %v7146_v41 = vld [vmem:[#allocation5 + $0x5ec] ss:$16 sps:$4 sm:$0xff]   ;;  %v7204_v2 = vld [vmem:[#allocation5 + $0x728] ss:$16 sps:$4 sm:$0xff]  }
 0x564   : > { %v7212_v28 = vld [vmem:[#allocation5 + $0x74c] ss:$16 sps:$4 sm:$0xff]  }
 0x565   : > { %5477 = vmatpush1.bf16.msra.mxu0 %v7060_v43  ;;  %v7149_v43 = vld [vmem:[#allocation5 + $0x684] ss:$16 sps:$4 sm:$0xff]  }
 0x566   : > { %5323 = vmatpush1.bf16.msra.mxu1 %v7063_v42  ;;  %5478 = vmatprep.subr.bf16.mxu0 %v7068_v12  ;;  %v7144_v42 = vld [vmem:[#allocation5 + $0x5e8] ss:$16 sps:$4 sm:$0xff]   ;;  %v7147_v12 = vld [vmem:[#allocation5 + $0x680] ss:$16 sps:$4 sm:$0xff]  }
 0x567   : > { %5324 = vmatprep.subr.bf16.mxu1 %v7071_v40  ;;  %v7152_v40 = vld [vmem:[#allocation5 + $0x60c] ss:$16 sps:$4 sm:$0xff]  }
 0x569   : > { %5479 = vmatpush1.bf16.msra.mxu0 %v7066_v23  ;;  %v7155_v23 = vld [vmem:[#allocation5 + $0x6a4] ss:$16 sps:$4 sm:$0xff]  }
 0x56a   : > { %5325 = vmatpush1.bf16.msra.mxu1 %v7069_v52  ;;  %5480 = vmatprep.subr.bf16.mxu0 %v7074_v36  ;;  %v7150_v52 = vld [vmem:[#allocation5 + $0x608] ss:$16 sps:$4 sm:$0xff]   ;;  %v7153_v36 = vld [vmem:[#allocation5 + $0x6a0] ss:$16 sps:$4 sm:$0xff]  }
 0x56b   : > { %5326 = vmatprep.subr.bf16.mxu1 %v7077_v19  ;;  %v7158_v19 = vld [vmem:[#allocation5 + $0x62c] ss:$16 sps:$4 sm:$0xff]  }
 0x56d   : > { %5481 = vmatpush1.bf16.msra.mxu0 %v7072_v54  ;;  %v7161_v54 = vld [vmem:[#allocation5 + $0x6c4] ss:$16 sps:$4 sm:$0xff]  }
 0x56e   : > { %5327 = vmatpush1.bf16.msra.mxu1 %v7075_v21  ;;  %5482 = vmatprep.subr.bf16.mxu0 %v7080_v37  ;;  %v7156_v21 = vld [vmem:[#allocation5 + $0x628] ss:$16 sps:$4 sm:$0xff]   ;;  %v7159_v37 = vld [vmem:[#allocation5 + $0x6c0] ss:$16 sps:$4 sm:$0xff]  }
 0x56f   : > { %5328 = vmatprep.subr.bf16.mxu1 %v7083_v8  ;;  %v7164_v8 = vld [vmem:[#allocation5 + $0x64c] ss:$16 sps:$4 sm:$0xff]  }
 0x571   : > { %5483 = vmatpush1.bf16.msra.mxu0 %v7078_v59  ;;  %v7167_v59 = vld [vmem:[#allocation5 + $0x6e4] ss:$16 sps:$4 sm:$0xff]  }
 0x572   : > { %5329 = vmatpush1.bf16.msra.mxu1 %v7081_v45  ;;  %5484 = vmatprep.subr.bf16.mxu0 %v7086_v22  ;;  %v7162_v45 = vld [vmem:[#allocation5 + $0x648] ss:$16 sps:$4 sm:$0xff]   ;;  %v7165_v22 = vld [vmem:[#allocation5 + $0x6e0] ss:$16 sps:$4 sm:$0xff]  }
 0x573   : > { %5330 = vmatprep.subr.bf16.mxu1 %v7089_v57  ;;  %v7170_v57 = vld [vmem:[#allocation5 + $0x66c] ss:$16 sps:$4 sm:$0xff]  }
 0x575   : > { %5485 = vmatpush1.bf16.msra.mxu0 %v7084_v39  ;;  %v7173_v39 = vld [vmem:[#allocation5 + $0x704] ss:$16 sps:$4 sm:$0xff]  }
 0x576   : > { %5331 = vmatpush1.bf16.msra.mxu1 %v7087_v29  ;;  %5486 = vmatprep.subr.bf16.mxu0 %v7092_v30  ;;  %v7168_v29 = vld [vmem:[#allocation5 + $0x668] ss:$16 sps:$4 sm:$0xff]   ;;  %v7171_v30 = vld [vmem:[#allocation5 + $0x700] ss:$16 sps:$4 sm:$0xff]  }
 0x577   : > { %5332 = vmatprep.subr.bf16.mxu1 %v7095_v60  ;;  %v7176_v60 = vld [vmem:[#allocation5 + $0x68c] ss:$16 sps:$4 sm:$0xff]  }
 0x579   : > { %5487 = vmatpush1.bf16.msra.mxu0 %v7090_v11  ;;  %v7179_v11 = vld [vmem:[#allocation5 + $0x724] ss:$16 sps:$4 sm:$0xff]  }
 0x57a   : > { %5333 = vmatpush1.bf16.msra.mxu1 %v7093_v38  ;;  %5488 = vmatprep.subr.bf16.mxu0 %v7098_v25  ;;  %v7174_v38 = vld [vmem:[#allocation5 + $0x688] ss:$16 sps:$4 sm:$0xff]   ;;  %v7177_v25 = vld [vmem:[#allocation5 + $0x720] ss:$16 sps:$4 sm:$0xff]  }
 0x57b   : > { %5334 = vmatprep.subr.bf16.mxu1 %v7101_v3  ;;  %v7182_v3 = vld [vmem:[#allocation5 + $0x6ac] ss:$16 sps:$4 sm:$0xff]  }
 0x57d   : > { %5489 = vmatpush1.bf16.msra.mxu0 %v7096_v14  ;;  %v7185_v14 = vld [vmem:[#allocation5 + $0x744] ss:$16 sps:$4 sm:$0xff]  }
 0x57e   : > { %5335 = vmatpush1.bf16.msra.mxu1 %v7099_v61  ;;  %5490 = vmatprep.subr.bf16.mxu0 %v7104_v16  ;;  %v7180_v61 = vld [vmem:[#allocation5 + $0x6a8] ss:$16 sps:$4 sm:$0xff]   ;;  %v7183_v16 = vld [vmem:[#allocation5 + $0x740] ss:$16 sps:$4 sm:$0xff]  }
 0x57f   : > { %5336 = vmatprep.subr.bf16.mxu1 %v7107_v7  ;;  %v7188_v7 = vld [vmem:[#allocation5 + $0x6cc] ss:$16 sps:$4 sm:$0xff]  }
 0x581   : > { %5491 = vmatpush1.bf16.msra.mxu0 %v7102_v5  ;;  %v7191_v5 = vld [vmem:[#allocation5 + $0x764] ss:$16 sps:$4 sm:$0xff]  }
 0x582   : > { %5337 = vmatpush1.bf16.msra.mxu1 %v7105_v48  ;;  %5492 = vmatprep.subr.bf16.mxu0 %v7110_v47  ;;  %v7186_v48 = vld [vmem:[#allocation5 + $0x6c8] ss:$16 sps:$4 sm:$0xff]   ;;  %v7189_v47 = vld [vmem:[#allocation5 + $0x760] ss:$16 sps:$4 sm:$0xff]  }
 0x583   : > { %5338 = vmatprep.subr.bf16.mxu1 %v7113_v35  ;;  %v7194_v35 = vld [vmem:[#allocation5 + $0x6ec] ss:$16 sps:$4 sm:$0xff]  }
 0x585   : > { %5493 = vmatpush1.bf16.msra.mxu0 %v7108_v13  ;;  %v7197_v13 = vld [vmem:[#allocation5 + $0x784] ss:$16 sps:$4 sm:$0xff]  }
 0x586   : > { %5339 = vmatpush1.bf16.msra.mxu1 %v7111_v32  ;;  %5494 = vmatprep.subr.bf16.mxu0 %v7116_v18  ;;  %v7192_v32 = vld [vmem:[#allocation5 + $0x6e8] ss:$16 sps:$4 sm:$0xff]   ;;  %v7195_v18 = vld [vmem:[#allocation5 + $0x780] ss:$16 sps:$4 sm:$0xff]  }
 0x587   : > { %5340 = vmatprep.subr.bf16.mxu1 %v7119_v50  ;;  %v7200_v50 = vld [vmem:[#allocation5 + $0x70c] ss:$16 sps:$4 sm:$0xff]  }
 0x589   : > { %5495 = vmatpush1.bf16.msra.mxu0 %v7114_v63  ;;  %v7201_v63 = vld [vmem:[#allocation5 + $0x7a0] ss:$16 sps:$4 sm:$0xff]  }
 0x58a   : > { %5341 = vmatpush1.bf16.msra.mxu1 %v7117_v62  ;;  %5496 = vmatprep.subr.bf16.mxu0 %v7122_v49  ;;  %v7206_v62 = vld [vmem:[#allocation5 + $0x72c] ss:$16 sps:$4 sm:$0xff]   ;;  %v7209_v49 = vld [vmem:[#allocation5 + $0x7c4] ss:$16 sps:$4 sm:$0xff]  }
 0x58b   : > { %5351 = vmatprep.subr.bf16.mxu1 %v7125_v56  ;;  %v7207_v56 = vld [vmem:[#allocation5 + $0x7c0] ss:$16 sps:$4 sm:$0xff]  }
 0x58d   : > { %5343 = vmatmul.mubr.bf16.vlgmr.msra.gmra.mrb[56].mxu1 %v3666_v10  ;;  %5497 = vmatpush1.bf16.msra.mxu0 %v7120_v26  ;;  %v6776_v26 = vunpack.i.h.bf16 %v9419_v46  ;;  %v7232_v46 = vld [vmem:[%s9583_s7] sm:$0xff]  }
 0x58e   : > { %5352 = vmatpush1.bf16.msra.mxu1 %v7123_v34  ;;  %5383 = vmatprep.mubr.bf16.mxu1 %v3669_v55  ;;  %v7213_v34 = vld [vmem:[#allocation5 + $0x7e0] ss:$16 sps:$4 sm:$0xff]  }
 0x58f   : > { %5498 = vmatprep.subr.bf16.mxu0 %v7128_v51  ;;  %5353 = vmatprep.subr.bf16.mxu1 %v7131_v24  ;;  %v3618_v51 = vld [vmem:[#allocation4 + $0x47] sm:$0x1]  ;;  %v7231_v24 = vld [vmem:[%s9583_s7 + $0x40] sm:$0xff]  }
 0x591   : > { %5499 = vmatpush1.bf16.msra.mxu0 %v7126_v20  ;;  %v7216_v20 = vld [vmem:[#allocation5 + $0x768] ss:$16 sps:$4 sm:$0xff]  }
 0x592   : > { %5354 = vmatpush1.bf16.msra.mxu1 %v7129_v1  ;;  %5500 = vmatprep.subr.bf16.mxu0 %v7134_v58  ;;  %v7221_v1 = vld [vmem:[#allocation5 + $0x78c] ss:$16 sps:$4 sm:$0xff]  }
 0x593   : > { %5355 = vmatprep.subr.bf16.mxu1 %v7137_v31  ;;  %v7233_v31 = vld [vmem:[%s9583_s7 + $0x48] sm:$0xff]  }
 0x595   : > { %5501 = vmatpush1.bf16.msra.mxu0 %v7132_v33  ;;  %v7219_v33 = vld [vmem:[#allocation5 + $0x788] ss:$16 sps:$4 sm:$0xff]  }
 0x596   : > { %5356 = vmatpush1.bf16.msra.mxu1 %v7135_v44  ;;  %5502 = vmatprep.subr.bf16.mxu0 %v7140_v53  ;;  %v7224_v44 = vld [vmem:[#allocation5 + $0x7ac] ss:$16 sps:$4 sm:$0xff]   ;;  %v7234_v53 = vld [vmem:[%s9583_s7 + $0x8] sm:$0xff]  }
 0x597   : > { %5357 = vmatprep.subr.bf16.mxu1 %v7143_v15  ;;  %v7235_v15 = vld [vmem:[%s9583_s7 + $0x50] sm:$0xff]  }
 0x599   : > { %5503 = vmatpush1.bf16.msra.mxu0 %v7138_v4  ;;  %v7222_v4 = vld [vmem:[#allocation5 + $0x7a8] ss:$16 sps:$4 sm:$0xff]  }
 0x59a   : > { %5358 = vmatpush1.bf16.msra.mxu1 %v7141_v0  ;;  %5504 = vmatprep.subr.bf16.mxu0 %v7146_v41  ;;  %v7227_v0 = vld [vmem:[#allocation5 + $0x7cc] ss:$16 sps:$4 sm:$0xff]  }
 0x59b   : > { %5359 = vmatprep.subr.bf16.mxu1 %v7149_v43  ;;  %v7236_v41 = vld [vmem:[%s9583_s7 + $0x10] sm:$0xff]   ;;  %v7237_v43 = vld [vmem:[%s9583_s7 + $0x58] sm:$0xff]  }
 0x59d   : > { %5505 = vmatpush1.bf16.msra.mxu0 %v7144_v42  ;;  %v7225_v42 = vld [vmem:[#allocation5 + $0x7c8] ss:$16 sps:$4 sm:$0xff]  }
 0x59e   : > { %5360 = vmatpush1.bf16.msra.mxu1 %v7147_v12  ;;  %5515 = vmatprep.subr.bf16.mxu0 %v7152_v40  ;;  %v7230_v12 = vld [vmem:[#allocation5 + $0x7ec] ss:$16 sps:$4 sm:$0xff]   ;;  %v7238_v40 = vld [vmem:[%s9583_s7 + $0x18] sm:$0xff]  }
 0x59f   : > { %5361 = vmatprep.subr.bf16.mxu1 %v7155_v23  ;;  %v7239_v23 = vld [vmem:[%s9583_s7 + $0x60] sm:$0xff]  }
 0x5a0   : > { %5507 = vmatmul.mubr.bf16.vlgmr.msra.gmra.mrb[84].mxu0 %v3666_v10  ;;  %v7218_v10 = vld [vmem:[#allocation5 + $0x76c] ss:$16 sps:$4 sm:$0xff]  }
 0x5a1   : > { %5516 = vmatpush1.bf16.msra.mxu0 %v7150_v52  ;;  %5547 = vmatprep.mubr.bf16.mxu0 %v3669_v55  ;;  %v3660_v55 = vsel %vm1683_vm15, %v3618_v51, %v6776_v26  ;;  %v7228_v52 = vld [vmem:[#allocation5 + $0x7e8] ss:$16 sps:$4 sm:$0xff]  }
 0x5a2   : > { %5362 = vmatpush1.bf16.msra.mxu1 %v7153_v36  ;;  %5517 = vmatprep.subr.bf16.mxu0 %v7158_v19  ;;  %v3668_v58 = vpack.c.bf16 %v3660_v55, %v3660_v55  ;;  %v7240_v36 = vld [vmem:[%s9583_s7 + $0x20] sm:$0xff]   ;;  %v7241_v19 = vld [vmem:[%s9583_s7 + $0x68] sm:$0xff]  }
 0x5a3   : > { %5363 = vmatprep.subr.bf16.mxu1 %v7161_v54  ;;  %v7242_v54 = vld [vmem:[%s9583_s7 + $0x28] sm:$0xff]   ;;  %v7255_v26 = vld [vmem:[%s9583_s7 + $0xe0] sm:$0xff]  }
 0x5a5   : > { %5518 = vmatpush1.bf16.msra.mxu0 %v7156_v21 }
 0x5a6   : > { %5364 = vmatpush1.bf16.msra.mxu1 %v7159_v37  ;;  %5519 = vmatprep.subr.bf16.mxu0 %v7164_v8 }
 0x5a7   : > { %5365 = vmatprep.subr.bf16.mxu1 %v7167_v59 }
 0x5a9   : > { %5520 = vmatpush1.bf16.msra.mxu0 %v7162_v45  ;;  %v7243_v45 = vld [vmem:[%s9583_s7 + $0x70] sm:$0xff]  }
 0x5aa   : > { %5366 = vmatpush1.bf16.msra.mxu1 %v7165_v22  ;;  %5521 = vmatprep.subr.bf16.mxu0 %v7170_v57  ;;  %v7244_v22 = vld [vmem:[%s9583_s7 + $0x30] sm:$0xff]   ;;  %v7245_v57 = vld [vmem:[%s9583_s7 + $0x78] sm:$0xff]  }
 0x5ab   : > { %5367 = vmatprep.subr.bf16.mxu1 %v7173_v39  ;;  %v7246_v39 = vld [vmem:[%s9583_s7 + $0x38] sm:$0xff]  }
 0x5ad   : > { %5522 = vmatpush1.bf16.msra.mxu0 %v7168_v29  ;;  %v7247_v29 = vld [vmem:[%s9583_s7 + $0xc0] sm:$0xff]  }
 0x5ae   : > { %5368 = vmatpush1.bf16.msra.mxu1 %v7171_v30  ;;  %5523 = vmatprep.subr.bf16.mxu0 %v7176_v60  ;;  %v5208_v30 = vlaneseq }
 0x5af   : > { %5369 = vmatprep.subr.bf16.mxu1 %v7179_v11 }
 0x5b0   : > { %v5209_v60 = vshrl.u32 %v5208_v30, 7 }
 0x5b1   : > { %5524 = vmatpush1.bf16.msra.mxu0 %v7174_v38  ;;  %v3926_v38 = vld [vmem:[%s9582_s6] sm:$0xf] }
 0x5b2   : > { %5370 = vmatpush1.bf16.msra.mxu1 %v7177_v25  ;;  %5525 = vmatprep.subr.bf16.mxu0 %v7182_v3  ;;  %v5210_v11 = vsub.s32 0, %v5209_v60  ;;  %v5214_v25 = vsub.s32 1, %v5209_v60  ;;  %v5218_v55 = vsub.s32 2, %v5209_v60 }
 0x5b3   : > { %5371 = vmatprep.subr.bf16.mxu1 %v7185_v14 }
 0x5b4   : > { %v5211_v3 = vrot.slane %v3926_v38, %v5210_v11  ;;  %v5215_v14 = vrot.slane %v3926_v38, %v5214_v25 }
 0x5b5   : > { %5526 = vmatpush1.bf16.msra.mxu0 %v7180_v61 }
 0x5b6   : > { %5372 = vmatpush1.bf16.msra.mxu1 %v7183_v16  ;;  %5527 = vmatprep.subr.bf16.mxu0 %v7188_v7 }
 0x5b7   : > { %5373 = vmatprep.subr.bf16.mxu1 %v7191_v5 }
 0x5b9   : > { %5528 = vmatpush1.bf16.msra.mxu0 %v7186_v48 }
 0x5ba   : > { %5374 = vmatpush1.bf16.msra.mxu1 %v7189_v47  ;;  %5529 = vmatprep.subr.bf16.mxu0 %v7194_v35 }
 0x5bb   : > { %5375 = vmatprep.subr.bf16.mxu1 %v7197_v13 }
 0x5bd   : > { %5530 = vmatpush1.bf16.msra.mxu0 %v7192_v32 }
 0x5be   : > { %5376 = vmatpush1.bf16.msra.mxu1 %v7195_v18  ;;  %5531 = vmatprep.subr.bf16.mxu0 %v7200_v50  ;;  %v7248_v18 = vld [vmem:[%s9583_s7 + $0x80] sm:$0xff]  }
 0x5bf   : > { %5377 = vmatprep.subr.bf16.mxu1 %v7203_v17  ;;  %v7249_v17 = vld [vmem:[%s9583_s7 + $0xc8] sm:$0xff]  }
 0x5c1   : > { %5532 = vmatpush1.bf16.msra.mxu0 %v7198_v9  ;;  %v7250_v9 = vld [vmem:[%s9583_s7 + $0x88] sm:$0xff]  }
 0x5c2   : > { %5378 = vmatpush1.bf16.msra.mxu1 %v7201_v63  ;;  %5533 = vmatprep.subr.bf16.mxu0 %v7206_v62  ;;  %v7251_v63 = vld [vmem:[%s9583_s7 + $0xd0] sm:$0xff]   ;;  %v5222_v62 = vsub.s32 3, %v5209_v60 }
 0x5c3   : > { %5379 = vmatprep.subr.bf16.mxu1 %v7209_v49  ;;  %v7252_v49 = vld [vmem:[%s9583_s7 + $0x90] sm:$0xff]  }
 0x5c5   : > { %5534 = vmatpush1.bf16.msra.mxu0 %v7204_v2  ;;  %v7253_v2 = vld [vmem:[%s9583_s7 + $0xd8] sm:$0xff]  }
 0x5c6   : > { %5380 = vmatpush1.bf16.msra.mxu1 %v7207_v56  ;;  %5535 = vmatprep.subr.bf16.mxu0 %v7212_v28  ;;  %v5223_v56 = vrot.slane %v3926_v38, %v5222_v62  ;;  %v7254_v28 = vld [vmem:[%s9583_s7 + $0x98] sm:$0xff]  }
 0x5c7   : > { %5381 = vmatprep.subr.bf16.mxu1 %v7215_v6 }
 0x5c9   : > { %5536 = vmatpush1.bf16.msra.mxu0 %v7210_v27 }
 0x5ca   : > { %5382 = vmatpush1.bf16.msra.mxu1 %v7213_v34  ;;  %5537 = vmatprep.subr.bf16.mxu0 %v7218_v10 }
 0x5cb   : > { %6494 = vmatprep.subr.bf16.mxu1 %v7231_v24  ;;  %v7256_v24 = vld [vmem:[%s9583_s7 + $0xa0] sm:$0xff]  }
 0x5cd   : > { %5384 = vmatmul.mubr.bf16.vlgmr.msra.gmra.mrb[56].mxu1 %v3668_v58  ;;  %5538 = vmatpush1.bf16.msra.mxu0 %v7216_v20 }
 0x5ce   : > { %5539 = vmatprep.subr.bf16.mxu0 %v7221_v1  ;;  %6495 = vmatpush3.bf16.msra.mxu1 %v7232_v46  ;;  %v7257_v1 = vld [vmem:[%s9583_s7 + $0xe8] sm:$0xff]  }
 0x5cf   : > { %6496 = vmatprep.subr.bf16.mxu1 %v7233_v31  ;;  %v5219_v31 = vrot.slane %v3926_v38, %v5218_v55 }
 0x5d1   : > { %5540 = vmatpush1.bf16.msra.mxu0 %v7219_v33  ;;  %v7259_v33 = vld [vmem:[%s9583_s7 + $0xf0] sm:$0xff]  }
 0x5d2   : > { %5541 = vmatprep.subr.bf16.mxu0 %v7224_v44  ;;  %6497 = vmatpush3.bf16.msra.mxu1 %v7234_v53  ;;  %v7260_v44 = vld [vmem:[%s9583_s7 + $0xb0] sm:$0xff]  }
 0x5d3   : > { %6498 = vmatprep.subr.bf16.mxu1 %v7235_v15  ;;  %v7261_v15 = vld [vmem:[%s9583_s7 + $0xf8] sm:$0xff]  }
 0x5d5   : > { %5542 = vmatpush1.bf16.msra.mxu0 %v7222_v4  ;;  %v7262_v4 = vld [vmem:[%s9583_s7 + $0xb8] sm:$0xff]  }
 0x5d6   : > { %5543 = vmatprep.subr.bf16.mxu0 %v7227_v0  ;;  %6499 = vmatpush3.bf16.msra.mxu1 %v7236_v41 }
 0x5d7   : > { %6500 = vmatprep.subr.bf16.mxu1 %v7237_v43 }
 0x5d9   : > { %5544 = vmatpush1.bf16.msra.mxu0 %v7225_v42 }
 0x5da   : > { %5545 = vmatprep.subr.bf16.mxu0 %v7230_v12  ;;  %6501 = vmatpush3.bf16.msra.mxu1 %v7238_v40 }
 0x5db   : > { %6502 = vmatprep.subr.bf16.mxu1 %v7239_v23 }
 0x5dd   : > { %5546 = vmatpush1.bf16.msra.mxu0 %v7228_v52  ;;  %v5628_v52 = vld [vmem:[%s9584_s8] sm:$0x1] }
 0x5de   : > { %6503 = vmatpush3.bf16.msra.mxu1 %v7240_v36 }
 0x5df   : > { %6504 = vmatprep.subr.bf16.mxu1 %v7241_v19 }
 0x5e0   : > { %5548 = vmatmul.mubr.bf16.vlgmr.msra.gmra.mrb[84].mxu0 %v3668_v58  ;;  %v7258_v58 = vld [vmem:[%s9583_s7 + $0xa8] sm:$0xff]  }
 0x5e2   : > { %6505 = vmatpush3.bf16.msra.mxu1 %v7242_v54 }
 0x5e3   : > { %6506 = vmatprep.subr.bf16.mxu1 %v7243_v45 }
 0x5e6   : > { %6507 = vmatpush3.bf16.msra.mxu1 %v7244_v22 }
 0x5e7   : > { %6508 = vmatprep.subr.bf16.mxu1 %v7245_v57 }
 0x5ea   : > { %6509 = vmatpush3.bf16.msra.mxu1 %v7246_v39 }
 0x5eb   : > { %v2010_v21 = vpop.f32.mrb[80].mxu0  ;;  %6516 = vmatprep.subr.bf16.mxu1 %v7247_v29 }
 0x5ec   : > { %v6630_v37 = vpop.f32.mrb[81].mxu0 }
 0x5ed   : > { %v2013_v8 = vpop.f32.mrb[82].mxu0 }
 0x5ee   : > { %v6631_v59 = vpop.f32.mrb[83].mxu0 }
 0x6a0   : > { %v5385_v61 = vpop.f32.mrb[56].mxu1 }
 0x6a1   : > { %v6664_v16 = vadd.f32 %v5385_v61, %v5211_v3  ;;  %v5387_v7 = vpop.f32.mrb[57].mxu1 }
 0x6a2   : > { %v6665_v5 = vadd.f32 %v5387_v7, %v5215_v14  ;;  %v5389_v48 = vpop.f32.mrb[58].mxu1 }
 0x6a3   : > { %v5556_v47 = vmax.f32 %v6664_v16, 0.0  ;;  %v5390_v35 = vpop.f32.mrb[59].mxu1 }
 0x6a4   : > { %v5557_v13 = vmax.f32 %v6665_v5, 0.0 }
 0x6a5   : > { %v5560_v50 = vpack.c.bf16 %v5556_v47, %v5556_v47 }
 0x6a6   : > { %v5561_v32 = vpack.c.bf16 %v5557_v13, %v5557_v13 }
 0x6a8   : > { %5853 = vmatprep.mubr.bf16.mxu1 %v5561_v32 }
 0x6a9   : > { %5854 = vmatmul.mubr.bf16.vlgmr.msra.gmra.mrb[60].mxu1 %v5560_v50 }
 0x6aa   : > { %6517 = vmatpush3.bf16.msra.mxu1 %v7248_v18 }
 0x6ab   : > { %6518 = vmatprep.subr.bf16.mxu1 %v7249_v17 }
 0x6ae   : > { %6519 = vmatpush3.bf16.msra.mxu1 %v7250_v9 }
 0x6af   : > { %6520 = vmatprep.subr.bf16.mxu1 %v7251_v63 }
 0x6b2   : > { %6521 = vmatpush3.bf16.msra.mxu1 %v7252_v49 }
 0x6b3   : > { %v5549_v6 = vpop.f32.mrb[84].mxu0  ;;  %6522 = vmatprep.subr.bf16.mxu1 %v7253_v2 }
 0x6b4   : > { %v5551_v27 = vpop.f32.mrb[85].mxu0  ;;  %v6666_v53 = vadd.f32 %v5549_v6, %v5219_v31 }
 0x6b5   : > { %v6667_v34 = vadd.f32 %v5551_v27, %v5223_v56  ;;  %v5553_v10 = vpop.f32.mrb[86].mxu0 }
 0x6b6   : > { %6523 = vmatpush3.bf16.msra.mxu1 %v7254_v28  ;;  %v5554_v51 = vpop.f32.mrb[87].mxu0  ;;  %v5558_v0 = vmax.f32 %v6666_v53, 0.0 }
 0x6b7   : > { %v5559_v20 = vmax.f32 %v6667_v34, 0.0  ;;  %6524 = vmatprep.subr.bf16.mxu1 %v7255_v26 }
 0x6b8   : > { %v5562_v41 = vpack.c.bf16 %v5558_v0, %v5558_v0 }
 0x6b9   : > { %v5563_v46 = vpack.c.bf16 %v5559_v20, %v5559_v20 }
 0x6ba   : > { %6525 = vmatpush3.bf16.msra.mxu1 %v7256_v24 }
 0x6bb   : > { %5893 = vmatprep.mubr.bf16.mxu1 %v5563_v46  ;;  %6526 = vmatprep.subr.bf16.mxu1 %v7257_v1 }
 0x6be   : > { %6527 = vmatpush3.bf16.msra.mxu1 %v7258_v58 }
 0x6bf   : > { %6528 = vmatprep.subr.bf16.mxu1 %v7259_v33 }
 0x6c2   : > { %6529 = vmatpush3.bf16.msra.mxu1 %v7260_v44 }
 0x6c3   : > { %6530 = vmatprep.subr.bf16.mxu1 %v7261_v15 }
 0x6c6   : > { %6531 = vmatpush3.bf16.msra.mxu1 %v7262_v4 }
 0x6c9   : > { %5894 = vmatmul.mubr.bf16.vlgmr.msra.gmra.mrb[64].mxu1 %v5562_v41 }
 0x77c   : > { %v6510_v43 = vpop.f32.mrb[60].mxu1 }
 0x77d   : > { %v6511_v42 = vpop.f32.mrb[61].mxu1 }
 0x77e   : > { %v6512_v12 = vadd.f32 %v6511_v42, %v6510_v43  ;;  %v6513_v40 = vpop.f32.mrb[62].mxu1 }
 0x77f   : > { %v6514_v23 = vpop.f32.mrb[63].mxu1 }
 0x780   : > { %v5856_v54 = vadd.f32 %v6512_v12, %v5628_v52 }
 0x79c   : > { %v6532_v36 = vpop.f32.mrb[64].mxu1 }
 0x79d   : > { %v6533_v19 = vpop.f32.mrb[65].mxu1 }
 0x79e   : > { %v6534_v21 = vadd.f32 %v6533_v19, %v6532_v36  ;;  %v6535_v37 = vpop.f32.mrb[66].mxu1 }
 0x79f   : > { %v6536_v8 = vpop.f32.mrb[67].mxu1 }
 0x7a0   : > { %v5896_v59 = vadd.f32 %v6534_v21, %v5856_v54 }
 0x7a2   : > { %5901 = vst [vmem:[%s339_s22] sm:$0x1] %v5896_v59 }
 0x7a3   : > { %7319 = shalt.err (!%p7316_p7)
}
 0x7a4   : > { %s7320_s29 = scalar_lea.hbm %s9534_s24, 16  ;;  %s7324_s22 = scalar_lea.hbm %s9585_s9, 32 }
 0x7a5   : > { %p7321_p8 = scmp.ne.s32.totalorder %s9534_s24, %s7320_s29  ;;  %p7325_p1 = scmp.lt.u32.totalorder %s9534_s24, %s9585_s9 }
 0x7a6   : > { %p7326_p0 = scmp.lt.u32.totalorder %s7324_s22, %s7320_s29  ;;  %p7328_p6 = scmp.lt.u32.totalorder %s7320_s29, %s9534_s24 }
 0x7a7   : > { %p7322_p11 = pnand %p7321_p8, %p9632_p9 }
 0x7a8   : > { %p7327_p5 = por %p7326_p0, %p7325_p1 }
 0x7a9   : > { %p7323_p13 = pneg %p7322_p11 }
 0x7aa   : > { %p7329_p10 = por %p7328_p6, %p7327_p5 }
 0x7ac   : > { %p7330_p12 = pnand %p7329_p10, %p7323_p13 }
 0x7ae   : > { %7333 = shalt.err (!%p7330_p12)
}
 0x7af   : > { %6697 = dma.vmem_to_hbm [thread:$0]  (%p9632_p9), %s9536_s16, 16, %s9534_s24, %s5903_s21  }
 0x7b0 PF: > { %p6709_p2 = scmp.ge.s32.totalorder %s7372_s12, 2  ;;  %s5927_s13 = sand.u32 1, %s7360_s30  }
 0x7b1   : > { %p9633_p3 = scmp.ne.s32.totalorder %s9602_s20, 0  ;;  %s5928_s17 = scalar_lea.sflag [#allocation7], %s5927_s13 }
 0x7b3   : > { %p6704_p4 = pnand %p6709_p2, %p9633_p3 }
 0x7b5   : > { %7355 = dma.done.wait (!%p6704_p4), %s5928_s17, 16  }
 0x7b6   : > { %7357 = vsyncadd (!%p6704_p4), %s5928_s17, 4294967280  ;;  %p20_p7 = scmp.ge.s32.totalorder %s7465_s15, 4   ;;  %s9634_s30 = smov %s7364_s10 }
 0x7b7   : > { %s9635_s10 = smov %s7368_s11  ;;  %s9636_s11 = smov %s7476_s18 }
 0x7b8   : > { %s9637_s12 = smov %s7465_s15  ;;  %22 = sbr.rel (!%p20_p7) target bundleno = 4 (0x4), region = 104 }
 0x7bf   :  { %5932 = vsyncpa [#allocation6], 1 }
 0x7c0   :  { %5934 = vsyncpa [#allocation6 + $0x1], 1 }
 0x7c1   :  { %5935 = vsyncpa [#allocation7], 1 }
 0x7c2   :  { %5937 = vsyncpa [#allocation7 + $0x1], 1 }

</bundles_post_ra>
